<compile_context>
chip_gen: v7x
topology: tpu7x:2x2x1
jax: 0.10.0
libtpu: 0.0.40
codegen_flags: <defaults>
</compile_context>

<pallas_src>
import functools

import jax
import jax.numpy as jnp
import numpy as np
from jax.experimental import pallas as pl
from jax.experimental.pallas import tpu as pltpu

_LANE = 128
_DEF_VMEM_CAP = 64 * 1024 * 1024  # v7x physical VMEM (most restrictive part)


def _round_up(x, m):
    return ((x + m - 1) // m) * m


def _vmem_capacity_bytes():
    """Best-effort hardware VMEM capacity query (falls back to v7x's 64 MiB)."""
    try:
        info = pltpu.get_tpu_info()
        for name in ("vmem_capacity_bytes", "vmem_size_bytes", "vmem_bytes"):
            v = getattr(info, name, None)
            if v:
                return int(v)
    except Exception:
        pass
    return _DEF_VMEM_CAP


def _vmem_limit(need_bytes, cap):
    """Scoped-VMEM limit derived from the actual block working set."""
    return int(max(16 << 20, min(2 * need_bytes + (8 << 20), cap * 3 // 4)))


# ----------------------------------------------------------------------------
# Pallas kernels
# ----------------------------------------------------------------------------
def _fused_layer_kernel(*refs, kh, kw, stride, ho, wo, inv_p, eps, activate,
                        skip_mode):
    """Whole-sample fused layer: conv (single K=kh*kw*Cin bf16 matmul) + bias +
    GroupNorm (exact centering) + affine (+ fused 1x1-conv / identity skip) +
    Swish.  Grid = (N,)."""
    if skip_mode == "conv":
        (xps_ref, w_ref, b_ref, g_ref, be_ref, gavg_ref,
         sx_ref, sw_ref, sb_ref, o_ref) = refs
    elif skip_mode == "add":
        (xps_ref, w_ref, b_ref, g_ref, be_ref, gavg_ref, sk_ref, o_ref) = refs
    else:
        (xps_ref, w_ref, b_ref, g_ref, be_ref, gavg_ref, o_ref) = refs

    cin = xps_ref.shape[-1]

    # Assemble the (P, kh*kw*Cin) patch from unit-stride shifted slices of the
    # phase-split padded input; one MXU matmul does the whole conv.
    taps = []
    for dy in range(kh):
        for dx in range(kw):
            ph, oy = dy % stride, dy // stride
            pw, ox = dx % stride, dx // stride
            xt = xps_ref[ph * stride + pw, pl.ds(oy, ho), pl.ds(ox, wo), :]
            taps.append(xt.reshape(ho * wo, cin))
    patch = jnp.concatenate(taps, axis=-1).astype(jnp.bfloat16)

    y = jnp.dot(patch, w_ref[...], preferred_element_type=jnp.float32)
    y = y + b_ref[...]                                        # (P, Cp) f32

    # GroupNorm with exact centering (avoids E[x^2]-E[x]^2 cancellation).
    # gavg is the resident (Cp, Cp) group-average matrix (1/cg on same real
    # group, 0 elsewhere); inv_p = 1/P folds the spatial divisor.
    ch_sum = jnp.sum(y, axis=0, keepdims=True)                # (1, Cp)
    mean_c = jnp.dot(ch_sum, gavg_ref[...],
                     preferred_element_type=jnp.float32) * inv_p
    yc = y - mean_c
    ch_sq = jnp.sum(yc * yc, axis=0, keepdims=True)
    var_c = jnp.dot(ch_sq, gavg_ref[...],
                    preferred_element_type=jnp.float32) * inv_p
    inv_std = jax.lax.rsqrt(var_c + eps)
    z = yc * (inv_std * g_ref[...]) + be_ref[...]

    if skip_mode == "conv":                                   # fused 1x1 skip
        skip = jnp.dot(sx_ref[0].astype(jnp.bfloat16), sw_ref[...],
                       preferred_element_type=jnp.float32) + sb_ref[...]
        z = z + skip
    elif skip_mode == "add":                                  # identity skip
        z = z + sk_ref[0].astype(jnp.float32)
    if activate or skip_mode is not None:
        z = z * jax.nn.sigmoid(z)                             # Swish
    o_ref[0] = z.astype(o_ref.dtype)


def _conv_pstats_kernel(xps_ref, w_ref, b_ref, conv_ref, stats_ref,
                        *, kh, kw, stride, th, wo):
    """Two-pass fallback, pass 1: conv + bias for one output row-tile.
    Emits the conv tile (bf16) plus per-tile partial sum / sumsq (f32) so BOTH
    grid axes stay 'parallel' (no cross-tile accumulation)."""
    j = pl.program_id(1)
    row0 = j * th
    cin = xps_ref.shape[-1]
    taps = []
    for dy in range(kh):
        for dx in range(kw):
            ph, oy = dy % stride, dy // stride
            pw, ox = dx % stride, dx // stride
            xt = xps_ref[ph * stride + pw, pl.ds(row0 + oy, th),
                         pl.ds(ox, wo), :]
            taps.append(xt.reshape(th * wo, cin))
    patch = jnp.concatenate(taps, axis=-1).astype(jnp.bfloat16)
    y = jnp.dot(patch, w_ref[...], preferred_element_type=jnp.float32)
    y = y + b_ref[...]
    conv_ref[0] = y.astype(conv_ref.dtype)
    # direct row writes (no concatenate / relayout)
    stats_ref[0, 0, pl.ds(0, 1), :] = jnp.sum(y, axis=0, keepdims=True)
    stats_ref[0, 0, pl.ds(1, 1), :] = jnp.sum(y * y, axis=0, keepdims=True)


def _norm_act_kernel(*refs, activate, skip_mode):
    """Two-pass fallback, pass 2: y*scale + shift (scale/shift fold GN
    mean / inv_std / affine, precomputed per sample) + optional fused skip +
    Swish."""
    if skip_mode == "conv":
        conv_ref, sc_ref, sh_ref, sx_ref, sw_ref, sb_ref, o_ref = refs
    elif skip_mode == "add":
        conv_ref, sc_ref, sh_ref, sk_ref, o_ref = refs
    else:
        conv_ref, sc_ref, sh_ref, o_ref = refs

    z = conv_ref[0].astype(jnp.float32) * sc_ref[0] + sh_ref[0]
    if skip_mode == "conv":
        z = z + jnp.dot(sx_ref[0].astype(jnp.bfloat16), sw_ref[...],
                        preferred_element_type=jnp.float32) + sb_ref[...]
    elif skip_mode == "add":
        z = z + sk_ref[0].astype(jnp.float32)
    if activate or skip_mode is not None:
        z = z * jax.nn.sigmoid(z)
    o_ref[0] = z.astype(o_ref.dtype)


# ----------------------------------------------------------------------------
# Plain-JAX glue (layout only: pad, stride-phase split)
# ----------------------------------------------------------------------------
def _phase_split(x_nhwc, pad, stride):
    """Zero-pad and split into stride phases so every conv tap becomes a
    unit-stride shifted slice inside the kernel.  Returns (N*s*s, Hs, Ws, C)."""
    n, h, w, c = x_nhwc.shape
    hp, wp = h + 2 * pad, w + 2 * pad
    hp_r = _round_up(hp, stride)
    wp_r = _round_up(wp, stride)
    xp = jnp.pad(x_nhwc, ((0, 0), (pad, hp_r - h - pad),
                          (pad, wp_r - w - pad), (0, 0)))
    hs, ws = hp_r // stride, wp_r // stride
    xps = xp.reshape(n, hs, stride, ws, stride, c)
    xps = jnp.transpose(xps, (0, 2, 4, 1, 3, 5))       # (n, sh, sw, hs, ws, c)
    return xps.reshape(n * stride * stride, hs, ws, c), hs, ws


def _pick_row_tile(ho, wo, fixed_bytes, rows_bytes_fn, budget):
    """Largest divisor t of ho with (t*wo) 8-aligned (or full) that fits the
    VMEM budget; degrades to the smallest valid divisor otherwise."""
    smallest_valid = ho
    for t in range(ho, 0, -1):
        if ho % t:
            continue
        if not (t == ho or (t * wo) % 8 == 0):
            continue
        smallest_valid = t
        if fixed_bytes + rows_bytes_fn(t) <= budget:
            return t
    return smallest_valid


# ----------------------------------------------------------------------------
# One Conv2d -> GroupNorm -> (Swish) layer (optionally with the fused skip)
# ----------------------------------------------------------------------------
def conv_groupnorm(x_nhwc, layer, gavg, *, ksize, stride, padding, activate,
                   skip=None, out_dtype=None, eps=1e-5):
    """`skip` is None, or ("conv", xs_flat, skip_w, skip_b) / ("add", skip_flat)
    fused into the last layer (residual add + final Swish).
    Returns (n, ho, wo, Cp) with channel-padded (lane-dense) outputs."""
    n, h, w_in, cin = x_nhwc.shape
    w_km, b2, g2, be2 = layer["w"], layer["b"], layer["gamma"], layer["beta"]
    kk = ksize
    cp = w_km.shape[-1]
    assert w_km.shape[0] == kk * kk * cin
    ho = (h + 2 * padding - kk) // stride + 1
    wo = (w_in + 2 * padding - kk) // stride + 1
    p_total = ho * wo
    out_dtype = out_dtype or x_nhwc.dtype

    xps, hs, ws = _phase_split(x_nhwc, padding, stride)
    s2 = stride * stride
    item = x_nhwc.dtype.itemsize
    skip_mode = None if skip is None else skip[0]

    # ---- VMEM sizing (derived from the actual block sizes) -----------------
    cap = _vmem_capacity_bytes()
    budget = int(cap * 0.55)
    kdepth = kk * kk * cin
    bytes_const = (kdepth * cp * 2        # weight (bf16)
                   + cp * cp * 4          # group-average matrix
                   + 3 * cp * 4)          # bias / gamma / beta
    bytes_xps = 2 * s2 * hs * ws * cin * item     # double-buffered input
    if skip_mode == "conv":
        bytes_skip_const = skip[2].shape[0] * cp * 2 + cp * 4
        skip_row = wo * skip[1].shape[-1] * skip[1].dtype.itemsize
    elif skip_mode == "add":
        bytes_skip_const = 0
        skip_row = wo * cp * skip[1].dtype.itemsize
    else:
        bytes_skip_const = 0
        skip_row = 0

    def _rows_bytes(rows):
        tp = rows * wo
        return (2 * tp * cp * 4            # double-buffered f32 output tile
                + tp * kdepth * 2          # assembled patch (bf16)
                + 4 * tp * cp * 4          # f32 temporaries (y / yc / z / skip)
                + 2 * rows * skip_row)     # double-buffered skip input tile

    need_fused = bytes_const + bytes_xps + bytes_skip_const + _rows_bytes(ho)

    # ---- fused whole-sample path (no conv_out HBM round trip) --------------
    if need_fused <= budget:
        kern = functools.partial(
            _fused_layer_kernel, kh=kk, kw=kk, stride=stride, ho=ho, wo=wo,
            inv_p=1.0 / p_total, eps=eps, activate=activate,
            skip_mode=skip_mode)
        inputs = [xps, w_km, b2, g2, be2, gavg]
        in_specs = [
            pl.BlockSpec((s2, hs, ws, cin), lambda i: (i, 0, 0, 0)),
            pl.BlockSpec(w_km.shape, lambda i: (0, 0)),
            pl.BlockSpec((1, cp), lambda i: (0, 0)),
            pl.BlockSpec((1, cp), lambda i: (0, 0)),
            pl.BlockSpec((1, cp), lambda i: (0, 0)),
            pl.BlockSpec((cp, cp), lambda i: (0, 0)),
        ]
        if skip_mode == "conv":
            _, xs_flat, sw, sb = skip
            inputs += [xs_flat, sw, sb]
            in_specs += [
                pl.BlockSpec((1, p_total, xs_flat.shape[-1]),
                             lambda i: (i, 0, 0)),
                pl.BlockSpec(sw.shape, lambda i: (0, 0)),
                pl.BlockSpec((1, cp), lambda i: (0, 0)),
            ]
        elif skip_mode == "add":
            _, sk_flat = skip
            inputs += [sk_flat]
            in_specs += [pl.BlockSpec((1, p_total, cp), lambda i: (i, 0, 0))]

        out = pl.pallas_call(
            kern,
            grid=(n,),
            out_shape=jax.ShapeDtypeStruct((n, p_total, cp), out_dtype),
            in_specs=in_specs,
            out_specs=pl.BlockSpec((1, p_total, cp), lambda i: (i, 0, 0)),
            compiler_params=pltpu.CompilerParams(
                dimension_semantics=("parallel",),
                vmem_limit_bytes=_vmem_limit(need_fused, cap)),
        )(*inputs)
        return out.reshape(n, ho, wo, cp)

    # ---- two-pass fallback (spatial row-tiling) -----------------------------
    fixed = bytes_const + bytes_xps + bytes_skip_const
    th = _pick_row_tile(ho, wo, fixed, _rows_bytes, budget)
    pt = ho // th
    tp = th * wo
    limit = _vmem_limit(fixed + _rows_bytes(th), cap)

    conv_kern = functools.partial(_conv_pstats_kernel, kh=kk, kw=kk,
                                  stride=stride, th=th, wo=wo)
    conv_out, stats = pl.pallas_call(
        conv_kern,
        grid=(n, pt),
        out_shape=(jax.ShapeDtypeStruct((n, p_total, cp), jnp.bfloat16),
                   jax.ShapeDtypeStruct((n, pt, 2, cp), jnp.float32)),
        in_specs=[
            pl.BlockSpec((s2, hs, ws, cin), lambda i, j: (i, 0, 0, 0)),
            pl.BlockSpec(w_km.shape, lambda i, j: (0, 0)),
            pl.BlockSpec((1, cp), lambda i, j: (0, 0)),
        ],
        out_specs=(pl.BlockSpec((1, tp, cp), lambda i, j: (i, j, 0)),
                   pl.BlockSpec((1, 1, 2, cp), lambda i, j: (i, j, 0, 0))),
        compiler_params=pltpu.CompilerParams(
            dimension_semantics=("parallel", "parallel"),
            vmem_limit_bytes=limit),
    )(xps, w_km, b2)

    # Tiny per-sample GroupNorm statistics folded into scale/shift in plain
    # JAX (removes per-tile selector matmul / rsqrt from the kernel).
    ch_sum = jnp.sum(stats[:, :, 0, :], axis=1)               # (n, Cp)
    ch_sq = jnp.sum(stats[:, :, 1, :], axis=1)
    mean_c = (ch_sum @ gavg) / p_total
    ex2_c = (ch_sq @ gavg) / p_total
    # TODO(synk): E[x^2]-E[x]^2 can cancel for large-mean activations; the
    # fused (single-tile) path above centers exactly, this fallback clamps.
    var_c = jnp.maximum(ex2_c - mean_c * mean_c, 0.0)
    inv_std = jax.lax.rsqrt(var_c + eps)
    scale = (inv_std * g2)[:, None, :]                        # (n, 1, Cp)
    shift = (be2 - mean_c * inv_std * g2)[:, None, :]

    act_kern = functools.partial(_norm_act_kernel, activate=activate,
                                 skip_mode=skip_mode)
    inputs = [conv_out, scale, shift]
    in_specs = [pl.BlockSpec((1, tp, cp), lambda i, j: (i, j, 0)),
                pl.BlockSpec((1, 1, cp), lambda i, j: (i, 0, 0)),
                pl.BlockSpec((1, 1, cp), lambda i, j: (i, 0, 0))]
    if skip_mode == "conv":
        _, xs_flat, sw, sb = skip
        inputs += [xs_flat, sw, sb]
        in_specs += [pl.BlockSpec((1, tp, xs_flat.shape[-1]),
                                  lambda i, j: (i, j, 0)),
                     pl.BlockSpec(sw.shape, lambda i, j: (0, 0)),
                     pl.BlockSpec((1, cp), lambda i, j: (0, 0))]
    elif skip_mode == "add":
        _, sk_flat = skip
        inputs += [sk_flat]
        in_specs += [pl.BlockSpec((1, tp, cp), lambda i, j: (i, j, 0))]

    out = pl.pallas_call(
        act_kern,
        grid=(n, pt),
        out_shape=jax.ShapeDtypeStruct((n, p_total, cp), out_dtype),
        in_specs=in_specs,
        out_specs=pl.BlockSpec((1, tp, cp), lambda i, j: (i, j, 0)),
        compiler_params=pltpu.CompilerParams(
            dimension_semantics=("parallel", "parallel"),
            vmem_limit_bytes=limit),
    )(*inputs)
    return out.reshape(n, ho, wo, cp)


# ----------------------------------------------------------------------------
# EncoderBlock: init (natural params), pack (lane-dense bf16 params), forward
# ----------------------------------------------------------------------------
def init_encoder_block(key, in_c, out_c, kernel_size, stride, deep=3,
                       num_groups=4):
    padding = kernel_size // 2
    config = {"in_c": in_c, "out_c": out_c, "ksize": kernel_size,
              "stride": stride, "padding": padding, "num_groups": num_groups,
              "has_skip": (in_c != out_c or stride != 1), "blocks": []}
    params = {"blocks": [], "skip_w": None, "skip_b": None}

    def conv_init(k, kh, kw, ci, co):
        fan_in = kh * kw * ci
        bound = 1.0 / np.sqrt(fan_in)
        k1, k2 = jax.random.split(k)
        w = jax.random.uniform(k1, (kh, kw, ci, co), jnp.float32, -bound, bound)
        b = jax.random.uniform(k2, (co,), jnp.float32, -bound, bound)
        return w, b

    cfgs = [(in_c, out_c, stride, True)]
    for _ in range(deep - 2):
        cfgs.append((out_c, out_c, 1, True))
    cfgs.append((out_c, out_c, 1, False))

    keys = jax.random.split(key, len(cfgs) + 1)
    for k, (ci, co, s, act) in zip(keys[:-1], cfgs):
        kw_, kg_, kb_ = jax.random.split(k, 3)
        w, b = conv_init(kw_, kernel_size, kernel_size, ci, co)
        gamma = 1.0 + 0.1 * jax.random.normal(kg_, (co,), jnp.float32)
        beta = 0.1 * jax.random.normal(kb_, (co,), jnp.float32)
        params["blocks"].append({"w": w, "b": b, "gamma": gamma, "beta": beta})
        config["blocks"].append({"stride": s, "activate": act, "cin": ci})

    if config["has_skip"]:
        w, b = conv_init(keys[-1], 1, 1, in_c, out_c)
        params["skip_w"] = w.reshape(in_c, out_c)
        params["skip_b"] = b
    return config, params


def _pad_vec(v, cp):
    return jnp.zeros((1, cp), jnp.float32).at[0, :v.shape[0]].set(
        v.astype(jnp.float32))


def pack_encoder_params(config, params):
    """Channel-pad to lane-dense Cp = roundup(out_c, 128), reshape conv weights
    to (kh*kw*Cin, Cp) bf16, and precompute the group-average matrix."""
    out_c = config["out_c"]
    cp = _round_up(out_c, _LANE)
    cg = out_c // config["num_groups"]

    packed = {"layers": [], "skip_w": None, "skip_b": None}
    for li, (bcfg, bpar) in enumerate(zip(config["blocks"], params["blocks"])):
        ci = bcfg["cin"]
        ci_p = ci if li == 0 else cp      # interior layers consume padded acts
        kh, kw_, _, co = bpar["w"].shape
        wp = jnp.zeros((kh, kw_, ci_p, cp), jnp.float32)
        wp = wp.at[:, :, :ci, :co].set(bpar["w"])
        packed["layers"].append({
            "w": wp.reshape(kh * kw_ * ci_p, cp).astype(jnp.bfloat16),
            "b": _pad_vec(bpar["b"], cp),
            "gamma": _pad_vec(bpar["gamma"], cp),
            "beta": _pad_vec(bpar["beta"], cp),
        })

    if config["has_skip"]:
        in_c = config["in_c"]
        swp = jnp.zeros((in_c, cp), jnp.float32).at[:, :out_c].set(
            params["skip_w"])
        packed["skip_w"] = swp.astype(jnp.bfloat16)
        packed["skip_b"] = _pad_vec(params["skip_b"], cp)

    # gavg[i, j] = 1/cg iff real channels i, j share a GroupNorm group (padded
    # channels map to nothing).  Precomputed once, VMEM-resident in the kernel.
    idx = np.arange(cp)
    same = ((idx[:, None] // cg) == (idx[None, :] // cg)) \
        & (idx[:, None] < out_c) & (idx[None, :] < out_c)
    packed["gavg"] = jnp.asarray(same.astype(np.float32) / cg)
    return packed


def encoder_block_forward(config, packed, x_nchw):
    x = jnp.transpose(x_nchw, (0, 2, 3, 1))               # NCHW -> NHWC
    n, h, w, in_c = x.shape
    out_c = config["out_c"]
    cp = _round_up(out_c, _LANE)
    stride, padding, ksize = config["stride"], config["padding"], config["ksize"]

    # Skip path is fused into the last layer's kernel (no separate conv1x1
    # pallas_call and no HBM round trip of the skip tensor).
    if config["has_skip"]:
        xs = x[:, ::stride, ::stride, :]
        skip_args = ("conv", xs.reshape(n, -1, in_c),
                     packed["skip_w"], packed["skip_b"])
    else:
        xpad = jnp.zeros((n, h * w, cp), x.dtype).at[..., :in_c].set(
            x.reshape(n, h * w, in_c))
        skip_args = ("add", xpad)

    h_act = x
    nl = len(config["blocks"])
    for li, (bcfg, lp) in enumerate(zip(config["blocks"], packed["layers"])):
        last = (li == nl - 1)
        h_act = conv_groupnorm(
            h_act, lp, packed["gavg"],
            ksize=ksize, stride=bcfg["stride"], padding=padding,
            activate=bcfg["activate"],
            skip=skip_args if last else None,
            out_dtype=x.dtype)
    out = h_act[..., :out_c]                               # un-pad channels
    return jnp.transpose(out, (0, 3, 1, 2))                # NHWC -> NCHW


# ----------------------------------------------------------------------------
# Pure-JAX reference (for correctness check)
# ----------------------------------------------------------------------------
def _ref_conv_gn(x, w, b, gamma, beta, stride, padding, num_groups, activate,
                 eps=1e-5):
    y = jax.lax.conv_general_dilated(
        x, w, window_strides=(stride, stride),
        padding=[(padding, padding), (padding, padding)],
        dimension_numbers=("NHWC", "HWIO", "NHWC"),
        precision=jax.lax.Precision.HIGHEST)
    y = y + b
    n, ho, wo, c = y.shape
    cg = c // num_groups
    yg = y.reshape(n, ho, wo, num_groups, cg)
    mean = yg.mean(axis=(1, 2, 4), keepdims=True)
    var = yg.var(axis=(1, 2, 4), keepdims=True)
    yg = (yg - mean) / jnp.sqrt(var + eps)
    y = yg.reshape(n, ho, wo, c) * gamma + beta
    if activate:
        y = y * jax.nn.sigmoid(y)
    return y


def _ref_forward(config, params, x_nchw):
    x = jnp.transpose(x_nchw, (0, 2, 3, 1))
    stride, padding = config["stride"], config["padding"]
    if config["has_skip"]:
        skip = jnp.einsum("nhwc,cd->nhwd", x[:, ::stride, ::stride, :],
                          params["skip_w"],
                          precision=jax.lax.Precision.HIGHEST)
        skip = skip + params["skip_b"]
    else:
        skip = x
    h = x
    for bcfg, bpar in zip(config["blocks"], params["blocks"]):
        h = _ref_conv_gn(h, bpar["w"], bpar["b"], bpar["gamma"], bpar["beta"],
                         bcfg["stride"], padding, config["num_groups"],
                         bcfg["activate"])
    y = h + skip
    y = y * jax.nn.sigmoid(y)
    return jnp.transpose(y, (0, 3, 1, 2))


# ----------------------------------------------------------------------------
if __name__ == "__main__":
    key = jax.random.PRNGKey(0)
    kp, kx = jax.random.split(key)

    N, IN_C, OUT_C, H, W = 2, 4, 8, 16, 16
    KS, STRIDE, DEEP, GROUPS = 3, 2, 3, 4

    config, params = init_encoder_block(kp, IN_C, OUT_C, KS, STRIDE, deep=DEEP,
                                        num_groups=GROUPS)
    packed = pack_encoder_params(config, params)
    x = jax.random.normal(kx, (N, IN_C, H, W), jnp.float32)

    fwd = jax.jit(functools.partial(encoder_block_forward, config))
    out = jax.block_until_ready(fwd(packed, x))

    # The reference uses the same bf16-rounded weights the kernel's MXU
    # consumes; all other reference math (conv accumulation, GroupNorm, skip)
    # stays f32/HIGHEST.
    rbf = lambda a: a.astype(jnp.bfloat16).astype(jnp.float32)
    ref_params = {
        "blocks": [dict(b, w=rbf(b["w"])) for b in params["blocks"]],
        "skip_w": rbf(params["skip_w"]) if params["skip_w"] is not None else None,
        "skip_b": params["skip_b"],
    }
    ref = jax.block_until_ready(_ref_forward(config, ref_params, x))

    np.testing.assert_allclose(np.asarray(out), np.asarray(ref),
                               rtol=2e-2, atol=2e-2)
    assert out.shape == (N, OUT_C, H // STRIDE, W // STRIDE)

    print("KERNEL_OK")
</pallas_src>

<mosaic_0001>
module attributes {stable_mosaic.version = 11 : i64} {
  func.func @_fused_layer_kernel(%arg0: i32, %arg1: memref<4x9x9x4xf32, #tpu.memory_space<vmem>>, %arg2: memref<36x128xbf16, #tpu.memory_space<vmem>>, %arg3: memref<1x128xf32, #tpu.memory_space<vmem>>, %arg4: memref<1x128xf32, #tpu.memory_space<vmem>>, %arg5: memref<1x128xf32, #tpu.memory_space<vmem>>, %arg6: memref<128x128xf32, #tpu.memory_space<vmem>>, %arg7: memref<1x64x128xf32, #tpu.memory_space<vmem>>) attributes {dimension_semantics = [#tpu.dimension_semantics<parallel>], iteration_bounds = array<i64: 2>, scalar_prefetch = 0 : i64, scratch_operands = 0 : i64, tpu.core_type = #tpu.core_type<tc>, window_params = [{transform_indices = @transform_0, window_bounds = array<i64: 4, 9, 9, 4>}, {pipeline_mode = #tpu.pipeline_mode<synchronous>, transform_indices = @transform_1, window_bounds = array<i64: 36, 128>}, {pipeline_mode = #tpu.pipeline_mode<synchronous>, transform_indices = @transform_2, window_bounds = array<i64: 1, 128>}, {pipeline_mode = #tpu.pipeline_mode<synchronous>, transform_indices = @transform_3, window_bounds = array<i64: 1, 128>}, {pipeline_mode = #tpu.pipeline_mode<synchronous>, transform_indices = @transform_4, window_bounds = array<i64: 1, 128>}, {pipeline_mode = #tpu.pipeline_mode<synchronous>, transform_indices = @transform_5, window_bounds = array<i64: 128, 128>}, {transform_indices = @transform_6, window_bounds = array<i64: 1, 64, 128>}]} {
    %c0 = arith.constant 0 : index
    %c0_0 = arith.constant 0 : index
    %c0_1 = arith.constant 0 : index
    %c0_2 = arith.constant 0 : index
    %0 = vector.load %arg1[%c0, %c0_0, %c0_1, %c0_2] : memref<4x9x9x4xf32, #tpu.memory_space<vmem>>, vector<1x8x8x4xf32>
    %1 = vector.shape_cast %0 : vector<1x8x8x4xf32> to vector<8x8x4xf32>
    %2 = vector.shape_cast %1 : vector<8x8x4xf32> to vector<64x4xf32>
    %c1 = arith.constant 1 : index
    %c0_3 = arith.constant 0 : index
    %c0_4 = arith.constant 0 : index
    %c0_5 = arith.constant 0 : index
    %3 = vector.load %arg1[%c1, %c0_3, %c0_4, %c0_5] : memref<4x9x9x4xf32, #tpu.memory_space<vmem>>, vector<1x8x8x4xf32>
    %4 = vector.shape_cast %3 : vector<1x8x8x4xf32> to vector<8x8x4xf32>
    %5 = vector.shape_cast %4 : vector<8x8x4xf32> to vector<64x4xf32>
    %c0_6 = arith.constant 0 : index
    %c0_7 = arith.constant 0 : index
    %c1_8 = arith.constant 1 : index
    %c0_9 = arith.constant 0 : index
    %6 = vector.load %arg1[%c0_6, %c0_7, %c1_8, %c0_9] : memref<4x9x9x4xf32, #tpu.memory_space<vmem>>, vector<1x8x8x4xf32>
    %7 = vector.shape_cast %6 : vector<1x8x8x4xf32> to vector<8x8x4xf32>
    %8 = vector.shape_cast %7 : vector<8x8x4xf32> to vector<64x4xf32>
    %c2 = arith.constant 2 : index
    %c0_10 = arith.constant 0 : index
    %c0_11 = arith.constant 0 : index
    %c0_12 = arith.constant 0 : index
    %9 = vector.load %arg1[%c2, %c0_10, %c0_11, %c0_12] : memref<4x9x9x4xf32, #tpu.memory_space<vmem>>, vector<1x8x8x4xf32>
    %10 = vector.shape_cast %9 : vector<1x8x8x4xf32> to vector<8x8x4xf32>
    %11 = vector.shape_cast %10 : vector<8x8x4xf32> to vector<64x4xf32>
    %c3 = arith.constant 3 : index
    %c0_13 = arith.constant 0 : index
    %c0_14 = arith.constant 0 : index
    %c0_15 = arith.constant 0 : index
    %12 = vector.load %arg1[%c3, %c0_13, %c0_14, %c0_15] : memref<4x9x9x4xf32, #tpu.memory_space<vmem>>, vector<1x8x8x4xf32>
    %13 = vector.shape_cast %12 : vector<1x8x8x4xf32> to vector<8x8x4xf32>
    %14 = vector.shape_cast %13 : vector<8x8x4xf32> to vector<64x4xf32>
    %c2_16 = arith.constant 2 : index
    %c0_17 = arith.constant 0 : index
    %c1_18 = arith.constant 1 : index
    %c0_19 = arith.constant 0 : index
    %15 = vector.load %arg1[%c2_16, %c0_17, %c1_18, %c0_19] : memref<4x9x9x4xf32, #tpu.memory_space<vmem>>, vector<1x8x8x4xf32>
    %16 = vector.shape_cast %15 : vector<1x8x8x4xf32> to vector<8x8x4xf32>
    %17 = vector.shape_cast %16 : vector<8x8x4xf32> to vector<64x4xf32>
    %c0_20 = arith.constant 0 : index
    %c1_21 = arith.constant 1 : index
    %c0_22 = arith.constant 0 : index
    %c0_23 = arith.constant 0 : index
    %18 = vector.load %arg1[%c0_20, %c1_21, %c0_22, %c0_23] : memref<4x9x9x4xf32, #tpu.memory_space<vmem>>, vector<1x8x8x4xf32>
    %19 = vector.shape_cast %18 : vector<1x8x8x4xf32> to vector<8x8x4xf32>
    %20 = vector.shape_cast %19 : vector<8x8x4xf32> to vector<64x4xf32>
    %c1_24 = arith.constant 1 : index
    %c1_25 = arith.constant 1 : index
    %c0_26 = arith.constant 0 : index
    %c0_27 = arith.constant 0 : index
    %21 = vector.load %arg1[%c1_24, %c1_25, %c0_26, %c0_27] : memref<4x9x9x4xf32, #tpu.memory_space<vmem>>, vector<1x8x8x4xf32>
    %22 = vector.shape_cast %21 : vector<1x8x8x4xf32> to vector<8x8x4xf32>
    %23 = vector.shape_cast %22 : vector<8x8x4xf32> to vector<64x4xf32>
    %c0_28 = arith.constant 0 : index
    %c1_29 = arith.constant 1 : index
    %c1_30 = arith.constant 1 : index
    %c0_31 = arith.constant 0 : index
    %24 = vector.load %arg1[%c0_28, %c1_29, %c1_30, %c0_31] : memref<4x9x9x4xf32, #tpu.memory_space<vmem>>, vector<1x8x8x4xf32>
    %25 = vector.shape_cast %24 : vector<1x8x8x4xf32> to vector<8x8x4xf32>
    %26 = vector.shape_cast %25 : vector<8x8x4xf32> to vector<64x4xf32>
    %27 = tpu.concatenate %2, %5, %8, %11, %14, %17, %20, %23, %26 in 1 : vector<64x4xf32>, vector<64x4xf32>, vector<64x4xf32>, vector<64x4xf32>, vector<64x4xf32>, vector<64x4xf32>, vector<64x4xf32>, vector<64x4xf32>, vector<64x4xf32> -> vector<64x36xf32>
    %28 = arith.truncf %27 : vector<64x36xf32> to vector<64x36xbf16>
    %c0_32 = arith.constant 0 : index
    %c0_33 = arith.constant 0 : index
    %29 = vector.load %arg2[%c0_32, %c0_33] : memref<36x128xbf16, #tpu.memory_space<vmem>>, vector<36x128xbf16>
    %cst = arith.constant dense<0.000000e+00> : vector<64x128xf32>
    %30 = tpu.matmul %28, %29, %cst {dimension_numbers = #tpu.dot_dimension_numbers<[1], [0], [0], [1], [0, 0, 1, 1], [], []>} : vector<64x36xbf16>, vector<36x128xbf16>, vector<64x128xf32> -> vector<64x128xf32>
    %c0_34 = arith.constant 0 : index
    %c0_35 = arith.constant 0 : index
    %31 = vector.load %arg3[%c0_34, %c0_35] : memref<1x128xf32, #tpu.memory_space<vmem>>, vector<1x128xf32>
    %32 = vector.broadcast %31 : vector<1x128xf32> to vector<64x128xf32>
    %33 = arith.addf %30, %32 : vector<64x128xf32>
    %cst_36 = arith.constant dense<0.000000e+00> : vector<128xf32>
    %34 = vector.multi_reduction <add>, %33, %cst_36 [0] : vector<64x128xf32> to vector<128xf32>
    %35 = vector.shape_cast %34 : vector<128xf32> to vector<1x128xf32>
    %c0_37 = arith.constant 0 : index
    %c0_38 = arith.constant 0 : index
    %36 = vector.load %arg6[%c0_37, %c0_38] : memref<128x128xf32, #tpu.memory_space<vmem>>, vector<128x128xf32>
    %cst_39 = arith.constant dense<0.000000e+00> : vector<1x128xf32>
    %37 = tpu.matmul %35, %36, %cst_39 {dimension_numbers = #tpu.dot_dimension_numbers<[1], [0], [0], [1], [0, 0, 1, 1], [], []>} : vector<1x128xf32>, vector<128x128xf32>, vector<1x128xf32> -> vector<1x128xf32>
    %cst_40 = arith.constant 1.562500e-02 : f32
    %38 = vector.broadcast %cst_40 : f32 to vector<1x128xf32>
    %39 = arith.mulf %37, %38 : vector<1x128xf32>
    %40 = vector.broadcast %39 : vector<1x128xf32> to vector<64x128xf32>
    %41 = arith.subf %33, %40 : vector<64x128xf32>
    %42 = arith.mulf %41, %41 : vector<64x128xf32>
    %cst_41 = arith.constant dense<0.000000e+00> : vector<128xf32>
    %43 = vector.multi_reduction <add>, %42, %cst_41 [0] : vector<64x128xf32> to vector<128xf32>
    %44 = vector.shape_cast %43 : vector<128xf32> to vector<1x128xf32>
    %c0_42 = arith.constant 0 : index
    %c0_43 = arith.constant 0 : index
    %45 = vector.load %arg6[%c0_42, %c0_43] : memref<128x128xf32, #tpu.memory_space<vmem>>, vector<128x128xf32>
    %cst_44 = arith.constant dense<0.000000e+00> : vector<1x128xf32>
    %46 = tpu.matmul %44, %45, %cst_44 {dimension_numbers = #tpu.dot_dimension_numbers<[1], [0], [0], [1], [0, 0, 1, 1], [], []>} : vector<1x128xf32>, vector<128x128xf32>, vector<1x128xf32> -> vector<1x128xf32>
    %cst_45 = arith.constant 1.562500e-02 : f32
    %47 = vector.broadcast %cst_45 : f32 to vector<1x128xf32>
    %48 = arith.mulf %46, %47 : vector<1x128xf32>
    %cst_46 = arith.constant 9.99999974E-6 : f32
    %49 = vector.broadcast %cst_46 : f32 to vector<1x128xf32>
    %50 = arith.addf %48, %49 : vector<1x128xf32>
    %51 = math.rsqrt %50 : vector<1x128xf32>
    %c0_47 = arith.constant 0 : index
    %c0_48 = arith.constant 0 : index
    %52 = vector.load %arg4[%c0_47, %c0_48] : memref<1x128xf32, #tpu.memory_space<vmem>>, vector<1x128xf32>
    %53 = arith.mulf %51, %52 : vector<1x128xf32>
    %54 = vector.broadcast %53 : vector<1x128xf32> to vector<64x128xf32>
    %55 = arith.mulf %41, %54 : vector<64x128xf32>
    %c0_49 = arith.constant 0 : index
    %c0_50 = arith.constant 0 : index
    %56 = vector.load %arg5[%c0_49, %c0_50] : memref<1x128xf32, #tpu.memory_space<vmem>>, vector<1x128xf32>
    %57 = vector.broadcast %56 : vector<1x128xf32> to vector<64x128xf32>
    %58 = arith.addf %55, %57 : vector<64x128xf32>
    %59 = arith.negf %58 : vector<64x128xf32>
    %60 = math.exp %59 : vector<64x128xf32>
    %cst_51 = arith.constant 1.000000e+00 : f32
    %61 = vector.broadcast %cst_51 : f32 to vector<64x128xf32>
    %62 = arith.addf %61, %60 : vector<64x128xf32>
    %63 = arith.divf %61, %62 : vector<64x128xf32>
    %64 = arith.mulf %58, %63 : vector<64x128xf32>
    %c0_52 = arith.constant 0 : index
    %c0_53 = arith.constant 0 : index
    %c0_54 = arith.constant 0 : index
    %65 = vector.load %arg7[%c0_52, %c0_53, %c0_54] : memref<1x64x128xf32, #tpu.memory_space<vmem>>, vector<1x64x128xf32>
    %66 = vector.shape_cast %65 : vector<1x64x128xf32> to vector<64x128xf32>
    %67 = vector.shape_cast %64 : vector<64x128xf32> to vector<1x64x128xf32>
    tpu.vector_store %arg7[%c0_52, %c0_53, %c0_54], %67 {strides = array<i32>} : memref<1x64x128xf32, #tpu.memory_space<vmem>>, vector<1x64x128xf32>,
    return
  }
  func.func @transform_0(%arg0: i32) -> (i32, i32, i32, i32) {
    %c0_i32 = arith.constant 0 : i32
    %c0_i32_0 = arith.constant 0 : i32
    %c0_i32_1 = arith.constant 0 : i32
    %c0_i32_2 = arith.constant 0 : i32
    return %arg0, %c0_i32, %c0_i32_0, %c0_i32_1 : i32, i32, i32, i32
  }
  func.func @transform_1(%arg0: i32) -> (i32, i32) {
    %c0_i32 = arith.constant 0 : i32
    %c0_i32_0 = arith.constant 0 : i32
    %c0_i32_1 = arith.constant 0 : i32
    return %c0_i32, %c0_i32_0 : i32, i32
  }
  func.func @transform_2(%arg0: i32) -> (i32, i32) {
    %c0_i32 = arith.constant 0 : i32
    %c0_i32_0 = arith.constant 0 : i32
    %c0_i32_1 = arith.constant 0 : i32
    return %c0_i32, %c0_i32_0 : i32, i32
  }
  func.func @transform_3(%arg0: i32) -> (i32, i32) {
    %c0_i32 = arith.constant 0 : i32
    %c0_i32_0 = arith.constant 0 : i32
    %c0_i32_1 = arith.constant 0 : i32
    return %c0_i32, %c0_i32_0 : i32, i32
  }
  func.func @transform_4(%arg0: i32) -> (i32, i32) {
    %c0_i32 = arith.constant 0 : i32
    %c0_i32_0 = arith.constant 0 : i32
    %c0_i32_1 = arith.constant 0 : i32
    return %c0_i32, %c0_i32_0 : i32, i32
  }
  func.func @transform_5(%arg0: i32) -> (i32, i32) {
    %c0_i32 = arith.constant 0 : i32
    %c0_i32_0 = arith.constant 0 : i32
    %c0_i32_1 = arith.constant 0 : i32
    return %c0_i32, %c0_i32_0 : i32, i32
  }
  func.func @transform_6(%arg0: i32) -> (i32, i32, i32) {
    %c0_i32 = arith.constant 0 : i32
    %c0_i32_0 = arith.constant 0 : i32
    %c0_i32_1 = arith.constant 0 : i32
    return %arg0, %c0_i32, %c0_i32_0 : i32, i32, i32
  }
}

module attributes {stable_mosaic.version = 11 : i64} {
  func.func @_fused_layer_kernel(%arg0: i32, %arg1: memref<1x10x10x128xf32, #tpu.memory_space<vmem>>, %arg2: memref<1152x128xbf16, #tpu.memory_space<vmem>>, %arg3: memref<1x128xf32, #tpu.memory_space<vmem>>, %arg4: memref<1x128xf32, #tpu.memory_space<vmem>>, %arg5: memref<1x128xf32, #tpu.memory_space<vmem>>, %arg6: memref<128x128xf32, #tpu.memory_space<vmem>>, %arg7: memref<1x64x128xf32, #tpu.memory_space<vmem>>) attributes {dimension_semantics = [#tpu.dimension_semantics<parallel>], iteration_bounds = array<i64: 2>, scalar_prefetch = 0 : i64, scratch_operands = 0 : i64, tpu.core_type = #tpu.core_type<tc>, window_params = [{transform_indices = @transform_0, window_bounds = array<i64: 1, 10, 10, 128>}, {pipeline_mode = #tpu.pipeline_mode<synchronous>, transform_indices = @transform_1, window_bounds = array<i64: 1152, 128>}, {pipeline_mode = #tpu.pipeline_mode<synchronous>, transform_indices = @transform_2, window_bounds = array<i64: 1, 128>}, {pipeline_mode = #tpu.pipeline_mode<synchronous>, transform_indices = @transform_3, window_bounds = array<i64: 1, 128>}, {pipeline_mode = #tpu.pipeline_mode<synchronous>, transform_indices = @transform_4, window_bounds = array<i64: 1, 128>}, {pipeline_mode = #tpu.pipeline_mode<synchronous>, transform_indices = @transform_5, window_bounds = array<i64: 128, 128>}, {transform_indices = @transform_6, window_bounds = array<i64: 1, 64, 128>}]} {
    %c0 = arith.constant 0 : index
    %c0_0 = arith.constant 0 : index
    %c0_1 = arith.constant 0 : index
    %c0_2 = arith.constant 0 : index
    %0 = vector.load %arg1[%c0, %c0_0, %c0_1, %c0_2] : memref<1x10x10x128xf32, #tpu.memory_space<vmem>>, vector<1x8x8x128xf32>
    %1 = vector.shape_cast %0 : vector<1x8x8x128xf32> to vector<8x8x128xf32>
    %2 = vector.shape_cast %1 : vector<8x8x128xf32> to vector<64x128xf32>
    %c0_3 = arith.constant 0 : index
    %c0_4 = arith.constant 0 : index
    %c1 = arith.constant 1 : index
    %c0_5 = arith.constant 0 : index
    %3 = vector.load %arg1[%c0_3, %c0_4, %c1, %c0_5] : memref<1x10x10x128xf32, #tpu.memory_space<vmem>>, vector<1x8x8x128xf32>
    %4 = vector.shape_cast %3 : vector<1x8x8x128xf32> to vector<8x8x128xf32>
    %5 = vector.shape_cast %4 : vector<8x8x128xf32> to vector<64x128xf32>
    %c0_6 = arith.constant 0 : index
    %c0_7 = arith.constant 0 : index
    %c2 = arith.constant 2 : index
    %c0_8 = arith.constant 0 : index
    %6 = vector.load %arg1[%c0_6, %c0_7, %c2, %c0_8] : memref<1x10x10x128xf32, #tpu.memory_space<vmem>>, vector<1x8x8x128xf32>
    %7 = vector.shape_cast %6 : vector<1x8x8x128xf32> to vector<8x8x128xf32>
    %8 = vector.shape_cast %7 : vector<8x8x128xf32> to vector<64x128xf32>
    %c0_9 = arith.constant 0 : index
    %c1_10 = arith.constant 1 : index
    %c0_11 = arith.constant 0 : index
    %c0_12 = arith.constant 0 : index
    %9 = vector.load %arg1[%c0_9, %c1_10, %c0_11, %c0_12] : memref<1x10x10x128xf32, #tpu.memory_space<vmem>>, vector<1x8x8x128xf32>
    %10 = vector.shape_cast %9 : vector<1x8x8x128xf32> to vector<8x8x128xf32>
    %11 = vector.shape_cast %10 : vector<8x8x128xf32> to vector<64x128xf32>
    %c0_13 = arith.constant 0 : index
    %c1_14 = arith.constant 1 : index
    %c1_15 = arith.constant 1 : index
    %c0_16 = arith.constant 0 : index
    %12 = vector.load %arg1[%c0_13, %c1_14, %c1_15, %c0_16] : memref<1x10x10x128xf32, #tpu.memory_space<vmem>>, vector<1x8x8x128xf32>
    %13 = vector.shape_cast %12 : vector<1x8x8x128xf32> to vector<8x8x128xf32>
    %14 = vector.shape_cast %13 : vector<8x8x128xf32> to vector<64x128xf32>
    %c0_17 = arith.constant 0 : index
    %c1_18 = arith.constant 1 : index
    %c2_19 = arith.constant 2 : index
    %c0_20 = arith.constant 0 : index
    %15 = vector.load %arg1[%c0_17, %c1_18, %c2_19, %c0_20] : memref<1x10x10x128xf32, #tpu.memory_space<vmem>>, vector<1x8x8x128xf32>
    %16 = vector.shape_cast %15 : vector<1x8x8x128xf32> to vector<8x8x128xf32>
    %17 = vector.shape_cast %16 : vector<8x8x128xf32> to vector<64x128xf32>
    %c0_21 = arith.constant 0 : index
    %c2_22 = arith.constant 2 : index
    %c0_23 = arith.constant 0 : index
    %c0_24 = arith.constant 0 : index
    %18 = vector.load %arg1[%c0_21, %c2_22, %c0_23, %c0_24] : memref<1x10x10x128xf32, #tpu.memory_space<vmem>>, vector<1x8x8x128xf32>
    %19 = vector.shape_cast %18 : vector<1x8x8x128xf32> to vector<8x8x128xf32>
    %20 = vector.shape_cast %19 : vector<8x8x128xf32> to vector<64x128xf32>
    %c0_25 = arith.constant 0 : index
    %c2_26 = arith.constant 2 : index
    %c1_27 = arith.constant 1 : index
    %c0_28 = arith.constant 0 : index
    %21 = vector.load %arg1[%c0_25, %c2_26, %c1_27, %c0_28] : memref<1x10x10x128xf32, #tpu.memory_space<vmem>>, vector<1x8x8x128xf32>
    %22 = vector.shape_cast %21 : vector<1x8x8x128xf32> to vector<8x8x128xf32>
    %23 = vector.shape_cast %22 : vector<8x8x128xf32> to vector<64x128xf32>
    %c0_29 = arith.constant 0 : index
    %c2_30 = arith.constant 2 : index
    %c2_31 = arith.constant 2 : index
    %c0_32 = arith.constant 0 : index
    %24 = vector.load %arg1[%c0_29, %c2_30, %c2_31, %c0_32] : memref<1x10x10x128xf32, #tpu.memory_space<vmem>>, vector<1x8x8x128xf32>
    %25 = vector.shape_cast %24 : vector<1x8x8x128xf32> to vector<8x8x128xf32>
    %26 = vector.shape_cast %25 : vector<8x8x128xf32> to vector<64x128xf32>
    %27 = tpu.concatenate %2, %5, %8, %11, %14, %17, %20, %23, %26 in 1 : vector<64x128xf32>, vector<64x128xf32>, vector<64x128xf32>, vector<64x128xf32>, vector<64x128xf32>, vector<64x128xf32>, vector<64x128xf32>, vector<64x128xf32>, vector<64x128xf32> -> vector<64x1152xf32>
    %28 = arith.truncf %27 : vector<64x1152xf32> to vector<64x1152xbf16>
    %c0_33 = arith.constant 0 : index
    %c0_34 = arith.constant 0 : index
    %29 = vector.load %arg2[%c0_33, %c0_34] : memref<1152x128xbf16, #tpu.memory_space<vmem>>, vector<1152x128xbf16>
    %cst = arith.constant dense<0.000000e+00> : vector<64x128xf32>
    %30 = tpu.matmul %28, %29, %cst {dimension_numbers = #tpu.dot_dimension_numbers<[1], [0], [0], [1], [0, 0, 1, 1], [], []>} : vector<64x1152xbf16>, vector<1152x128xbf16>, vector<64x128xf32> -> vector<64x128xf32>
    %c0_35 = arith.constant 0 : index
    %c0_36 = arith.constant 0 : index
    %31 = vector.load %arg3[%c0_35, %c0_36] : memref<1x128xf32, #tpu.memory_space<vmem>>, vector<1x128xf32>
    %32 = vector.broadcast %31 : vector<1x128xf32> to vector<64x128xf32>
    %33 = arith.addf %30, %32 : vector<64x128xf32>
    %cst_37 = arith.constant dense<0.000000e+00> : vector<128xf32>
    %34 = vector.multi_reduction <add>, %33, %cst_37 [0] : vector<64x128xf32> to vector<128xf32>
    %35 = vector.shape_cast %34 : vector<128xf32> to vector<1x128xf32>
    %c0_38 = arith.constant 0 : index
    %c0_39 = arith.constant 0 : index
    %36 = vector.load %arg6[%c0_38, %c0_39] : memref<128x128xf32, #tpu.memory_space<vmem>>, vector<128x128xf32>
    %cst_40 = arith.constant dense<0.000000e+00> : vector<1x128xf32>
    %37 = tpu.matmul %35, %36, %cst_40 {dimension_numbers = #tpu.dot_dimension_numbers<[1], [0], [0], [1], [0, 0, 1, 1], [], []>} : vector<1x128xf32>, vector<128x128xf32>, vector<1x128xf32> -> vector<1x128xf32>
    %cst_41 = arith.constant 1.562500e-02 : f32
    %38 = vector.broadcast %cst_41 : f32 to vector<1x128xf32>
    %39 = arith.mulf %37, %38 : vector<1x128xf32>
    %40 = vector.broadcast %39 : vector<1x128xf32> to vector<64x128xf32>
    %41 = arith.subf %33, %40 : vector<64x128xf32>
    %42 = arith.mulf %41, %41 : vector<64x128xf32>
    %cst_42 = arith.constant dense<0.000000e+00> : vector<128xf32>
    %43 = vector.multi_reduction <add>, %42, %cst_42 [0] : vector<64x128xf32> to vector<128xf32>
    %44 = vector.shape_cast %43 : vector<128xf32> to vector<1x128xf32>
    %c0_43 = arith.constant 0 : index
    %c0_44 = arith.constant 0 : index
    %45 = vector.load %arg6[%c0_43, %c0_44] : memref<128x128xf32, #tpu.memory_space<vmem>>, vector<128x128xf32>
    %cst_45 = arith.constant dense<0.000000e+00> : vector<1x128xf32>
    %46 = tpu.matmul %44, %45, %cst_45 {dimension_numbers = #tpu.dot_dimension_numbers<[1], [0], [0], [1], [0, 0, 1, 1], [], []>} : vector<1x128xf32>, vector<128x128xf32>, vector<1x128xf32> -> vector<1x128xf32>
    %cst_46 = arith.constant 1.562500e-02 : f32
    %47 = vector.broadcast %cst_46 : f32 to vector<1x128xf32>
    %48 = arith.mulf %46, %47 : vector<1x128xf32>
    %cst_47 = arith.constant 9.99999974E-6 : f32
    %49 = vector.broadcast %cst_47 : f32 to vector<1x128xf32>
    %50 = arith.addf %48, %49 : vector<1x128xf32>
    %51 = math.rsqrt %50 : vector<1x128xf32>
    %c0_48 = arith.constant 0 : index
    %c0_49 = arith.constant 0 : index
    %52 = vector.load %arg4[%c0_48, %c0_49] : memref<1x128xf32, #tpu.memory_space<vmem>>, vector<1x128xf32>
    %53 = arith.mulf %51, %52 : vector<1x128xf32>
    %54 = vector.broadcast %53 : vector<1x128xf32> to vector<64x128xf32>
    %55 = arith.mulf %41, %54 : vector<64x128xf32>
    %c0_50 = arith.constant 0 : index
    %c0_51 = arith.constant 0 : index
    %56 = vector.load %arg5[%c0_50, %c0_51] : memref<1x128xf32, #tpu.memory_space<vmem>>, vector<1x128xf32>
    %57 = vector.broadcast %56 : vector<1x128xf32> to vector<64x128xf32>
    %58 = arith.addf %55, %57 : vector<64x128xf32>
    %59 = arith.negf %58 : vector<64x128xf32>
    %60 = math.exp %59 : vector<64x128xf32>
    %cst_52 = arith.constant 1.000000e+00 : f32
    %61 = vector.broadcast %cst_52 : f32 to vector<64x128xf32>
    %62 = arith.addf %61, %60 : vector<64x128xf32>
    %63 = arith.divf %61, %62 : vector<64x128xf32>
    %64 = arith.mulf %58, %63 : vector<64x128xf32>
    %c0_53 = arith.constant 0 : index
    %c0_54 = arith.constant 0 : index
    %c0_55 = arith.constant 0 : index
    %65 = vector.load %arg7[%c0_53, %c0_54, %c0_55] : memref<1x64x128xf32, #tpu.memory_space<vmem>>, vector<1x64x128xf32>
    %66 = vector.shape_cast %65 : vector<1x64x128xf32> to vector<64x128xf32>
    %67 = vector.shape_cast %64 : vector<64x128xf32> to vector<1x64x128xf32>
    tpu.vector_store %arg7[%c0_53, %c0_54, %c0_55], %67 {strides = array<i32>} : memref<1x64x128xf32, #tpu.memory_space<vmem>>, vector<1x64x128xf32>,
    return
  }
  func.func @transform_0(%arg0: i32) -> (i32, i32, i32, i32) {
    %c0_i32 = arith.constant 0 : i32
    %c0_i32_0 = arith.constant 0 : i32
    %c0_i32_1 = arith.constant 0 : i32
    %c0_i32_2 = arith.constant 0 : i32
    return %arg0, %c0_i32, %c0_i32_0, %c0_i32_1 : i32, i32, i32, i32
  }
  func.func @transform_1(%arg0: i32) -> (i32, i32) {
    %c0_i32 = arith.constant 0 : i32
    %c0_i32_0 = arith.constant 0 : i32
    %c0_i32_1 = arith.constant 0 : i32
    return %c0_i32, %c0_i32_0 : i32, i32
  }
  func.func @transform_2(%arg0: i32) -> (i32, i32) {
    %c0_i32 = arith.constant 0 : i32
    %c0_i32_0 = arith.constant 0 : i32
    %c0_i32_1 = arith.constant 0 : i32
    return %c0_i32, %c0_i32_0 : i32, i32
  }
  func.func @transform_3(%arg0: i32) -> (i32, i32) {
    %c0_i32 = arith.constant 0 : i32
    %c0_i32_0 = arith.constant 0 : i32
    %c0_i32_1 = arith.constant 0 : i32
    return %c0_i32, %c0_i32_0 : i32, i32
  }
  func.func @transform_4(%arg0: i32) -> (i32, i32) {
    %c0_i32 = arith.constant 0 : i32
    %c0_i32_0 = arith.constant 0 : i32
    %c0_i32_1 = arith.constant 0 : i32
    return %c0_i32, %c0_i32_0 : i32, i32
  }
  func.func @transform_5(%arg0: i32) -> (i32, i32) {
    %c0_i32 = arith.constant 0 : i32
    %c0_i32_0 = arith.constant 0 : i32
    %c0_i32_1 = arith.constant 0 : i32
    return %c0_i32, %c0_i32_0 : i32, i32
  }
  func.func @transform_6(%arg0: i32) -> (i32, i32, i32) {
    %c0_i32 = arith.constant 0 : i32
    %c0_i32_0 = arith.constant 0 : i32
    %c0_i32_1 = arith.constant 0 : i32
    return %arg0, %c0_i32, %c0_i32_0 : i32, i32, i32
  }
}

module attributes {stable_mosaic.version = 11 : i64} {
  func.func @_fused_layer_kernel(%arg0: i32, %arg1: memref<1x10x10x128xf32, #tpu.memory_space<vmem>>, %arg2: memref<1152x128xbf16, #tpu.memory_space<vmem>>, %arg3: memref<1x128xf32, #tpu.memory_space<vmem>>, %arg4: memref<1x128xf32, #tpu.memory_space<vmem>>, %arg5: memref<1x128xf32, #tpu.memory_space<vmem>>, %arg6: memref<128x128xf32, #tpu.memory_space<vmem>>, %arg7: memref<1x64x4xf32, #tpu.memory_space<vmem>>, %arg8: memref<4x128xbf16, #tpu.memory_space<vmem>>, %arg9: memref<1x128xf32, #tpu.memory_space<vmem>>, %arg10: memref<1x64x128xf32, #tpu.memory_space<vmem>>) attributes {dimension_semantics = [#tpu.dimension_semantics<parallel>], iteration_bounds = array<i64: 2>, scalar_prefetch = 0 : i64, scratch_operands = 0 : i64, tpu.core_type = #tpu.core_type<tc>, window_params = [{transform_indices = @transform_0, window_bounds = array<i64: 1, 10, 10, 128>}, {pipeline_mode = #tpu.pipeline_mode<synchronous>, transform_indices = @transform_1, window_bounds = array<i64: 1152, 128>}, {pipeline_mode = #tpu.pipeline_mode<synchronous>, transform_indices = @transform_2, window_bounds = array<i64: 1, 128>}, {pipeline_mode = #tpu.pipeline_mode<synchronous>, transform_indices = @transform_3, window_bounds = array<i64: 1, 128>}, {pipeline_mode = #tpu.pipeline_mode<synchronous>, transform_indices = @transform_4, window_bounds = array<i64: 1, 128>}, {pipeline_mode = #tpu.pipeline_mode<synchronous>, transform_indices = @transform_5, window_bounds = array<i64: 128, 128>}, {transform_indices = @transform_6, window_bounds = array<i64: 1, 64, 4>}, {pipeline_mode = #tpu.pipeline_mode<synchronous>, transform_indices = @transform_7, window_bounds = array<i64: 4, 128>}, {pipeline_mode = #tpu.pipeline_mode<synchronous>, transform_indices = @transform_8, window_bounds = array<i64: 1, 128>}, {transform_indices = @transform_9, window_bounds = array<i64: 1, 64, 128>}]} {
    %c0 = arith.constant 0 : index
    %c0_0 = arith.constant 0 : index
    %c0_1 = arith.constant 0 : index
    %c0_2 = arith.constant 0 : index
    %0 = vector.load %arg1[%c0, %c0_0, %c0_1, %c0_2] : memref<1x10x10x128xf32, #tpu.memory_space<vmem>>, vector<1x8x8x128xf32>
    %1 = vector.shape_cast %0 : vector<1x8x8x128xf32> to vector<8x8x128xf32>
    %2 = vector.shape_cast %1 : vector<8x8x128xf32> to vector<64x128xf32>
    %c0_3 = arith.constant 0 : index
    %c0_4 = arith.constant 0 : index
    %c1 = arith.constant 1 : index
    %c0_5 = arith.constant 0 : index
    %3 = vector.load %arg1[%c0_3, %c0_4, %c1, %c0_5] : memref<1x10x10x128xf32, #tpu.memory_space<vmem>>, vector<1x8x8x128xf32>
    %4 = vector.shape_cast %3 : vector<1x8x8x128xf32> to vector<8x8x128xf32>
    %5 = vector.shape_cast %4 : vector<8x8x128xf32> to vector<64x128xf32>
    %c0_6 = arith.constant 0 : index
    %c0_7 = arith.constant 0 : index
    %c2 = arith.constant 2 : index
    %c0_8 = arith.constant 0 : index
    %6 = vector.load %arg1[%c0_6, %c0_7, %c2, %c0_8] : memref<1x10x10x128xf32, #tpu.memory_space<vmem>>, vector<1x8x8x128xf32>
    %7 = vector.shape_cast %6 : vector<1x8x8x128xf32> to vector<8x8x128xf32>
    %8 = vector.shape_cast %7 : vector<8x8x128xf32> to vector<64x128xf32>
    %c0_9 = arith.constant 0 : index
    %c1_10 = arith.constant 1 : index
    %c0_11 = arith.constant 0 : index
    %c0_12 = arith.constant 0 : index
    %9 = vector.load %arg1[%c0_9, %c1_10, %c0_11, %c0_12] : memref<1x10x10x128xf32, #tpu.memory_space<vmem>>, vector<1x8x8x128xf32>
    %10 = vector.shape_cast %9 : vector<1x8x8x128xf32> to vector<8x8x128xf32>
    %11 = vector.shape_cast %10 : vector<8x8x128xf32> to vector<64x128xf32>
    %c0_13 = arith.constant 0 : index
    %c1_14 = arith.constant 1 : index
    %c1_15 = arith.constant 1 : index
    %c0_16 = arith.constant 0 : index
    %12 = vector.load %arg1[%c0_13, %c1_14, %c1_15, %c0_16] : memref<1x10x10x128xf32, #tpu.memory_space<vmem>>, vector<1x8x8x128xf32>
    %13 = vector.shape_cast %12 : vector<1x8x8x128xf32> to vector<8x8x128xf32>
    %14 = vector.shape_cast %13 : vector<8x8x128xf32> to vector<64x128xf32>
    %c0_17 = arith.constant 0 : index
    %c1_18 = arith.constant 1 : index
    %c2_19 = arith.constant 2 : index
    %c0_20 = arith.constant 0 : index
    %15 = vector.load %arg1[%c0_17, %c1_18, %c2_19, %c0_20] : memref<1x10x10x128xf32, #tpu.memory_space<vmem>>, vector<1x8x8x128xf32>
    %16 = vector.shape_cast %15 : vector<1x8x8x128xf32> to vector<8x8x128xf32>
    %17 = vector.shape_cast %16 : vector<8x8x128xf32> to vector<64x128xf32>
    %c0_21 = arith.constant 0 : index
    %c2_22 = arith.constant 2 : index
    %c0_23 = arith.constant 0 : index
    %c0_24 = arith.constant 0 : index
    %18 = vector.load %arg1[%c0_21, %c2_22, %c0_23, %c0_24] : memref<1x10x10x128xf32, #tpu.memory_space<vmem>>, vector<1x8x8x128xf32>
    %19 = vector.shape_cast %18 : vector<1x8x8x128xf32> to vector<8x8x128xf32>
    %20 = vector.shape_cast %19 : vector<8x8x128xf32> to vector<64x128xf32>
    %c0_25 = arith.constant 0 : index
    %c2_26 = arith.constant 2 : index
    %c1_27 = arith.constant 1 : index
    %c0_28 = arith.constant 0 : index
    %21 = vector.load %arg1[%c0_25, %c2_26, %c1_27, %c0_28] : memref<1x10x10x128xf32, #tpu.memory_space<vmem>>, vector<1x8x8x128xf32>
    %22 = vector.shape_cast %21 : vector<1x8x8x128xf32> to vector<8x8x128xf32>
    %23 = vector.shape_cast %22 : vector<8x8x128xf32> to vector<64x128xf32>
    %c0_29 = arith.constant 0 : index
    %c2_30 = arith.constant 2 : index
    %c2_31 = arith.constant 2 : index
    %c0_32 = arith.constant 0 : index
    %24 = vector.load %arg1[%c0_29, %c2_30, %c2_31, %c0_32] : memref<1x10x10x128xf32, #tpu.memory_space<vmem>>, vector<1x8x8x128xf32>
    %25 = vector.shape_cast %24 : vector<1x8x8x128xf32> to vector<8x8x128xf32>
    %26 = vector.shape_cast %25 : vector<8x8x128xf32> to vector<64x128xf32>
    %27 = tpu.concatenate %2, %5, %8, %11, %14, %17, %20, %23, %26 in 1 : vector<64x128xf32>, vector<64x128xf32>, vector<64x128xf32>, vector<64x128xf32>, vector<64x128xf32>, vector<64x128xf32>, vector<64x128xf32>, vector<64x128xf32>, vector<64x128xf32> -> vector<64x1152xf32>
    %28 = arith.truncf %27 : vector<64x1152xf32> to vector<64x1152xbf16>
    %c0_33 = arith.constant 0 : index
    %c0_34 = arith.constant 0 : index
    %29 = vector.load %arg2[%c0_33, %c0_34] : memref<1152x128xbf16, #tpu.memory_space<vmem>>, vector<1152x128xbf16>
    %cst = arith.constant dense<0.000000e+00> : vector<64x128xf32>
    %30 = tpu.matmul %28, %29, %cst {dimension_numbers = #tpu.dot_dimension_numbers<[1], [0], [0], [1], [0, 0, 1, 1], [], []>} : vector<64x1152xbf16>, vector<1152x128xbf16>, vector<64x128xf32> -> vector<64x128xf32>
    %c0_35 = arith.constant 0 : index
    %c0_36 = arith.constant 0 : index
    %31 = vector.load %arg3[%c0_35, %c0_36] : memref<1x128xf32, #tpu.memory_space<vmem>>, vector<1x128xf32>
    %32 = vector.broadcast %31 : vector<1x128xf32> to vector<64x128xf32>
    %33 = arith.addf %30, %32 : vector<64x128xf32>
    %cst_37 = arith.constant dense<0.000000e+00> : vector<128xf32>
    %34 = vector.multi_reduction <add>, %33, %cst_37 [0] : vector<64x128xf32> to vector<128xf32>
    %35 = vector.shape_cast %34 : vector<128xf32> to vector<1x128xf32>
    %c0_38 = arith.constant 0 : index
    %c0_39 = arith.constant 0 : index
    %36 = vector.load %arg6[%c0_38, %c0_39] : memref<128x128xf32, #tpu.memory_space<vmem>>, vector<128x128xf32>
    %cst_40 = arith.constant dense<0.000000e+00> : vector<1x128xf32>
    %37 = tpu.matmul %35, %36, %cst_40 {dimension_numbers = #tpu.dot_dimension_numbers<[1], [0], [0], [1], [0, 0, 1, 1], [], []>} : vector<1x128xf32>, vector<128x128xf32>, vector<1x128xf32> -> vector<1x128xf32>
    %cst_41 = arith.constant 1.562500e-02 : f32
    %38 = vector.broadcast %cst_41 : f32 to vector<1x128xf32>
    %39 = arith.mulf %37, %38 : vector<1x128xf32>
    %40 = vector.broadcast %39 : vector<1x128xf32> to vector<64x128xf32>
    %41 = arith.subf %33, %40 : vector<64x128xf32>
    %42 = arith.mulf %41, %41 : vector<64x128xf32>
    %cst_42 = arith.constant dense<0.000000e+00> : vector<128xf32>
    %43 = vector.multi_reduction <add>, %42, %cst_42 [0] : vector<64x128xf32> to vector<128xf32>
    %44 = vector.shape_cast %43 : vector<128xf32> to vector<1x128xf32>
    %c0_43 = arith.constant 0 : index
    %c0_44 = arith.constant 0 : index
    %45 = vector.load %arg6[%c0_43, %c0_44] : memref<128x128xf32, #tpu.memory_space<vmem>>, vector<128x128xf32>
    %cst_45 = arith.constant dense<0.000000e+00> : vector<1x128xf32>
    %46 = tpu.matmul %44, %45, %cst_45 {dimension_numbers = #tpu.dot_dimension_numbers<[1], [0], [0], [1], [0, 0, 1, 1], [], []>} : vector<1x128xf32>, vector<128x128xf32>, vector<1x128xf32> -> vector<1x128xf32>
    %cst_46 = arith.constant 1.562500e-02 : f32
    %47 = vector.broadcast %cst_46 : f32 to vector<1x128xf32>
    %48 = arith.mulf %46, %47 : vector<1x128xf32>
    %cst_47 = arith.constant 9.99999974E-6 : f32
    %49 = vector.broadcast %cst_47 : f32 to vector<1x128xf32>
    %50 = arith.addf %48, %49 : vector<1x128xf32>
    %51 = math.rsqrt %50 : vector<1x128xf32>
    %c0_48 = arith.constant 0 : index
    %c0_49 = arith.constant 0 : index
    %52 = vector.load %arg4[%c0_48, %c0_49] : memref<1x128xf32, #tpu.memory_space<vmem>>, vector<1x128xf32>
    %53 = arith.mulf %51, %52 : vector<1x128xf32>
    %54 = vector.broadcast %53 : vector<1x128xf32> to vector<64x128xf32>
    %55 = arith.mulf %41, %54 : vector<64x128xf32>
    %c0_50 = arith.constant 0 : index
    %c0_51 = arith.constant 0 : index
    %56 = vector.load %arg5[%c0_50, %c0_51] : memref<1x128xf32, #tpu.memory_space<vmem>>, vector<1x128xf32>
    %57 = vector.broadcast %56 : vector<1x128xf32> to vector<64x128xf32>
    %58 = arith.addf %55, %57 : vector<64x128xf32>
    %c0_52 = arith.constant 0 : index
    %c0_53 = arith.constant 0 : index
    %c0_54 = arith.constant 0 : index
    %59 = vector.load %arg7[%c0_52, %c0_53, %c0_54] : memref<1x64x4xf32, #tpu.memory_space<vmem>>, vector<1x64x4xf32>
    %60 = vector.shape_cast %59 : vector<1x64x4xf32> to vector<64x4xf32>
    %61 = arith.truncf %60 : vector<64x4xf32> to vector<64x4xbf16>
    %c0_55 = arith.constant 0 : index
    %c0_56 = arith.constant 0 : index
    %62 = vector.load %arg8[%c0_55, %c0_56] : memref<4x128xbf16, #tpu.memory_space<vmem>>, vector<4x128xbf16>
    %cst_57 = arith.constant dense<0.000000e+00> : vector<64x128xf32>
    %63 = tpu.matmul %61, %62, %cst_57 {dimension_numbers = #tpu.dot_dimension_numbers<[1], [0], [0], [1], [0, 0, 1, 1], [], []>} : vector<64x4xbf16>, vector<4x128xbf16>, vector<64x128xf32> -> vector<64x128xf32>
    %c0_58 = arith.constant 0 : index
    %c0_59 = arith.constant 0 : index
    %64 = vector.load %arg9[%c0_58, %c0_59] : memref<1x128xf32, #tpu.memory_space<vmem>>, vector<1x128xf32>
    %65 = vector.broadcast %64 : vector<1x128xf32> to vector<64x128xf32>
    %66 = arith.addf %63, %65 : vector<64x128xf32>
    %67 = arith.addf %58, %66 : vector<64x128xf32>
    %68 = arith.negf %67 : vector<64x128xf32>
    %69 = math.exp %68 : vector<64x128xf32>
    %cst_60 = arith.constant 1.000000e+00 : f32
    %70 = vector.broadcast %cst_60 : f32 to vector<64x128xf32>
    %71 = arith.addf %70, %69 : vector<64x128xf32>
    %72 = arith.divf %70, %71 : vector<64x128xf32>
    %73 = arith.mulf %67, %72 : vector<64x128xf32>
    %c0_61 = arith.constant 0 : index
    %c0_62 = arith.constant 0 : index
    %c0_63 = arith.constant 0 : index
    %74 = vector.load %arg10[%c0_61, %c0_62, %c0_63] : memref<1x64x128xf32, #tpu.memory_space<vmem>>, vector<1x64x128xf32>
    %75 = vector.shape_cast %74 : vector<1x64x128xf32> to vector<64x128xf32>
    %76 = vector.shape_cast %73 : vector<64x128xf32> to vector<1x64x128xf32>
    tpu.vector_store %arg10[%c0_61, %c0_62, %c0_63], %76 {strides = array<i32>} : memref<1x64x128xf32, #tpu.memory_space<vmem>>, vector<1x64x128xf32>,
    return
  }
  func.func @transform_0(%arg0: i32) -> (i32, i32, i32, i32) {
    %c0_i32 = arith.constant 0 : i32
    %c0_i32_0 = arith.constant 0 : i32
    %c0_i32_1 = arith.constant 0 : i32
    %c0_i32_2 = arith.constant 0 : i32
    return %arg0, %c0_i32, %c0_i32_0, %c0_i32_1 : i32, i32, i32, i32
  }
  func.func @transform_1(%arg0: i32) -> (i32, i32) {
    %c0_i32 = arith.constant 0 : i32
    %c0_i32_0 = arith.constant 0 : i32
    %c0_i32_1 = arith.constant 0 : i32
    return %c0_i32, %c0_i32_0 : i32, i32
  }
  func.func @transform_2(%arg0: i32) -> (i32, i32) {
    %c0_i32 = arith.constant 0 : i32
    %c0_i32_0 = arith.constant 0 : i32
    %c0_i32_1 = arith.constant 0 : i32
    return %c0_i32, %c0_i32_0 : i32, i32
  }
  func.func @transform_3(%arg0: i32) -> (i32, i32) {
    %c0_i32 = arith.constant 0 : i32
    %c0_i32_0 = arith.constant 0 : i32
    %c0_i32_1 = arith.constant 0 : i32
    return %c0_i32, %c0_i32_0 : i32, i32
  }
  func.func @transform_4(%arg0: i32) -> (i32, i32) {
    %c0_i32 = arith.constant 0 : i32
    %c0_i32_0 = arith.constant 0 : i32
    %c0_i32_1 = arith.constant 0 : i32
    return %c0_i32, %c0_i32_0 : i32, i32
  }
  func.func @transform_5(%arg0: i32) -> (i32, i32) {
    %c0_i32 = arith.constant 0 : i32
    %c0_i32_0 = arith.constant 0 : i32
    %c0_i32_1 = arith.constant 0 : i32
    return %c0_i32, %c0_i32_0 : i32, i32
  }
  func.func @transform_6(%arg0: i32) -> (i32, i32, i32) {
    %c0_i32 = arith.constant 0 : i32
    %c0_i32_0 = arith.constant 0 : i32
    %c0_i32_1 = arith.constant 0 : i32
    return %arg0, %c0_i32, %c0_i32_0 : i32, i32, i32
  }
  func.func @transform_7(%arg0: i32) -> (i32, i32) {
    %c0_i32 = arith.constant 0 : i32
    %c0_i32_0 = arith.constant 0 : i32
    %c0_i32_1 = arith.constant 0 : i32
    return %c0_i32, %c0_i32_0 : i32, i32
  }
  func.func @transform_8(%arg0: i32) -> (i32, i32) {
    %c0_i32 = arith.constant 0 : i32
    %c0_i32_0 = arith.constant 0 : i32
    %c0_i32_1 = arith.constant 0 : i32
    return %c0_i32, %c0_i32_0 : i32, i32
  }
  func.func @transform_9(%arg0: i32) -> (i32, i32, i32) {
    %c0_i32 = arith.constant 0 : i32
    %c0_i32_0 = arith.constant 0 : i32
    %c0_i32_1 = arith.constant 0 : i32
    return %arg0, %c0_i32, %c0_i32_0 : i32, i32, i32
  }
}

</mosaic_0001>

<bundles_post_ra>
// kernel: encoder_block_forward.3
= control target key start
LH: loop header
LB: loop body
LE: loop exit
PB: predicated region body
PF: predicated region fallthrough
CT: control target
= control target key end

     0   :  { %s1660_s21 = smov 0   ;;  %s1969_s0 = inlined_call_operand.vmem [shape: f32[8,9,9,4], index: 0, kind: input, shape index: {}]   ;;  %s1970_s1 = inlined_call_operand.vmem [shape: bf16[36,128], index: 1, kind: input, shape index: {}]   ;;  %s1971_s2 = inlined_call_operand.vmem [shape: f32[1,128], index: 2, kind: input, shape index: {}]   ;;  %s1972_s3 = inlined_call_operand.vmem [shape: f32[1,128], index: 3, kind: input, shape index: {}]   ;;  %s1973_s4 = inlined_call_operand.vmem [shape: f32[1,128], index: 4, kind: input, shape index: {}]   ;;  %s1974_s5 = inlined_call_operand.vmem [shape: f32[128,128], index: 5, kind: input, shape index: {}]   ;;  %s1975_s6 = inlined_call_operand.vmem [shape: f32[2,64,128], index: 6, kind: output, shape index: {}]  }
   0x1 LB: > { %s1666_s22 = sadd.s32 4294967295, %s1612_s21   ;;  %p1134_p0 = scmp.ge.s32.totalorder %s1612_s21, 1  ;;  %s1612_s21 = sphi %s1660_s21, %s16_s21  }
   0x2   : > { %p214_p1 = scmp.lt.s32.totalorder %s1612_s21, 3 }
   0x4   : > { %p215_p2 = pnand %p1134_p0, %p214_p1 }
   0x5   : > { %s1135_s23 = sshll.u32 (!%p215_p2), %s1666_s22, 2  ;;  %s1614_s28 = smov (!%p215_p2), 8   ;;  %v1569_v34 = vld [vmem:[%s1970_s1] sm:$0xff] (!%p215_p2)   ;;  %v1570_v35 = vld [vmem:[%s1970_s1 + $0x8] sm:$0xff] (!%p215_p2)   ;;  %vm707_vm0 = vcmask (!%p215_p2), 1041408   ;;  %vm591_vm1 = vcmask (!%p215_p2), 31744  }
   0x6   : > { %218 = sbr.rel (%p215_p2) target bundleno = 954 (0x3ba), region = 44  ;;  %p246_p3 = scmp.lt.s32.totalorder (!%p215_p2), %s1135_s23, 7  ;;  %1256 = vmatprep.subr.bf16.mxu0 (!%p215_p2), %v1569_v34  ;;  %v1571_v39 = vld [vmem:[%s1970_s1 + $0x10] ss:$0 sps:$4 sm:$0x33] (!%p215_p2)   ;;  %vm600_vm2 = vcmask (!%p215_p2), 64512  }
   0x7   : > { %s1615_s29 = smov (!%p215_p2), 4   ;;  %s1616_s30 = smov (!%p215_p2), 12   ;;  %1257 = vmatpush3.bf16.msra.mxu0 (!%p215_p2), %v1569_v34  ;;  %v709_v43 = vsel (!%p215_p2), %vm707_vm0, %v1571_v39, 0  ;;  %vm609_vm3 = vcmask (!%p215_p2), 97280   ;;  %vm618_vm4 = vcmask (!%p215_p2), 130048   ;;  %vm627_vm5 = vcmask (!%p215_p2), 162816  }
   0x8   : > { %s1617_s7 = smov (!%p215_p2), 16   ;;  %s1618_s12 = smov (!%p215_p2), 20   ;;  %1258 = vmatprep.subr.bf16.mxu0 (!%p215_p2), %v1570_v35  ;;  %vm636_vm6 = vcmask (!%p215_p2), 195584   ;;  %vm645_vm7 = vcmask (!%p215_p2), 228352   ;;  %vm654_vm8 = vcmask (!%p215_p2), 261120   ;;  %vm694_vm9 = vcmask (!%p215_p2), 293888  }
   0x9   : > { %s1619_s15 = smov (!%p215_p2), 24   ;;  %s1620_s16 = smov (!%p215_p2), 28   ;;  %vm1623_vm10 = vmmov (!%p215_p2), 0  }
   0xa   : > { %s1621_s17 = smov (!%p215_p2), 32   ;;  %p252_p4 = scmp.lt.s32.totalorder (!%p215_p2), %s1666_s22, 1 }
   0xb   : > { %1259 = vmatpush3.bf16.msra.mxu0 (!%p215_p2), %v1570_v35 }
   0xc   : > { %1388 = vmatprep.subr.msk.bf16.mxu0 (!%p215_p2), %vm707_vm0, %v1571_v39 }
   0xd   : > { %s1977_s23 = smov (!%p246_p3, %s1135_s23), 7  ;;  %s1979_s22 = smov (!%p252_p4, %s1666_s22), 1 }
   0xe   : > { %s1389_s24 = smul.u32 144, %s1977_s23 }
   0xf   : > { %1261 = vmatpush3.bf16.msra.mxu0 %v709_v43 }
  0x10   : > { %s1674_s27 = scalar_lea.vmem %s1969_s0, %s1389_s24 }
  0x11   : > { %v275_v0 = vld [vmem:[%s1674_s27 + $0x1] sm:$0xff]  ;;  %v1678_v1 = vld [vmem:[%s1674_s27 + $0x11] sm:$0xff] }
  0x12   : > { %v1139_v2 = vld [vmem:[%s1674_s27 + $0x90] sm:$0xff]  ;;  %v1419_v3 = vpack.i.bf16 %v1678_v1, %v275_v0  ;;  %v1683_v4 = vld [vmem:[%s1674_s27 + $0xa0] sm:$0xff] }
  0x13   : > { %v1686_v5 = vld [vmem:[%s1674_s27 + $0x21] sm:$0xff]  ;;  %v1689_v6 = vld [vmem:[%s1674_s27 + $0x31] sm:$0xff]  ;;  %v1409_v7 = vpack.i.bf16 %v1683_v4, %v1139_v2 }
  0x14   : > { %v1693_v8 = vld [vmem:[%s1674_s27 + $0xb0] sm:$0xff]  ;;  %v1142_v9 = vld [vmem:[%s1674_s27 + $0xc0] sm:$0xff]  ;;  %1420 = vrot.lane.b32.xlu1 %v1419_v3, %s1614_s28  ;;  %v1424_v10 = vpack.i.bf16 %v1689_v6, %v1686_v5  ;;  %v1479_v45 = vpack.i.bf16 %v1686_v5, %v1678_v1 }
  0x15   : > { %1410 = vrot.lane.b32.xlu0 %v1409_v7, %s1615_s29  ;;  %v1414_v11 = vpack.i.bf16 %v1142_v9, %v1693_v8  ;;  %v1149_v12 = vld [vmem:[%s1674_s27 + $0x140] sm:$0xff]  ;;  %v1150_v13 = vld [vmem:[%s1674_s27 + $0x150] sm:$0xff]  ;;  %v1469_v41 = vpack.i.bf16 %v1693_v8, %v1683_v4 }
  0x16   : > { %v1147_v14 = vld [vmem:[%s1674_s27 + $0x120] sm:$0xff]  ;;  %v1148_v15 = vld [vmem:[%s1674_s27 + $0x130] sm:$0xff]  ;;  %v1434_v16 = vpack.i.bf16 %v1150_v13, %v1149_v12 }
  0x17   : > { %v1429_v17 = vpack.i.bf16 %v1148_v15, %v1147_v14  ;;  %v1157_v18 = vld [vmem:[%s1674_s27 + $0x1d0] sm:$0xff]  ;;  %v1158_v19 = vld [vmem:[%s1674_s27 + $0x1e0] sm:$0xff] }
  0x18   : > { %1425 = vrot.lane.b32.xlu1 %v1424_v10, %s1614_s28  ;;  %v1155_v20 = vld [vmem:[%s1674_s27 + $0x1b0] sm:$0xff]  ;;  %v1156_v21 = vld [vmem:[%s1674_s27 + $0x1c0] sm:$0xff]  ;;  %v1444_v22 = vpack.i.bf16 %v1158_v19, %v1157_v18 }
  0x19   : > { %1415 = vrot.lane.b32.xlu0 %v1414_v11, %s1615_s29  ;;  %v1439_v23 = vpack.i.bf16 %v1156_v21, %v1155_v20  ;;  %v1165_v24 = vld [vmem:[%s1674_s27 + $0x141] sm:$0xff]  ;;  %v1166_v25 = vld [vmem:[%s1674_s27 + $0x151] sm:$0xff] }
  0x1a   : > { %v1163_v26 = vld [vmem:[%s1674_s27 + $0x121] sm:$0xff]  ;;  %v1164_v27 = vld [vmem:[%s1674_s27 + $0x131] sm:$0xff]  ;;  %v1454_v28 = vpack.i.bf16 %v1166_v25, %v1165_v24 }
  0x1b   : > { %v1449_v29 = vpack.i.bf16 %v1164_v27, %v1163_v26  ;;  %v1720_v30 = vld [vmem:[%s1674_s27 + $0x30] sm:$0xff]  ;;  %v1723_v31 = vld [vmem:[%s1674_s27 + $0x40] sm:$0xff] }
  0x1c   : > { %1435 = vrot.lane.b32.xlu1 %v1434_v16, %s1616_s30  ;;  %v1726_v32 = vld [vmem:[%s1674_s27 + $0x10] sm:$0xff]  ;;  %v1729_v33 = vld [vmem:[%s1674_s27 + $0x20] sm:$0xff]  ;;  %v1464_v36 = vpack.i.bf16 %v1723_v31, %v1720_v30 }
  0x1d   : > { %1430 = vrot.lane.b32.xlu0 %v1429_v17, %s1616_s30  ;;  %v1459_v37 = vpack.i.bf16 %v1729_v33, %v1726_v32  ;;  %v1182_v38 = vld [vmem:[%s1674_s27 + $0xd0] sm:$0xff]  ;;  %v1752_v42 = vld [vmem:[%s1674_s27 + $0xe0] sm:$0xff] }
  0x1e   : > { %v1474_v40 = vpack.i.bf16 %v1182_v38, %v1142_v9  ;;  %v1484_v44 = vpack.i.bf16 %v1752_v42, %v1182_v38  ;;  %v1145_v46 = vld [vmem:[%s1674_s27 + $0xf0] sm:$0xff]  ;;  %v1146_v47 = vld [vmem:[%s1674_s27 + $0x100] sm:$0xff] }
  0x1f   : > { %v1190_v48 = vld [vmem:[%s1674_s27 + $0x41] sm:$0xff]  ;;  %v1494_v49 = vpack.i.bf16 %v1146_v47, %v1145_v46  ;;  %v282_v52 = vld [vmem:[%s1674_s27 + $0x71] sm:$0xff]  ;;  %v1549_v18 = vpack.i.bf16 %v1145_v46, %v1752_v42 }
  0x20   : > { %1445 = vrot.lane.b32.xlu1 %v1444_v22, %s1617_s7  ;;  %v1489_v50 = vpack.i.bf16 %v1190_v48, %v1689_v6  ;;  %v281_v51 = vld [vmem:[%s1674_s27 + $0x61] sm:$0xff]  ;;  %v280_v53 = vld [vmem:[%s1674_s27 + $0x51] sm:$0xff] }
  0x21   : > { %1440 = vrot.lane.b32.xlu0 %v1439_v23, %s1617_s7  ;;  %v1504_v54 = vpack.i.bf16 %v282_v52, %v281_v51  ;;  %v1499_v55 = vpack.i.bf16 %v280_v53, %v1190_v48  ;;  %v1153_v56 = vld [vmem:[%s1674_s27 + $0x180] sm:$0xff]  ;;  %v1154_v57 = vld [vmem:[%s1674_s27 + $0x190] sm:$0xff]  ;;  %v1559_v21 = vpack.i.bf16 %v281_v51, %v280_v53 }
  0x22   : > { %v1151_v58 = vld [vmem:[%s1674_s27 + $0x160] sm:$0xff]  ;;  %v1152_v59 = vld [vmem:[%s1674_s27 + $0x170] sm:$0xff]  ;;  %v1514_v60 = vpack.i.bf16 %v1154_v57, %v1153_v56 }
  0x23   : > { %v1509_v61 = vpack.i.bf16 %v1152_v59, %v1151_v58  ;;  %v1161_v62 = vld [vmem:[%s1674_s27 + $0x210] sm:$0xff]  ;;  %v1162_v63 = vld [vmem:[%s1674_s27 + $0x220] sm:$0xff] }
  0x24   : > { %1455 = vrot.lane.b32.xlu1 %v1454_v28, %s1618_s12  ;;  %v1159_v0 = vld [vmem:[%s1674_s27 + $0x1f0] sm:$0xff]  ;;  %v1160_v1 = vld [vmem:[%s1674_s27 + $0x200] sm:$0xff]  ;;  %v1524_v2 = vpack.i.bf16 %v1162_v63, %v1161_v62 }
  0x25   : > { %1450 = vrot.lane.b32.xlu0 %v1449_v29, %s1618_s12  ;;  %v1519_v3 = vpack.i.bf16 %v1160_v1, %v1159_v0  ;;  %v1169_v4 = vld [vmem:[%s1674_s27 + $0x181] sm:$0xff]  ;;  %v1170_v5 = vld [vmem:[%s1674_s27 + $0x191] sm:$0xff] }
  0x26   : > { %v1167_v6 = vld [vmem:[%s1674_s27 + $0x161] sm:$0xff]  ;;  %v1168_v7 = vld [vmem:[%s1674_s27 + $0x171] sm:$0xff]  ;;  %v1534_v8 = vpack.i.bf16 %v1170_v5, %v1169_v4 }
  0x27   : > { %v1529_v9 = vpack.i.bf16 %v1168_v7, %v1167_v6  ;;  %v1789_v10 = vld [vmem:[%s1674_s27 + $0x70] sm:$0xff]  ;;  %v1178_v11 = vld [vmem:[%s1674_s27 + $0x80] sm:$0xff] }
  0x28   : > { %1465 = vrot.lane.b32.xlu1 %v1464_v36, %s1619_s15  ;;  %v1793_v12 = vld [vmem:[%s1674_s27 + $0x50] sm:$0xff]  ;;  %v1796_v13 = vld [vmem:[%s1674_s27 + $0x60] sm:$0xff]  ;;  %v1544_v14 = vpack.i.bf16 %v1178_v11, %v1789_v10 }
  0x29   : > { %1460 = vrot.lane.b32.xlu0 %v1459_v37, %s1619_s15  ;;  %v1539_v15 = vpack.i.bf16 %v1796_v13, %v1793_v12  ;;  %v1186_v16 = vld [vmem:[%s1674_s27 + $0x110] sm:$0xff]  ;;  %v1194_v19 = vld [vmem:[%s1674_s27 + $0x81] sm:$0xff] }
  0x2a   : > { %v1554_v17 = vpack.i.bf16 %v1186_v16, %v1146_v47  ;;  %v1564_v20 = vpack.i.bf16 %v1194_v19, %v282_v52  ;;  %v258_v37 = vld [vmem:[%s1674_s27] sm:$0xff] }
  0x2c   : > { %1475 = vrot.lane.b32.xlu1 %v1474_v40, %s1620_s16 }
  0x2d   : > { %1470 = vrot.lane.b32.xlu0 %v1469_v41, %s1620_s16 }
  0x30   : > { %1485 = vrot.lane.b32.xlu1 %v1484_v44, %s1615_s29 }
  0x31   : > { %1480 = vrot.lane.b32.xlu0 %v1479_v45, %s1621_s17 }
  0x34   : > { %1495 = vrot.lane.b32.xlu1 %v1494_v49, %s1615_s29 }
  0x35   : > { %1490 = vrot.lane.b32.xlu0 %v1489_v50, %s1621_s17 }
  0x38   : > { %1505 = vrot.lane.b32.xlu1 %v1504_v54, %s1614_s28 }
  0x39   : > { %1500 = vrot.lane.b32.xlu0 %v1499_v55, %s1614_s28 }
  0x3c   : > { %1515 = vrot.lane.b32.xlu1 %v1514_v60, %s1616_s30 }
  0x3d   : > { %1510 = vrot.lane.b32.xlu0 %v1509_v61, %s1616_s30 }
  0x40   : > { %1525 = vrot.lane.b32.xlu1 %v1524_v2, %s1617_s7 }
  0x41   : > { %1520 = vrot.lane.b32.xlu0 %v1519_v3, %s1617_s7 }
  0x44   : > { %1535 = vrot.lane.b32.xlu1 %v1534_v8, %s1618_s12 }
  0x45   : > { %1530 = vrot.lane.b32.xlu0 %v1529_v9, %s1618_s12  ;;  %s1214_s12 = sshll.u32 %s1979_s22, 6 }
  0x48   : > { %1545 = vrot.lane.b32.xlu1 %v1544_v14, %s1619_s15 }
  0x49   : > { %1540 = vrot.lane.b32.xlu0 %v1539_v15, %s1619_s15  ;;  %s256_s15 = scalar_lea.vmem %s1975_s6, %s1214_s12 }
  0x4c   : > { %1555 = vrot.lane.b32.xlu1 %v1554_v17, %s1620_s16 }
  0x4d   : > { %1550 = vrot.lane.b32.xlu0 %v1549_v18, %s1620_s16 }
  0x50   : > { %1565 = vrot.lane.b32.xlu1 %v1564_v20, %s1621_s17 }
  0x51   : > { %1560 = vrot.lane.b32.xlu0 %v1559_v21, %s1621_s17 }
  0x86   : > { %v1421_v22 = vpop.permute.xlu1 %1420 }
  0x87   : > { %v1411_v23 = vpop.permute.xlu0 %1410  ;;  %v1423_v41 = vunpack.i.h.bf16 %v1421_v22  ;;  %v1422_v42 = vunpack.i.l.bf16 %v1421_v22 }
  0x88   : > { %v1413_v34 = vunpack.i.h.bf16 %v1411_v23  ;;  %v1412_v35 = vunpack.i.l.bf16 %v1411_v23 }
  0x8a   : > { %v1426_v24 = vpop.permute.xlu1 %1425  ;;  %v592_v43 = vsel %vm591_vm1, %v258_v37, %v1412_v35  ;;  %v593_v44 = vsel %vm591_vm1, %v1726_v32, %v1413_v34 }
  0x8b   : > { %v1416_v25 = vpop.permute.xlu0 %1415  ;;  %v1428_v45 = vunpack.i.h.bf16 %v1426_v24  ;;  %v1427_v46 = vunpack.i.l.bf16 %v1426_v24  ;;  %v601_v55 = vsel %vm600_vm2, %v592_v43, %v1422_v42  ;;  %v602_v32 = vsel %vm600_vm2, %v593_v44, %v1423_v41 }
  0x8c   : > { %v1418_v38 = vunpack.i.h.bf16 %v1416_v25  ;;  %v1417_v39 = vunpack.i.l.bf16 %v1416_v25 }
  0x8e   : > { %v1436_v26 = vpop.permute.xlu1 %1435  ;;  %v594_v48 = vsel %vm591_vm1, %v1729_v33, %v1417_v39  ;;  %v595_v49 = vsel %vm591_vm1, %v1720_v30, %v1418_v38 }
  0x8f   : > { %v1431_v27 = vpop.permute.xlu0 %1430  ;;  %v1438_v50 = vunpack.i.h.bf16 %v1436_v26  ;;  %v1437_v51 = vunpack.i.l.bf16 %v1436_v26  ;;  %v603_v56 = vsel %vm600_vm2, %v594_v48, %v1427_v46  ;;  %v604_v33 = vsel %vm600_vm2, %v595_v49, %v1428_v45 }
  0x90   : > { %v1433_v53 = vunpack.i.h.bf16 %v1431_v27  ;;  %v1432_v54 = vunpack.i.l.bf16 %v1431_v27 }
  0x91   : > { %v612_v59 = vsel %vm609_vm3, %v603_v56, %v1437_v51  ;;  %v613_v60 = vsel %vm609_vm3, %v604_v33, %v1438_v50 }
  0x92   : > { %v1812_v28 = vpop.permute.xlu1 %1445  ;;  %v610_v0 = vsel %vm609_vm3, %v601_v55, %v1432_v54  ;;  %v611_v1 = vsel %vm609_vm3, %v602_v32, %v1433_v53 }
  0x93   : > { %v1441_v29 = vpop.permute.xlu0 %1440  ;;  %v1448_v4 = vunpack.i.h.bf16 %v1812_v28  ;;  %v1447_v5 = vunpack.i.l.bf16 %v1812_v28 }
  0x94   : > { %v1443_v57 = vunpack.i.h.bf16 %v1441_v29  ;;  %v1442_v58 = vunpack.i.l.bf16 %v1441_v29 }
  0x95   : > { %v621_v29 = vsel %vm618_vm4, %v612_v59, %v1447_v5  ;;  %v622_v34 = vsel %vm618_vm4, %v613_v60, %v1448_v4 }
  0x96   : > { %v1814_v36 = vpop.permute.xlu1 %1455  ;;  %v619_v8 = vsel %vm618_vm4, %v610_v0, %v1442_v58  ;;  %v620_v9 = vsel %vm618_vm4, %v611_v1, %v1443_v57 }
  0x97   : > { %v1451_v40 = vpop.permute.xlu0 %1450  ;;  %v1458_v11 = vunpack.i.h.bf16 %v1814_v36  ;;  %v1457_v14 = vunpack.i.l.bf16 %v1814_v36 }
  0x98   : > { %v1453_v61 = vunpack.i.h.bf16 %v1451_v40  ;;  %v1452_v62 = vunpack.i.l.bf16 %v1451_v40 }
  0x99   : > { %v630_v38 = vsel %vm627_vm5, %v621_v29, %v1457_v14  ;;  %v631_v39 = vsel %vm627_vm5, %v622_v34, %v1458_v11 }
  0x9a   : > { %v1820_v47 = vpop.permute.xlu1 %1465  ;;  %v628_v16 = vsel %vm627_vm5, %v619_v8, %v1452_v62  ;;  %v629_v17 = vsel %vm627_vm5, %v620_v9, %v1453_v61 }
  0x9b   : > { %v1461_v52 = vpop.permute.xlu0 %1460  ;;  %v1468_v18 = vunpack.i.h.bf16 %v1820_v47  ;;  %v1467_v19 = vunpack.i.l.bf16 %v1820_v47 }
  0x9c   : > { %v1463_v2 = vunpack.i.h.bf16 %v1461_v52  ;;  %v1462_v3 = vunpack.i.l.bf16 %v1461_v52 }
  0x9d   : > { %v639_v42 = vsel %vm636_vm6, %v630_v38, %v1467_v19  ;;  %v640_v43 = vsel %vm636_vm6, %v631_v39, %v1468_v18 }
  0x9e   : > { %v1476_v30 = vpop.permute.xlu1 %1475  ;;  %v637_v21 = vsel %vm636_vm6, %v628_v16, %v1462_v3  ;;  %v638_v22 = vsel %vm636_vm6, %v629_v17, %v1463_v2 }
  0x9f   : > { %v1471_v63 = vpop.permute.xlu0 %1470  ;;  %v1478_v25 = vunpack.i.h.bf16 %v1476_v30  ;;  %v1477_v26 = vunpack.i.l.bf16 %v1476_v30 }
  0xa0   : > { %v1473_v6 = vunpack.i.h.bf16 %v1471_v63  ;;  %v1472_v7 = vunpack.i.l.bf16 %v1471_v63 }
  0xa1   : > { %v648_v46 = vsel %vm645_vm7, %v639_v42, %v1477_v26  ;;  %v649_v47 = vsel %vm645_vm7, %v640_v43, %v1478_v25 }
  0xa2   : > { %v1486_v15 = vpop.permute.xlu1 %1485  ;;  %v646_v27 = vsel %vm645_vm7, %v637_v21, %v1472_v7  ;;  %v647_v28 = vsel %vm645_vm7, %v638_v22, %v1473_v6 }
  0xa3   : > { %v1481_v20 = vpop.permute.xlu0 %1480  ;;  %v1488_v57 = vunpack.i.h.bf16 %v1486_v15  ;;  %v1487_v58 = vunpack.i.l.bf16 %v1486_v15 }
  0xa4   : > { %v1483_v23 = vunpack.i.h.bf16 %v1481_v20  ;;  %v1482_v24 = vunpack.i.l.bf16 %v1481_v20 }
  0xa5   : > { %v596_v6 = vsel %vm591_vm1, %v1723_v31, %v1487_v58  ;;  %v597_v7 = vsel %vm591_vm1, %v1793_v12, %v1488_v57 }
  0xa6   : > { %v1496_v35 = vpop.permute.xlu1 %1495  ;;  %v655_v36 = vsel %vm654_vm8, %v646_v27, %v1482_v24  ;;  %v656_v37 = vsel %vm654_vm8, %v647_v28, %v1483_v23 }
  0xa7   : > { %v1491_v40 = vpop.permute.xlu0 %1490  ;;  %v663_v41 = vpack.c.bf16 %v656_v37, %v655_v36  ;;  %v1498_v56 = vunpack.i.h.bf16 %v1496_v35  ;;  %v1497_v33 = vunpack.i.l.bf16 %v1496_v35 }
  0xa8   : > { %v1493_v44 = vunpack.i.h.bf16 %v1491_v40  ;;  %v1492_v45 = vunpack.i.l.bf16 %v1491_v40 }
  0xa9   : > { %1262 = vmatprep.mubr.msk.bf16.mxu0 %vm694_vm9, %v663_v41  ;;  %v598_v2 = vsel %vm591_vm1, %v1796_v13, %v1497_v33  ;;  %v599_v3 = vsel %vm591_vm1, %v1789_v10, %v1498_v56 }
  0xaa   : > { %v657_v48 = vsel %vm654_vm8, %v648_v46, %v1492_v45  ;;  %v658_v49 = vsel %vm654_vm8, %v649_v47, %v1493_v44  ;;  %v1506_v50 = vpop.permute.xlu1 %1505 }
  0xab   : > { %v664_v51 = vpack.c.bf16 %v658_v49, %v657_v48  ;;  %v1501_v52 = vpop.permute.xlu0 %1500  ;;  %v1508_v30 = vunpack.i.h.bf16 %v1506_v50  ;;  %v1507_v59 = vunpack.i.l.bf16 %v1506_v50 }
  0xac   : > { %v1503_v61 = vunpack.i.h.bf16 %v1501_v52  ;;  %v1502_v62 = vunpack.i.l.bf16 %v1501_v52 }
  0xad   : > { %1263 = vmatmul.mubr.msk.bf16.vlgmr.msra.gmra.mrb[0].mxu0 %vm694_vm9, %v664_v51  ;;  %v607_v8 = vsel %vm600_vm2, %v598_v2, %v1507_v59  ;;  %v608_v9 = vsel %vm600_vm2, %v599_v3, %v1508_v30  ;;  %v791_v2 = vld [vmem:[%s1974_s5 + $0x10] sm:$0xff]  ;;  %v1622_v3 = vmov 0.0|0.0  }
  0xae   : > { %v1516_v53 = vpop.permute.xlu1 %1515  ;;  %v605_v14 = vsel %vm600_vm2, %v596_v6, %v1502_v62  ;;  %v606_v13 = vsel %vm600_vm2, %v597_v7, %v1503_v61  ;;  %1340 = vmatprep.subr.bf16.mxu1 %v1622_v3  ;;  %1364 = vmatprep.subr.bf16.mxu0 %v1622_v3  ;;  %v793_v7 = vld [vmem:[%s1974_s5 + $0x20] sm:$0xff] }
  0xaf   : > { %v1511_v54 = vpop.permute.xlu0 %1510  ;;  %v1518_v0 = vunpack.i.h.bf16 %v1516_v53  ;;  %v1517_v1 = vunpack.i.l.bf16 %v1516_v53 }
  0xb0   : > { %v1513_v4 = vunpack.i.h.bf16 %v1511_v54  ;;  %v1512_v5 = vunpack.i.l.bf16 %v1511_v54 }
  0xb1   : > { %v616_v17 = vsel %vm609_vm3, %v607_v8, %v1517_v1  ;;  %v617_v18 = vsel %vm609_vm3, %v608_v9, %v1518_v0  ;;  %v789_v0 = vld [vmem:[%s1974_s5] sm:$0xff]  ;;  %v790_v1 = vld [vmem:[%s1974_s5 + $0x8] sm:$0xff] }
  0xb2   : > { %v1526_v55 = vpop.permute.xlu1 %1525  ;;  %v614_v12 = vsel %vm609_vm3, %v605_v14, %v1512_v5  ;;  %v615_v20 = vsel %vm609_vm3, %v606_v13, %v1513_v4  ;;  %v1341_v4 = vpack.c.bf16 %v790_v1, %v789_v0  ;;  %v792_v5 = vld [vmem:[%s1974_s5 + $0x18] sm:$0xff]  ;;  %v794_v8 = vld [vmem:[%s1974_s5 + $0x28] sm:$0xff] }
  0xb3   : > { %v1521_v32 = vpop.permute.xlu0 %1520  ;;  %v1528_v15 = vunpack.i.h.bf16 %v1526_v55  ;;  %v1527_v16 = vunpack.i.l.bf16 %v1526_v55  ;;  %v1344_v6 = vpack.c.bf16 %v792_v5, %v791_v2  ;;  %v1347_v9 = vpack.c.bf16 %v794_v8, %v793_v7  ;;  %v796_v14 = vld [vmem:[%s1974_s5 + $0x38] sm:$0xff] }
  0xb4   : > { %v1523_v31 = vunpack.i.h.bf16 %v1521_v32  ;;  %v1522_v19 = vunpack.i.l.bf16 %v1521_v32  ;;  %1342 = vmatpush3.bf16.msra.mxu1 %v1341_v4  ;;  %1366 = vmatpush3.bf16.msra.mxu0 %v1341_v4 }
  0xb5   : > { %v625_v28 = vsel %vm618_vm4, %v616_v17, %v1527_v16  ;;  %v626_v29 = vsel %vm618_vm4, %v617_v18, %v1528_v15  ;;  %1343 = vmatprep.subr.bf16.mxu1 %v1622_v3  ;;  %1367 = vmatprep.subr.bf16.mxu0 %v1622_v3  ;;  %v797_v15 = vld [vmem:[%s1974_s5 + $0x40] sm:$0xff]  ;;  %v798_v16 = vld [vmem:[%s1974_s5 + $0x48] sm:$0xff]  ;;  %v799_v17 = vld [vmem:[%s1974_s5 + $0x50] sm:$0xff] }
  0xb6   : > { %v1536_v60 = vpop.permute.xlu1 %1535  ;;  %v623_v37 = vsel %vm618_vm4, %v614_v12, %v1522_v19  ;;  %v624_v38 = vsel %vm618_vm4, %v615_v20, %v1523_v31  ;;  %v800_v18 = vld [vmem:[%s1974_s5 + $0x58] sm:$0xff]  ;;  %v801_v19 = vld [vmem:[%s1974_s5 + $0x60] sm:$0xff]  ;;  %v802_v12 = vld [vmem:[%s1974_s5 + $0x68] sm:$0xff] }
  0xb7   : > { %v1531_v63 = vpop.permute.xlu0 %1530  ;;  %v1538_v21 = vunpack.i.h.bf16 %v1536_v60  ;;  %v1537_v22 = vunpack.i.l.bf16 %v1536_v60  ;;  %v1356_v31 = vpack.c.bf16 %v800_v18, %v799_v17  ;;  %v1359_v20 = vpack.c.bf16 %v802_v12, %v801_v19 }
  0xb8   : > { %v1533_v23 = vunpack.i.h.bf16 %v1531_v63  ;;  %v1532_v24 = vunpack.i.l.bf16 %v1531_v63  ;;  %1345 = vmatpush3.bf16.msra.mxu1 %v1344_v6  ;;  %1369 = vmatpush3.bf16.msra.mxu0 %v1344_v6 }
  0xb9   : > { %v634_v41 = vsel %vm627_vm5, %v625_v28, %v1537_v22  ;;  %v635_v42 = vsel %vm627_vm5, %v626_v29, %v1538_v21  ;;  %1346 = vmatprep.subr.bf16.mxu1 %v1622_v3  ;;  %1370 = vmatprep.subr.bf16.mxu0 %v1622_v3  ;;  %v1624_v21 = vmov 0.0   ;;  %v803_v22 = vld [vmem:[%s1974_s5 + $0x70] sm:$0xff]  ;;  %v1195_v29 = vld [vmem:[%s1971_s2] ss:$0 sm:$0xff] }
  0xba   : > { %v1546_v11 = vpop.permute.xlu1 %1545  ;;  %v632_v45 = vsel %vm627_vm5, %v623_v37, %v1532_v24  ;;  %v633_v46 = vsel %vm627_vm5, %v624_v38, %v1533_v23  ;;  %1302 = vmatprep.mubr.msk.f32.mxu1 %vm1623_vm10, %v1624_v21  ;;  %v804_v23 = vld [vmem:[%s1974_s5 + $0x78] sm:$0xff] }
  0xbb   : > { %v1541_v10 = vpop.permute.xlu0 %1540  ;;  %v1548_v25 = vunpack.i.h.bf16 %v1546_v11  ;;  %v1547_v26 = vunpack.i.l.bf16 %v1546_v11  ;;  %v795_v11 = vld [vmem:[%s1974_s5 + $0x30] sm:$0xff]  ;;  %v1362_v24 = vpack.c.bf16 %v804_v23, %v803_v22 }
  0xbc   : > { %v1543_v34 = vunpack.i.h.bf16 %v1541_v10  ;;  %v1542_v35 = vunpack.i.l.bf16 %v1541_v10  ;;  %1348 = vmatpush3.bf16.msra.mxu1 %v1347_v9  ;;  %1372 = vmatpush3.bf16.msra.mxu0 %v1347_v9  ;;  %v1350_v13 = vpack.c.bf16 %v796_v14, %v795_v11  ;;  %v1353_v10 = vpack.c.bf16 %v798_v16, %v797_v15 }
  0xbd   : > { %v643_v47 = vsel %vm636_vm6, %v634_v41, %v1547_v26  ;;  %v644_v48 = vsel %vm636_vm6, %v635_v42, %v1548_v25  ;;  %1349 = vmatprep.subr.bf16.mxu1 %v1622_v3  ;;  %1373 = vmatprep.subr.bf16.mxu0 %v1622_v3 }
  0xbe   : > { %v1556_v27 = vpop.permute.xlu1 %1555  ;;  %v641_v50 = vsel %vm636_vm6, %v632_v45, %v1542_v35  ;;  %v642_v51 = vsel %vm636_vm6, %v633_v46, %v1543_v34 }
  0xbf   : > { %v1551_v36 = vpop.permute.xlu0 %1550  ;;  %v1558_v39 = vunpack.i.h.bf16 %v1556_v27  ;;  %v1557_v40 = vunpack.i.l.bf16 %v1556_v27 }
  0xc0   : > { %v1553_v43 = vunpack.i.h.bf16 %v1551_v36  ;;  %v1552_v44 = vunpack.i.l.bf16 %v1551_v36  ;;  %1351 = vmatpush3.bf16.msra.mxu1 %v1350_v13  ;;  %1375 = vmatpush3.bf16.msra.mxu0 %v1350_v13 }
  0xc1   : > { %v652_v55 = vsel %vm645_vm7, %v643_v47, %v1557_v40  ;;  %v653_v32 = vsel %vm645_vm7, %v644_v48, %v1558_v39  ;;  %1352 = vmatprep.subr.bf16.mxu1 %v1622_v3  ;;  %1376 = vmatprep.subr.bf16.mxu0 %v1622_v3 }
  0xc2   : > { %v1566_v49 = vpop.permute.xlu1 %1565  ;;  %v650_v57 = vsel %vm645_vm7, %v641_v50, %v1552_v44  ;;  %v651_v58 = vsel %vm645_vm7, %v642_v51, %v1553_v43 }
  0xc3   : > { %v1568_v52 = vunpack.i.h.bf16 %v1566_v49  ;;  %v1567_v53 = vunpack.i.l.bf16 %v1566_v49  ;;  %v1561_v54 = vpop.permute.xlu0 %1560 }
  0xc4   : > { %v1563_v56 = vunpack.i.h.bf16 %v1561_v54  ;;  %v1562_v33 = vunpack.i.l.bf16 %v1561_v54  ;;  %1354 = vmatpush3.bf16.msra.mxu1 %v1353_v10  ;;  %1378 = vmatpush3.bf16.msra.mxu0 %v1353_v10 }
  0xc5   : > { %v661_v30 = vsel %vm654_vm8, %v652_v55, %v1567_v53  ;;  %v662_v59 = vsel %vm654_vm8, %v653_v32, %v1568_v52  ;;  %1355 = vmatprep.subr.bf16.mxu1 %v1622_v3  ;;  %1379 = vmatprep.subr.bf16.mxu0 %v1622_v3 }
  0xc6   : > { %v666_v60 = vpack.c.bf16 %v662_v59, %v661_v30  ;;  %v659_v61 = vsel %vm654_vm8, %v650_v57, %v1562_v33  ;;  %v660_v62 = vsel %vm654_vm8, %v651_v58, %v1563_v56  ;;  %v876_v57 = vlaneseq }
  0xc7   : > { %v665_v63 = vpack.c.bf16 %v660_v62, %v659_v61 }
  0xc8   : > { %1357 = vmatpush3.bf16.msra.mxu1 %v1356_v31  ;;  %1381 = vmatpush3.bf16.msra.mxu0 %v1356_v31  ;;  %v877_v58 = vshrl.u32 %v876_v57, 7 }
  0xc9   : > { %1266 = vmatprep.mubr.msk.bf16.mxu0 %vm694_vm9, %v665_v63  ;;  %1358 = vmatprep.subr.bf16.mxu1 %v1622_v3 }
  0xca   : > { %1267 = vmatmul.mubr.msk.bf16.gmra.mrb[4].mxu0 %vm694_vm9, %v666_v60  ;;  %1382 = vmatprep.subr.bf16.mxu0 %v1622_v3  ;;  %v878_v30 = vsub.s32 0, %v877_v58 }
  0xcb   : > { %1337 = vmatprep.mubr.msk.f32.mxu0 %vm1623_vm10, %v1624_v21 }
  0xcc   : > { %1360 = vmatpush3.bf16.msra.mxu1 %v1359_v20  ;;  %1384 = vmatpush3.bf16.msra.mxu0 %v1359_v20 }
  0xcd   : > { %1361 = vmatprep.subr.bf16.mxu1 %v1622_v3  ;;  %1385 = vmatprep.subr.bf16.mxu0 %v1622_v3 }
  0xd0   : > { %1363 = vmatpush3.bf16.msra.mxu1 %v1362_v24  ;;  %1387 = vmatpush3.bf16.msra.mxu0 %v1362_v24 }
 0x180   : > { %v1264_v25 = vpop.f32.mrb[0].mxu0 }
 0x181   : > { %v745_v26 = vpop.f32.mrb[1].mxu0  ;;  %v754_v37 = vadd.f32 %v1264_v25, %v1195_v29 }
 0x182   : > { %v1265_v27 = vpop.f32.mrb[2].mxu0  ;;  %v746_v35 = vadd.f32 %v1195_v29, %v745_v26 }
 0x183   : > { %v748_v28 = vpop.f32.mrb[3].mxu0  ;;  %v757_v39 = vadd.f32 %v1265_v27, %v1195_v29 }
 0x184   : > { %v749_v34 = vadd.f32 %v1195_v29, %v748_v28 }
 0x186   : > { %v776_v36 = vadd.f32 %v749_v34, %v746_v35 }
 0x188   : > { %v777_v38 = vadd.f32 %v776_v36, %v754_v37 }
 0x18a   : > { %v778_v43 = vadd.f32 %v777_v38, %v757_v39 }
 0x19d   : > { %v1268_v40 = vpop.f32.mrb[4].mxu0 }
 0x19e   : > { %v761_v41 = vpop.f32.mrb[5].mxu0  ;;  %v770_v48 = vadd.f32 %v1268_v40, %v1195_v29 }
 0x19f   : > { %v762_v42 = vadd.f32 %v1195_v29, %v761_v41  ;;  %v1269_v44 = vpop.f32.mrb[6].mxu0 }
 0x1a0   : > { %v764_v45 = vpop.f32.mrb[7].mxu0  ;;  %v773_v50 = vadd.f32 %v1269_v44, %v1195_v29 }
 0x1a1   : > { %v779_v46 = vadd.f32 %v778_v43, %v762_v42  ;;  %v765_v47 = vadd.f32 %v1195_v29, %v764_v45 }
 0x1a3   : > { %v780_v49 = vadd.f32 %v779_v46, %v765_v47 }
 0x1a5   : > { %v781_v51 = vadd.f32 %v780_v49, %v770_v48 }
 0x1a7   : > { %v782_v52 = vadd.f32 %v781_v51, %v773_v50 }
 0x1a9   : > { %v783_v53 = vrot.slane %v782_v52, 4 }
 0x1ab   : > { %v784_v54 = vadd.f32 %v783_v53, %v782_v52 }
 0x1ad   : > { %v785_v55 = vrot.slane %v784_v54, 2 }
 0x1af   : > { %v786_v32 = vadd.f32 %v785_v55, %v784_v54 }
 0x1b1   : > { %v787_v56 = vrot.slane %v786_v32, 1 }
 0x1b3   : > { %v788_v33 = vadd.f32 %v787_v56, %v786_v32 }
 0x1b5   : > { %1303 = vmatmul.mubr.f32.vlgmr.msra.gmra.mrb[0].mxu1 %v788_v33 }
 0x288   : > { %v871_v59 = vpop.f32.mrb[0].mxu1 }
 0x289   : > { %v875_v60 = vmul.f32 0.015625, %v871_v59  ;;  %v1304_v61 = vpop.f32.mrb[1].mxu1 }
 0x28b   : > { %v879_v62 = vrot.slane %v875_v60, %v878_v30 }
 0x28d   : > { %v880_v63 = vsub.f32 %v746_v35, %v879_v62  ;;  %v881_v0 = vsub.f32 %v749_v34, %v879_v62  ;;  %v882_v1 = vsub.f32 %v754_v37, %v879_v62  ;;  %v883_v2 = vsub.f32 %v757_v39, %v879_v62  ;;  %v982_v35 = vld [vmem:[%s1972_s3] sm:$0x1] }
 0x28e   : > { %v884_v5 = vsub.f32 %v762_v42, %v879_v62  ;;  %v885_v8 = vsub.f32 %v765_v47, %v879_v62  ;;  %v886_v14 = vsub.f32 %v770_v48, %v879_v62  ;;  %v887_v16 = vsub.f32 %v773_v50, %v879_v62  ;;  %v1203_v39 = vld [vmem:[%s1973_s4] ss:$0 sm:$0xff] }
 0x28f   : > { %v888_v3 = vmul.f32 %v880_v63, %v880_v63  ;;  %v889_v4 = vmul.f32 %v881_v0, %v881_v0  ;;  %v890_v6 = vmul.f32 %v882_v1, %v882_v1  ;;  %v891_v9 = vmul.f32 %v883_v2, %v883_v2 }
 0x290   : > { %v892_v13 = vmul.f32 %v884_v5, %v884_v5  ;;  %v893_v10 = vmul.f32 %v885_v8, %v885_v8  ;;  %v894_v18 = vmul.f32 %v886_v14, %v886_v14  ;;  %v895_v19 = vmul.f32 %v887_v16, %v887_v16 }
 0x291   : > { %v896_v7 = vadd.f32 %v889_v4, %v888_v3 }
 0x293   : > { %v897_v11 = vadd.f32 %v896_v7, %v890_v6 }
 0x295   : > { %v898_v15 = vadd.f32 %v897_v11, %v891_v9 }
 0x297   : > { %v899_v17 = vadd.f32 %v898_v15, %v892_v13 }
 0x299   : > { %v900_v31 = vadd.f32 %v899_v17, %v893_v10 }
 0x29b   : > { %v901_v12 = vadd.f32 %v900_v31, %v894_v18 }
 0x29d   : > { %v902_v20 = vadd.f32 %v901_v12, %v895_v19 }
 0x29f   : > { %v903_v21 = vrot.slane %v902_v20, 4 }
 0x2a1   : > { %v904_v22 = vadd.f32 %v903_v21, %v902_v20 }
 0x2a3   : > { %v905_v23 = vrot.slane %v904_v22, 2 }
 0x2a5   : > { %v906_v24 = vadd.f32 %v905_v23, %v904_v22 }
 0x2a7   : > { %v907_v25 = vrot.slane %v906_v24, 1 }
 0x2a9   : > { %v908_v26 = vadd.f32 %v907_v25, %v906_v24 }
 0x2ab   : > { %1338 = vmatmul.mubr.f32.vlgmr.msra.gmra.mrb[8].mxu0 %v908_v26 }
 0x37e   : > { %v975_v27 = vpop.f32.mrb[8].mxu0 }
 0x37f   : > { %v979_v28 = vmul.f32 0.015625, %v975_v27  ;;  %v1339_v29 = vpop.f32.mrb[9].mxu0 }
 0x381   : > { %v980_v34 = vadd.f32 1e-05, %v979_v28 }
 0x383   : > { %1572 = vrsqrt.f32 %v980_v34 }
 0x38d   : > { %v1573_v36 = vpop.eup %1572 }
 0x38e   : > { %v983_v37 = vmul.f32 %v1573_v36, %v982_v35 }
 0x390   : > { %v987_v38 = vrot.slane %v983_v37, %v878_v30 }
 0x392   : > { %v988_v40 = vmul.f32 %v987_v38, %v880_v63  ;;  %v989_v41 = vmul.f32 %v987_v38, %v881_v0  ;;  %v990_v42 = vmul.f32 %v987_v38, %v882_v1  ;;  %v991_v43 = vmul.f32 %v987_v38, %v883_v2 }
 0x393   : > { %v992_v44 = vmul.f32 %v987_v38, %v884_v5  ;;  %v993_v45 = vmul.f32 %v987_v38, %v885_v8  ;;  %v994_v46 = vmul.f32 %v987_v38, %v886_v14  ;;  %v995_v47 = vmul.f32 %v987_v38, %v887_v16 }
 0x394   : > { %v1003_v48 = vadd.f32 %v1203_v39, %v988_v40  ;;  %v1004_v49 = vadd.f32 %v1203_v39, %v989_v41  ;;  %v1005_v50 = vadd.f32 %v1203_v39, %v990_v42  ;;  %v1006_v51 = vadd.f32 %v1203_v39, %v991_v43 }
 0x395   : > { %v1007_v52 = vadd.f32 %v1203_v39, %v992_v44  ;;  %v1008_v53 = vadd.f32 %v1203_v39, %v993_v45  ;;  %v1957_v54 = vadd.f32 %v1203_v39, %v994_v46  ;;  %v1010_v33 = vadd.f32 %v1203_v39, %v995_v47 }
 0x396   : > { %v1204_v55 = vmul.f32 -1.442695, %v1003_v48  ;;  %v1205_v32 = vmul.f32 -1.442695, %v1004_v49  ;;  %v1206_v56 = vmul.f32 -1.442695, %v1005_v50 }
 0x397   : > { %v1207_v57 = vmul.f32 -1.442695, %v1006_v51  ;;  %v1208_v58 = vmul.f32 -1.442695, %v1007_v52  ;;  %v1209_v30 = vmul.f32 -1.442695, %v1008_v53 }
 0x398   : > { %1574 = vpow2.f32 %v1204_v55  ;;  %v1210_v59 = vmul.f32 -1.442695, %v1957_v54  ;;  %v1211_v60 = vmul.f32 -1.442695, %v1010_v33 }
 0x399   : > { %1576 = vpow2.f32 %v1205_v32 }
 0x39a   : > { %1578 = vpow2.f32 %v1206_v56 }
 0x39b   : > { %1580 = vpow2.f32 %v1207_v57 }
 0x39c   : > { %1582 = vpow2.f32 %v1208_v58 }
 0x39d   : > { %1584 = vpow2.f32 %v1209_v30 }
 0x39e   : > { %1586 = vpow2.f32 %v1210_v59 }
 0x39f   : > { %1588 = vpow2.f32 %v1211_v60 }
 0x3a2   : > { %v1575_v61 = vpop.eup %1574 }
 0x3a3   : > { %v1577_v62 = vpop.eup %1576  ;;  %v1035_v63 = vadd.f32 1.0, %v1575_v61 }
 0x3a4   : > { %v1579_v0 = vpop.eup %1578  ;;  %v1036_v1 = vadd.f32 1.0, %v1577_v62 }
 0x3a5   : > { %v1581_v2 = vpop.eup %1580  ;;  %v1037_v3 = vadd.f32 1.0, %v1579_v0  ;;  %1590 = vrcp.f32 %v1035_v63 }
 0x3a6   : > { %v1583_v4 = vpop.eup %1582  ;;  %v1038_v5 = vadd.f32 1.0, %v1581_v2  ;;  %1592 = vrcp.f32 %v1036_v1 }
 0x3a7   : > { %v1585_v6 = vpop.eup %1584  ;;  %v1039_v7 = vadd.f32 1.0, %v1583_v4  ;;  %1594 = vrcp.f32 %v1037_v3 }
 0x3a8   : > { %v1587_v8 = vpop.eup %1586  ;;  %v1040_v9 = vadd.f32 1.0, %v1585_v6  ;;  %1596 = vrcp.f32 %v1038_v5 }
 0x3a9   : > { %v1589_v11 = vpop.eup %1588  ;;  %v1041_v14 = vadd.f32 1.0, %v1587_v8  ;;  %1598 = vrcp.f32 %v1039_v7 }
 0x3aa   : > { %v1042_v13 = vadd.f32 1.0, %v1589_v11  ;;  %1600 = vrcp.f32 %v1040_v9 }
 0x3ab   : > { %1602 = vrcp.f32 %v1041_v14 }
 0x3ac   : > { %1604 = vrcp.f32 %v1042_v13 }
 0x3af   : > { %v1591_v15 = vpop.eup %1590 }
 0x3b0   : > { %v1593_v16 = vpop.eup %1592  ;;  %v1059_v10 = vmul.f32 %v1591_v15, %v1003_v48 }
 0x3b1   : > { %v1595_v17 = vpop.eup %1594  ;;  %v1060_v18 = vmul.f32 %v1593_v16, %v1004_v49 }
 0x3b2   : > { %v1597_v31 = vpop.eup %1596  ;;  %v1061_v19 = vmul.f32 %v1595_v17, %v1005_v50  ;;  %1067 = vst [vmem:[%s256_s15] sm:$0xff] %v1059_v10 }
 0x3b3   : > { %v1599_v12 = vpop.eup %1598  ;;  %v1062_v20 = vmul.f32 %v1597_v31, %v1006_v51  ;;  %1068 = vst [vmem:[%s256_s15 + $0x8] sm:$0xff] %v1060_v18 }
 0x3b4   : > { %v1601_v21 = vpop.eup %1600  ;;  %v1063_v22 = vmul.f32 %v1599_v12, %v1007_v52  ;;  %1069 = vst [vmem:[%s256_s15 + $0x10] sm:$0xff] %v1061_v19 }
 0x3b5   : > { %v1603_v23 = vpop.eup %1602  ;;  %v1064_v24 = vmul.f32 %v1601_v21, %v1008_v53  ;;  %1070 = vst [vmem:[%s256_s15 + $0x18] sm:$0xff] %v1062_v20 }
 0x3b6   : > { %v1605_v25 = vpop.eup %1604  ;;  %v1065_v26 = vmul.f32 %v1603_v23, %v1957_v54  ;;  %1071 = vst [vmem:[%s256_s15 + $0x20] sm:$0xff] %v1063_v22 }
 0x3b7   : > { %v1066_v27 = vmul.f32 %v1605_v25, %v1010_v33  ;;  %1072 = vst [vmem:[%s256_s15 + $0x28] sm:$0xff] %v1064_v24 }
 0x3b8   : > { %1073 = vst [vmem:[%s256_s15 + $0x30] sm:$0xff] %v1065_v26 }
 0x3b9   : > { %1074 = vst [vmem:[%s256_s15 + $0x38] sm:$0xff] %v1066_v27 }
 0x3ba PF: > { %s16_s21 = sadd.s32 1, %s1612_s21  }
 0x3bb   : > { %p13_p5 = scmp.ge.s32.totalorder %s16_s21, 4  }
 0x3bd   :  { %15 = sbr.rel (!%p13_p5) target bundleno = 1 (0x1), region = 79 }

// kernel: encoder_block_forward.4
= control target key start
LH: loop header
LB: loop body
LE: loop exit
PB: predicated region body
PF: predicated region fallthrough
CT: control target
= control target key end

     0   :  { %s2278_s21 = smov 0   ;;  %s2688_s0 = inlined_call_operand.vmem [shape: f32[2,10,10,128], index: 0, kind: input, shape index: {}]   ;;  %s2689_s1 = inlined_call_operand.vmem [shape: bf16[1152,128], index: 1, kind: input, shape index: {}]   ;;  %s2690_s2 = inlined_call_operand.vmem [shape: f32[1,128], index: 2, kind: input, shape index: {}]   ;;  %s2691_s3 = inlined_call_operand.vmem [shape: f32[1,128], index: 3, kind: input, shape index: {}]   ;;  %s2692_s4 = inlined_call_operand.vmem [shape: f32[1,128], index: 4, kind: input, shape index: {}]   ;;  %s2693_s5 = inlined_call_operand.vmem [shape: f32[128,128], index: 5, kind: input, shape index: {}]   ;;  %s2694_s6 = inlined_call_operand.vmem [shape: f32[2,64,128], index: 6, kind: output, shape index: {}]  }
   0x1 LB: > { %s1625_s22 = sadd.s32 4294967295, %s2238_s21   ;;  %p1629_p0 = scmp.ge.s32.totalorder %s2238_s21, 1  ;;  %s2238_s21 = sphi %s2278_s21, %s16_s21  }
   0x2   : > { %p212_p1 = scmp.lt.s32.totalorder %s2238_s21, 3 }
   0x4   : > { %p213_p2 = pnand %p1629_p0, %p212_p1 }
   0x5   : > { %v2126_v0 = vld [vmem:[%s2689_s1 + $0x40] sm:$0xff] (!%p213_p2)   ;;  %v2130_v4 = vld [vmem:[%s2689_s1 + $0x48] sm:$0xff] (!%p213_p2)   ;;  %v2134_v8 = vld [vmem:[%s2689_s1 + $0x50] sm:$0xff] (!%p213_p2)   ;;  %p242_p3 = scmp.lt.s32.totalorder (!%p213_p2), %s1625_s22, 1  ;;  %vm2241_vm0 = vmmov (!%p213_p2), 0  }
   0x6   : > { %216 = sbr.rel (%p213_p2) target bundleno = 862 (0x35e), region = 44  ;;  %v2127_v1 = vld [vmem:[%s2689_s1] sm:$0xff] (!%p213_p2)   ;;  %1766 = vmatprep.subr.bf16.mxu0 (!%p213_p2), %v2126_v0  ;;  %v2131_v5 = vld [vmem:[%s2689_s1 + $0x8] sm:$0xff] (!%p213_p2)   ;;  %v2135_v9 = vld [vmem:[%s2689_s1 + $0x10] sm:$0xff] (!%p213_p2)  }
   0x7   : > { %v2128_v2 = vld [vmem:[%s2689_s1 + $0xc0] sm:$0xff] (!%p213_p2)   ;;  %1767 = vmatpush3.bf16.msra.mxu0 (!%p213_p2), %v2127_v1  ;;  %v2132_v6 = vld [vmem:[%s2689_s1 + $0xc8] sm:$0xff] (!%p213_p2)   ;;  %v2136_v10 = vld [vmem:[%s2689_s1 + $0xd0] sm:$0xff] (!%p213_p2)  }
   0x8   : > { %v2129_v3 = vld [vmem:[%s2689_s1 + $0x80] sm:$0xff] (!%p213_p2)   ;;  %1806 = vmatprep.subr.bf16.mxu1 (!%p213_p2), %v2128_v2  ;;  %1768 = vmatprep.subr.bf16.mxu0 (!%p213_p2), %v2130_v4  ;;  %v2133_v7 = vld [vmem:[%s2689_s1 + $0x88] sm:$0xff] (!%p213_p2)   ;;  %v2137_v11 = vld [vmem:[%s2689_s1 + $0x90] sm:$0xff] (!%p213_p2)  }
   0x9   : > { %1807 = vmatpush3.bf16.msra.mxu1 (!%p213_p2), %v2129_v3  ;;  %v2138_v12 = vld [vmem:[%s2689_s1 + $0x58] sm:$0xff] (!%p213_p2)   ;;  %v2142_v16 = vld [vmem:[%s2689_s1 + $0x60] sm:$0xff] (!%p213_p2)   ;;  %v2146_v20 = vld [vmem:[%s2689_s1 + $0x68] sm:$0xff] (!%p213_p2)  }
   0xa   : > { %1808 = vmatprep.subr.bf16.mxu1 (!%p213_p2), %v2132_v6  ;;  %v2139_v13 = vld [vmem:[%s2689_s1 + $0x18] sm:$0xff] (!%p213_p2)   ;;  %v2143_v17 = vld [vmem:[%s2689_s1 + $0x20] sm:$0xff] (!%p213_p2)   ;;  %v2147_v21 = vld [vmem:[%s2689_s1 + $0x28] sm:$0xff] (!%p213_p2)  }
   0xb   : > { %1769 = vmatpush3.bf16.msra.mxu0 (!%p213_p2), %v2131_v5  ;;  %v2140_v14 = vld [vmem:[%s2689_s1 + $0xd8] sm:$0xff] (!%p213_p2)   ;;  %v2144_v18 = vld [vmem:[%s2689_s1 + $0xe0] sm:$0xff] (!%p213_p2)   ;;  %v2148_v22 = vld [vmem:[%s2689_s1 + $0xe8] sm:$0xff] (!%p213_p2)  }
   0xc   : > { %1770 = vmatprep.subr.bf16.mxu0 (!%p213_p2), %v2134_v8  ;;  %v2141_v15 = vld [vmem:[%s2689_s1 + $0x98] sm:$0xff] (!%p213_p2)   ;;  %v2145_v19 = vld [vmem:[%s2689_s1 + $0xa0] sm:$0xff] (!%p213_p2)   ;;  %v2149_v23 = vld [vmem:[%s2689_s1 + $0xa8] sm:$0xff] (!%p213_p2)  }
   0xd   : > { %1809 = vmatpush3.bf16.msra.mxu1 %v2133_v7  ;;  %s2696_s22 = smov (!%p242_p3, %s1625_s22), 1  ;;  %v2150_v24 = vld [vmem:[%s2689_s1 + $0x70] sm:$0xff]   ;;  %v2154_v28 = vld [vmem:[%s2689_s1 + $0x78] sm:$0xff]   ;;  %v2158_v38 = vld [vmem:[%s2689_s1 + $0x140] sm:$0xff]  }
   0xe   : > { %1810 = vmatprep.subr.bf16.mxu1 %v2136_v10  ;;  %s2114_s29 = smul.u32 160, %s2696_s22  ;;  %v2151_v25 = vld [vmem:[%s2689_s1 + $0x30] sm:$0xff]   ;;  %v2155_v29 = vld [vmem:[%s2689_s1 + $0x38] sm:$0xff]   ;;  %v2159_v41 = vld [vmem:[%s2689_s1 + $0x100] sm:$0xff]   ;;  %s1765_s12 = sshll.u32 %s2696_s22, 6 }
   0xf   : > { %1771 = vmatpush3.bf16.msra.mxu0 %v2135_v9  ;;  %v2152_v26 = vld [vmem:[%s2689_s1 + $0xf0] sm:$0xff]   ;;  %v2156_v30 = vld [vmem:[%s2689_s1 + $0xf8] sm:$0xff]   ;;  %v2160_v45 = vld [vmem:[%s2689_s1 + $0x1c0] sm:$0xff]   ;;  %s251_s15 = scalar_lea.vmem %s2694_s6, %s1765_s12 }
  0x10   : > { %1772 = vmatprep.subr.bf16.mxu0 %v2138_v12  ;;  %v2153_v27 = vld [vmem:[%s2689_s1 + $0xb0] sm:$0xff]   ;;  %s2383_s16 = scalar_lea.vmem %s2688_s0, %s2114_s29  ;;  %v2157_v34 = vld [vmem:[%s2689_s1 + $0xb8] sm:$0xff]   ;;  %v2161_v46 = vld [vmem:[%s2689_s1 + $0x180] sm:$0xff]  }
  0x11   : > { %1811 = vmatpush3.bf16.msra.mxu1 %v2137_v11  ;;  %v261_v31 = vld [vmem:[%s2383_s16 + $0x1] sm:$0xff]  ;;  %v2393_v32 = vld [vmem:[%s2383_s16 + $0x11] sm:$0xff] }
  0x12   : > { %1812 = vmatprep.subr.bf16.mxu1 %v2140_v14  ;;  %v328_v33 = vpack.c.bf16 %v2393_v32, %v261_v31  ;;  %v253_v35 = vld [vmem:[%s2383_s16] sm:$0xff]  ;;  %v254_v36 = vld [vmem:[%s2383_s16 + $0x10] sm:$0xff]  ;;  %v2162_v47 = vld [vmem:[%s2689_s1 + $0x148] sm:$0xff]  }
  0x13   : > { %1773 = vmatpush3.bf16.msra.mxu0 %v2139_v13  ;;  %v327_v37 = vpack.c.bf16 %v254_v36, %v253_v35  ;;  %v1634_v39 = vld [vmem:[%s2383_s16 + $0x20] sm:$0xff]  ;;  %v2410_v43 = vld [vmem:[%s2383_s16 + $0x12] sm:$0xff]  ;;  %v2163_v48 = vld [vmem:[%s2689_s1 + $0x108] sm:$0xff]  }
  0x14   : > { %1774 = vmatprep.subr.bf16.mxu0 %v2142_v16  ;;  %978 = vmatprep.mubr.bf16.mxu0 %v328_v33  ;;  %v330_v40 = vpack.c.bf16 %v1634_v39, %v254_v36  ;;  %v269_v42 = vld [vmem:[%s2383_s16 + $0x2] sm:$0xff]  ;;  %v2432_v51 = vld [vmem:[%s2383_s16 + $0x31] sm:$0xff] }
  0x15   : > { %1813 = vmatpush3.bf16.msra.mxu1 %v2141_v15  ;;  %v329_v44 = vpack.c.bf16 %v2410_v43, %v269_v42  ;;  %v2164_v49 = vld [vmem:[%s2689_s1 + $0x1c8] sm:$0xff]   ;;  %v256_v54 = vld [vmem:[%s2383_s16 + $0x30] sm:$0xff]  ;;  %v1636_v57 = vld [vmem:[%s2383_s16 + $0x40] sm:$0xff] }
  0x16   : > { %1814 = vmatprep.subr.bf16.mxu1 %v2144_v18  ;;  %1043 = vmatprep.mubr.bf16.mxu1 %v330_v40  ;;  %v2429_v50 = vld [vmem:[%s2383_s16 + $0x21] sm:$0xff]  ;;  %v2443_v55 = vpack.c.bf16 %v256_v54, %v1634_v39  ;;  %v2166_v56 = vld [vmem:[%s2689_s1 + $0x150] sm:$0xff]   ;;  %v339_v58 = vpack.c.bf16 %v1636_v57, %v256_v54  ;;  %v2170_v1 = vld [vmem:[%s2689_s1 + $0x158] sm:$0xff]  }
  0x17   : > { %1775 = vmatpush3.bf16.msra.mxu0 %v2143_v17  ;;  %v2436_v52 = vpack.c.bf16 %v2432_v51, %v2429_v50  ;;  %v2165_v53 = vld [vmem:[%s2689_s1 + $0x188] sm:$0xff]   ;;  %v2167_v59 = vld [vmem:[%s2689_s1 + $0x110] sm:$0xff]   ;;  %v2171_v2 = vld [vmem:[%s2689_s1 + $0x118] sm:$0xff]   ;;  %v331_v42 = vpack.c.bf16 %v2429_v50, %v2393_v32 }
  0x18   : > { %1776 = vmatprep.subr.bf16.mxu0 %v2146_v20  ;;  %v2453_v60 = vld [vmem:[%s2383_s16 + $0x22] sm:$0xff]  ;;  %v2457_v61 = vld [vmem:[%s2383_s16 + $0x32] sm:$0xff] }
  0x19   : > { %1815 = vmatpush3.bf16.msra.mxu1 %v2145_v19  ;;  %v2461_v62 = vpack.c.bf16 %v2457_v61, %v2453_v60  ;;  %v2168_v63 = vld [vmem:[%s2689_s1 + $0x1d0] sm:$0xff]   ;;  %v2172_v3 = vld [vmem:[%s2689_s1 + $0x1d8] sm:$0xff]   ;;  %v2480_v4 = vld [vmem:[%s2383_s16 + $0x41] sm:$0xff] }
  0x1a   : > { %1816 = vmatprep.subr.bf16.mxu1 %v2148_v22  ;;  %v2169_v0 = vld [vmem:[%s2689_s1 + $0x190] sm:$0xff]   ;;  %v2173_v7 = vld [vmem:[%s2689_s1 + $0x198] sm:$0xff]   ;;  %v2174_v10 = vld [vmem:[%s2689_s1 + $0x160] sm:$0xff]  }
  0x1b   : > { %1777 = vmatpush3.bf16.msra.mxu0 %v2147_v21  ;;  %v2483_v5 = vld [vmem:[%s2383_s16 + $0x51] sm:$0xff]  ;;  %v1638_v11 = vld [vmem:[%s2383_s16 + $0x60] sm:$0xff]  ;;  %v2178_v19 = vld [vmem:[%s2689_s1 + $0x168] sm:$0xff]  }
  0x1c   : > { %1778 = vmatprep.subr.bf16.mxu0 %v2150_v24  ;;  %v2487_v6 = vpack.c.bf16 %v2483_v5, %v2480_v4  ;;  %v258_v8 = vld [vmem:[%s2383_s16 + $0x50] sm:$0xff]  ;;  %v2175_v13 = vld [vmem:[%s2689_s1 + $0x120] sm:$0xff]   ;;  %v2179_v20 = vld [vmem:[%s2689_s1 + $0x128] sm:$0xff]  }
  0x1d   : > { %1817 = vmatpush3.bf16.msra.mxu1 %v2149_v23  ;;  %v2494_v9 = vpack.c.bf16 %v258_v8, %v1636_v57  ;;  %v348_v12 = vpack.c.bf16 %v1638_v11, %v258_v8  ;;  %v273_v14 = vld [vmem:[%s2383_s16 + $0x42] sm:$0xff]  ;;  %v2506_v15 = vld [vmem:[%s2383_s16 + $0x52] sm:$0xff] }
  0x1e   : > { %1818 = vmatprep.subr.bf16.mxu1 %v2152_v26  ;;  %v2509_v16 = vpack.c.bf16 %v2506_v15, %v273_v14  ;;  %v2176_v17 = vld [vmem:[%s2689_s1 + $0x1e0] sm:$0xff]   ;;  %v2180_v21 = vld [vmem:[%s2689_s1 + $0x1e8] sm:$0xff]   ;;  %v2531_v23 = vld [vmem:[%s2383_s16 + $0x71] sm:$0xff] }
  0x1f   : > { %1779 = vmatpush3.bf16.msra.mxu0 %v2151_v25  ;;  %v2177_v18 = vld [vmem:[%s2689_s1 + $0x1a0] sm:$0xff]   ;;  %v2181_v25 = vld [vmem:[%s2689_s1 + $0x1a8] sm:$0xff]   ;;  %v260_v26 = vld [vmem:[%s2383_s16 + $0x70] sm:$0xff] }
  0x20   : > { %1780 = vmatprep.subr.bf16.mxu0 %v2154_v28  ;;  %v2528_v22 = vld [vmem:[%s2383_s16 + $0x61] sm:$0xff]  ;;  %v2182_v28 = vld [vmem:[%s2689_s1 + $0x170] sm:$0xff]   ;;  %v2186_v39 = vld [vmem:[%s2689_s1 + $0x178] sm:$0xff]  }
  0x21   : > { %1819 = vmatpush3.bf16.msra.mxu1 %v2153_v27  ;;  %v355_v24 = vpack.c.bf16 %v2531_v23, %v2528_v22  ;;  %v2539_v27 = vpack.c.bf16 %v260_v26, %v1638_v11  ;;  %v2183_v33 = vld [vmem:[%s2689_s1 + $0x130] sm:$0xff]   ;;  %v2187_v40 = vld [vmem:[%s2689_s1 + $0x138] sm:$0xff]   ;;  %v2194_v50 = vld [vmem:[%s2689_s1 + $0x220] sm:$0xff]  }
  0x22   : > { %1820 = vmatprep.subr.bf16.mxu1 %v2156_v30  ;;  %v332_v30 = vpack.c.bf16 %v2453_v60, %v2410_v43  ;;  %v276_v35 = vld [vmem:[%s2383_s16 + $0x72] sm:$0xff]  ;;  %v1288_v8 = vld [vmem:[%s2693_s5 + $0x20] sm:$0xff] }
  0x23   : > { %1781 = vmatpush3.bf16.msra.mxu0 %v2155_v29  ;;  %v2545_v29 = vld [vmem:[%s2383_s16 + $0x80] sm:$0xff]  ;;  %v2189_v43 = vld [vmem:[%s2689_s1 + $0x1b8] sm:$0xff]   ;;  %v2192_v32 = vld [vmem:[%s2689_s1 + $0x210] sm:$0xff]  }
  0x24   : > { %1846 = vmatprep.subr.bf16.mxu0 %v2158_v38  ;;  %v357_v31 = vpack.c.bf16 %v2545_v29, %v260_v26  ;;  %v2185_v38 = vld [vmem:[%s2689_s1 + $0x1b0] sm:$0xff]   ;;  %v2242_v26 = vmov 0.0  }
  0x25   : > { %1821 = vmatpush3.bf16.msra.mxu1 %v2157_v34  ;;  %v275_v34 = vld [vmem:[%s2383_s16 + $0x62] sm:$0xff]  ;;  %v1672_v54 = vld [vmem:[%s2383_s16 + $0x91] sm:$0xff] }
  0x26   : > { %979 = vmatmul.mubr.bf16.vlgmr.msra.gmra.mrb[0].mxu0 %v327_v37  ;;  %1886 = vmatprep.subr.bf16.mxu1 %v2160_v45  ;;  %v2556_v36 = vpack.c.bf16 %v276_v35, %v275_v34  ;;  %v2184_v37 = vld [vmem:[%s2689_s1 + $0x1f0] sm:$0xff]   ;;  %v2190_v45 = vld [vmem:[%s2689_s1 + $0x200] sm:$0xff]  }
  0x27   : > { %1847 = vmatpush3.bf16.msra.mxu0 %v2159_v41  ;;  %986 = vmatprep.mubr.bf16.mxu0 %v2436_v52  ;;  %v2188_v41 = vld [vmem:[%s2689_s1 + $0x1f8] sm:$0xff]   ;;  %v1290_v11 = vld [vmem:[%s2693_s5 + $0x30] sm:$0xff] }
  0x28   : > { %1044 = vmatmul.mubr.bf16.vlgmr.msra.gmra.mrb[0].mxu1 %v329_v44  ;;  %1848 = vmatprep.subr.bf16.mxu0 %v2162_v47  ;;  %v341_v44 = vpack.c.bf16 %v273_v14, %v2457_v61  ;;  %v340_v47 = vpack.c.bf16 %v2480_v4, %v2432_v51  ;;  %v349_v51 = vpack.c.bf16 %v2528_v22, %v2483_v5  ;;  %v1286_v5 = vld [vmem:[%s2693_s5 + $0x10] sm:$0xff]  ;;  %v1292_v14 = vld [vmem:[%s2693_s5 + $0x40] sm:$0xff] }
  0x29   : > { %1887 = vmatpush3.bf16.msra.mxu1 %v2161_v46  ;;  %1051 = vmatprep.mubr.bf16.mxu1 %v339_v58  ;;  %v2191_v46 = vld [vmem:[%s2689_s1 + $0x208] sm:$0xff]   ;;  %v2196_v58 = vld [vmem:[%s2689_s1 + $0x230] sm:$0xff]  }
  0x2a   : > { %1888 = vmatprep.subr.bf16.mxu1 %v2164_v49  ;;  %v2193_v49 = vld [vmem:[%s2689_s1 + $0x218] sm:$0xff]  }
  0x2b   : > { %1849 = vmatpush3.bf16.msra.mxu0 %v2163_v48  ;;  %v350_v48 = vpack.c.bf16 %v275_v34, %v2506_v15  ;;  %v1293_v15 = vld [vmem:[%s2693_s5 + $0x48] sm:$0xff] }
  0x2c   : > { %1850 = vmatprep.subr.bf16.mxu0 %v2166_v56  ;;  %v2195_v56 = vld [vmem:[%s2689_s1 + $0x228] sm:$0xff]  }
  0x2d   : > { %1889 = vmatpush3.bf16.msra.mxu1 %v2165_v53  ;;  %v1648_v53 = vld [vmem:[%s2383_s16 + $0x81] sm:$0xff] }
  0x2e   : > { %987 = vmatmul.mubr.bf16.gmra.mrb[4].mxu0 %v2443_v55  ;;  %1890 = vmatprep.subr.bf16.mxu1 %v2168_v63  ;;  %v361_v57 = vpack.c.bf16 %v1672_v54, %v1648_v53  ;;  %v358_v60 = vpack.c.bf16 %v1648_v53, %v2531_v23  ;;  %v2197_v63 = vld [vmem:[%s2689_s1 + $0x238] sm:$0xff]   ;;  %v1298_v23 = vld [vmem:[%s2693_s5 + $0x70] sm:$0xff] }
  0x2f   : > { %1851 = vmatpush3.bf16.msra.mxu0 %v2167_v59  ;;  %994 = vmatprep.mubr.bf16.mxu0 %v2487_v6  ;;  %v1664_v59 = vld [vmem:[%s2383_s16 + $0x90] sm:$0xff] }
  0x30   : > { %1052 = vmatmul.mubr.bf16.gmra.mrb[4].mxu1 %v2461_v62  ;;  %1852 = vmatprep.subr.bf16.mxu0 %v2170_v1  ;;  %v360_v61 = vpack.c.bf16 %v1664_v59, %v2545_v29 }
  0x31   : > { %1891 = vmatpush3.bf16.msra.mxu1 %v2169_v0  ;;  %1059 = vmatprep.mubr.bf16.mxu1 %v348_v12  ;;  %v1680_v0 = vld [vmem:[%s2383_s16 + $0x92] sm:$0xff] }
  0x32   : > { %1892 = vmatprep.subr.bf16.mxu1 %v2172_v3  ;;  %v1285_v3 = vld [vmem:[%s2693_s5 + $0x8] sm:$0xff]  ;;  %v1291_v12 = vld [vmem:[%s2693_s5 + $0x38] sm:$0xff] }
  0x33   : > { %1853 = vmatpush3.bf16.msra.mxu0 %v2171_v2  ;;  %v1284_v2 = vld [vmem:[%s2693_s5] sm:$0xff] }
  0x34   : > { %1854 = vmatprep.subr.bf16.mxu0 %v2174_v10  ;;  %v2067_v4 = vpack.c.bf16 %v1285_v3, %v1284_v2 }
  0x35   : > { %1893 = vmatpush3.bf16.msra.mxu1 %v2173_v7 }
  0x36   : > { %995 = vmatmul.mubr.bf16.gmra.mrb[8].mxu0 %v2494_v9  ;;  %1894 = vmatprep.subr.bf16.mxu1 %v2176_v17  ;;  %v1294_v17 = vld [vmem:[%s2693_s5 + $0x50] sm:$0xff] }
  0x37   : > { %1855 = vmatpush3.bf16.msra.mxu0 %v2175_v13  ;;  %1002 = vmatprep.mubr.bf16.mxu0 %v355_v24  ;;  %v2076_v13 = vpack.c.bf16 %v1291_v12, %v1290_v11 }
  0x38   : > { %1060 = vmatmul.mubr.bf16.gmra.mrb[8].mxu1 %v2509_v16  ;;  %1856 = vmatprep.subr.bf16.mxu0 %v2178_v19 }
  0x39   : > { %1895 = vmatpush3.bf16.msra.mxu1 %v2177_v18  ;;  %1067 = vmatprep.mubr.bf16.mxu1 %v357_v31  ;;  %v1295_v18 = vld [vmem:[%s2693_s5 + $0x58] sm:$0xff] }
  0x3a   : > { %1896 = vmatprep.subr.bf16.mxu1 %v2180_v21  ;;  %v2082_v19 = vpack.c.bf16 %v1295_v18, %v1294_v17  ;;  %v1297_v21 = vld [vmem:[%s2693_s5 + $0x68] sm:$0xff] }
  0x3b   : > { %1857 = vmatpush3.bf16.msra.mxu0 %v2179_v20  ;;  %v1296_v20 = vld [vmem:[%s2693_s5 + $0x60] sm:$0xff] }
  0x3c   : > { %1858 = vmatprep.subr.bf16.mxu0 %v2182_v28  ;;  %v2085_v22 = vpack.c.bf16 %v1297_v21, %v1296_v20  ;;  %v1681_v28 = vld [vmem:[%s2690_s2] ss:$0 sm:$0xff] }
  0x3d   : > { %1897 = vmatpush3.bf16.msra.mxu1 %v2181_v25 }
  0x3e   : > { %1003 = vmatmul.mubr.bf16.gmra.mrb[12].mxu0 %v2539_v27  ;;  %1898 = vmatprep.subr.bf16.mxu1 %v2184_v37 }
  0x3f   : > { %1859 = vmatpush3.bf16.msra.mxu0 %v2183_v33  ;;  %1108 = vmatprep.mubr.bf16.mxu0 %v332_v30 }
  0x40   : > { %1068 = vmatmul.mubr.bf16.gmra.mrb[12].mxu1 %v2556_v36  ;;  %1860 = vmatprep.subr.bf16.mxu0 %v2186_v39 }
  0x41   : > { %1899 = vmatpush3.bf16.msra.mxu1 %v2185_v38  ;;  %1173 = vmatprep.mubr.bf16.mxu1 %v2436_v52  ;;  %v1656_v52 = vld [vmem:[%s2383_s16 + $0x82] sm:$0xff] }
  0x42   : > { %1900 = vmatprep.subr.bf16.mxu1 %v2188_v41  ;;  %v362_v1 = vpack.c.bf16 %v1680_v0, %v1656_v52 }
  0x43   : > { %1861 = vmatpush3.bf16.msra.mxu0 %v2187_v40 }
  0x44   : > { %1972 = vmatprep.subr.bf16.mxu0 %v2190_v45 }
  0x45   : > { %1901 = vmatpush3.bf16.msra.mxu1 %v2189_v43 }
  0x46   : > { %1109 = vmatmul.mubr.bf16.vlgmr.msra.gmra.mrb[16].mxu0 %v331_v42 }
  0x47   : > { %1973 = vmatpush3.bf16.msra.mxu0 %v2190_v45  ;;  %1116 = vmatprep.mubr.bf16.mxu0 %v341_v44 }
  0x48   : > { %1174 = vmatmul.mubr.bf16.vlgmr.msra.gmra.mrb[16].mxu1 %v2443_v55  ;;  %1974 = vmatprep.subr.bf16.mxu0 %v2191_v46  ;;  %v359_v55 = vpack.c.bf16 %v1656_v52, %v276_v35 }
  0x49   : > { %1181 = vmatprep.mubr.bf16.mxu1 %v2487_v6  ;;  %v1287_v6 = vld [vmem:[%s2693_s5 + $0x18] sm:$0xff] }
  0x4a   : > { %v2070_v7 = vpack.c.bf16 %v1287_v6, %v1286_v5 }
  0x4b   : > { %1975 = vmatpush3.bf16.msra.mxu0 %v2191_v46 }
  0x4c   : > { %1976 = vmatprep.subr.bf16.mxu0 %v2192_v32 }
  0x4e   : > { %1117 = vmatmul.mubr.bf16.gmra.mrb[20].mxu0 %v340_v47 }
  0x4f   : > { %1977 = vmatpush3.bf16.msra.mxu0 %v2192_v32  ;;  %1124 = vmatprep.mubr.bf16.mxu0 %v350_v48 }
  0x50   : > { %1182 = vmatmul.mubr.bf16.gmra.mrb[20].mxu1 %v2494_v9  ;;  %1978 = vmatprep.subr.bf16.mxu0 %v2193_v49  ;;  %v1289_v9 = vld [vmem:[%s2693_s5 + $0x28] sm:$0xff] }
  0x51   : > { %1189 = vmatprep.mubr.bf16.mxu1 %v355_v24  ;;  %v2073_v10 = vpack.c.bf16 %v1289_v9, %v1288_v8  ;;  %v1299_v24 = vld [vmem:[%s2693_s5 + $0x78] sm:$0xff] }
  0x52   : > { %v2088_v25 = vpack.c.bf16 %v1299_v24, %v1298_v23 }
  0x53   : > { %1979 = vmatpush3.bf16.msra.mxu0 %v2193_v49 }
  0x54   : > { %1980 = vmatprep.subr.bf16.mxu0 %v2194_v50 }
  0x56   : > { %1125 = vmatmul.mubr.bf16.gmra.mrb[24].mxu0 %v349_v51 }
  0x57   : > { %1981 = vmatpush3.bf16.msra.mxu0 %v2194_v50  ;;  %1132 = vmatprep.mubr.bf16.mxu0 %v359_v55 }
  0x58   : > { %1190 = vmatmul.mubr.bf16.gmra.mrb[24].mxu1 %v2539_v27  ;;  %1982 = vmatprep.subr.bf16.mxu0 %v2195_v56 }
  0x59   : > { %1197 = vmatprep.mubr.bf16.mxu1 %v361_v57 }
  0x5b   : > { %1983 = vmatpush3.bf16.msra.mxu0 %v2195_v56 }
  0x5c   : > { %1984 = vmatprep.subr.bf16.mxu0 %v2196_v58 }
  0x5e   : > { %1133 = vmatmul.mubr.bf16.gmra.mrb[28].mxu0 %v358_v60 }
  0x5f   : > { %1985 = vmatpush3.bf16.msra.mxu0 %v2196_v58  ;;  %1988 = vmatprep.mubr.bf16.mxu0 %v2461_v62  ;;  %v2240_v62 = vmov 0.0|0.0  }
  0x60   : > { %1198 = vmatmul.mubr.bf16.gmra.mrb[28].mxu1 %v360_v61  ;;  %1986 = vmatprep.subr.bf16.mxu0 %v2197_v63 }
  0x61   : > { %2066 = vmatprep.subr.bf16.mxu1 %v2240_v62  ;;  %2028 = vmatprep.mubr.msk.f32.mxu1 %vm2241_vm0, %v2242_v26 }
  0x62   : > { %2068 = vmatpush3.bf16.msra.mxu1 %v2067_v4 }
  0x63   : > { %1987 = vmatpush3.bf16.msra.mxu0 %v2197_v63  ;;  %2069 = vmatprep.subr.bf16.mxu1 %v2240_v62 }
  0x64   : > { %2090 = vmatprep.subr.bf16.mxu0 %v2240_v62 }
  0x66   : > { %1989 = vmatmul.mubr.bf16.vlgmr.msra.gmra.mrb[32].mxu0 %v2509_v16  ;;  %2071 = vmatpush3.bf16.msra.mxu1 %v2070_v7  ;;  %v2079_v16 = vpack.c.bf16 %v1293_v15, %v1292_v14 }
  0x67   : > { %1992 = vmatprep.mubr.bf16.mxu0 %v2556_v36  ;;  %2092 = vmatpush3.bf16.msra.mxu0 %v2067_v4 }
  0x68   : > { %2093 = vmatprep.subr.bf16.mxu0 %v2240_v62  ;;  %2072 = vmatprep.subr.bf16.mxu1 %v2240_v62 }
  0x6a   : > { %2074 = vmatpush3.bf16.msra.mxu1 %v2073_v10 }
  0x6b   : > { %2095 = vmatpush3.bf16.msra.mxu0 %v2070_v7  ;;  %2075 = vmatprep.subr.bf16.mxu1 %v2240_v62 }
  0x6c   : > { %2096 = vmatprep.subr.bf16.mxu0 %v2240_v62 }
  0x6e   : > { %1993 = vmatmul.mubr.bf16.gmra.mrb[36].mxu0 %v362_v1  ;;  %2077 = vmatpush3.bf16.msra.mxu1 %v2076_v13 }
  0x6f   : > { %2098 = vmatpush3.bf16.msra.mxu0 %v2073_v10  ;;  %2078 = vmatprep.subr.bf16.mxu1 %v2240_v62 }
  0x70   : > { %2099 = vmatprep.subr.bf16.mxu0 %v2240_v62  ;;  %2063 = vmatprep.mubr.msk.f32.mxu0 %vm2241_vm0, %v2242_v26 }
  0x72   : > { %2080 = vmatpush3.bf16.msra.mxu1 %v2079_v16 }
  0x73   : > { %2101 = vmatpush3.bf16.msra.mxu0 %v2076_v13  ;;  %2081 = vmatprep.subr.bf16.mxu1 %v2240_v62 }
  0x74   : > { %2102 = vmatprep.subr.bf16.mxu0 %v2240_v62 }
  0x76   : > { %2083 = vmatpush3.bf16.msra.mxu1 %v2082_v19 }
  0x77   : > { %2104 = vmatpush3.bf16.msra.mxu0 %v2079_v16  ;;  %2084 = vmatprep.subr.bf16.mxu1 %v2240_v62 }
  0x78   : > { %2105 = vmatprep.subr.bf16.mxu0 %v2240_v62 }
  0x7a   : > { %2086 = vmatpush3.bf16.msra.mxu1 %v2085_v22 }
  0x7b   : > { %2107 = vmatpush3.bf16.msra.mxu0 %v2082_v19  ;;  %2087 = vmatprep.subr.bf16.mxu1 %v2240_v62 }
  0x7c   : > { %2108 = vmatprep.subr.bf16.mxu0 %v2240_v62 }
  0x7e   : > { %2089 = vmatpush3.bf16.msra.mxu1 %v2088_v25 }
  0x7f   : > { %2110 = vmatpush3.bf16.msra.mxu0 %v2085_v22 }
  0x80   : > { %2111 = vmatprep.subr.bf16.mxu0 %v2240_v62 }
  0x83   : > { %2113 = vmatpush3.bf16.msra.mxu0 %v2088_v25 }
  0xf9   : > { %v1782_v27 = vpop.f32.mrb[0].mxu0 }
  0xfa   : > { %v1783_v29 = vpop.f32.mrb[1].mxu0 }
  0xfb   : > { %v1784_v30 = vadd.f32 %v1783_v29, %v1782_v27  ;;  %v1785_v31 = vpop.f32.mrb[2].mxu0  ;;  %v1822_v33 = vpop.f32.mrb[0].mxu1 }
  0xfc   : > { %v1786_v34 = vpop.f32.mrb[3].mxu0  ;;  %v1823_v37 = vpop.f32.mrb[1].mxu1 }
  0xfd   : > { %v981_v35 = vadd.f32 %v1784_v30, %v1681_v28  ;;  %v1787_v36 = vadd.f32 %v1786_v34, %v1785_v31  ;;  %v1824_v38 = vadd.f32 %v1823_v37, %v1822_v33  ;;  %v1825_v39 = vpop.f32.mrb[2].mxu1 }
  0xfe   : > { %v1826_v41 = vpop.f32.mrb[3].mxu1 }
  0xff   : > { %v984_v40 = vadd.f32 %v1787_v36, %v1681_v28  ;;  %v1046_v42 = vadd.f32 %v1824_v38, %v981_v35  ;;  %v1827_v43 = vadd.f32 %v1826_v41, %v1825_v39 }
 0x101   : > { %v1049_v44 = vadd.f32 %v1827_v43, %v984_v40  ;;  %v1788_v45 = vpop.f32.mrb[4].mxu0 }
 0x102   : > { %v1789_v46 = vpop.f32.mrb[5].mxu0 }
 0x103   : > { %v1790_v32 = vadd.f32 %v1789_v46, %v1788_v45  ;;  %v1791_v47 = vpop.f32.mrb[6].mxu0  ;;  %v1828_v48 = vpop.f32.mrb[4].mxu1 }
 0x104   : > { %v1792_v49 = vpop.f32.mrb[7].mxu0  ;;  %v1829_v51 = vpop.f32.mrb[5].mxu1 }
 0x105   : > { %v989_v50 = vadd.f32 %v1790_v32, %v1681_v28  ;;  %v1793_v52 = vadd.f32 %v1792_v49, %v1791_v47  ;;  %v1830_v53 = vadd.f32 %v1829_v51, %v1828_v48  ;;  %v1831_v54 = vpop.f32.mrb[6].mxu1 }
 0x106   : > { %v1832_v56 = vpop.f32.mrb[7].mxu1 }
 0x107   : > { %v992_v55 = vadd.f32 %v1793_v52, %v1681_v28  ;;  %v1054_v57 = vadd.f32 %v1830_v53, %v989_v50  ;;  %v1833_v58 = vadd.f32 %v1832_v56, %v1831_v54 }
 0x109   : > { %v1057_v59 = vadd.f32 %v1833_v58, %v992_v55  ;;  %v1794_v60 = vpop.f32.mrb[8].mxu0 }
 0x10a   : > { %v1795_v61 = vpop.f32.mrb[9].mxu0 }
 0x10b   : > { %v1796_v63 = vadd.f32 %v1795_v61, %v1794_v60  ;;  %v1797_v0 = vpop.f32.mrb[10].mxu0  ;;  %v1834_v1 = vpop.f32.mrb[8].mxu1 }
 0x10c   : > { %v1798_v2 = vpop.f32.mrb[11].mxu0  ;;  %v1835_v62 = vpop.f32.mrb[9].mxu1 }
 0x10d   : > { %v997_v3 = vadd.f32 %v1796_v63, %v1681_v28  ;;  %v1799_v4 = vadd.f32 %v1798_v2, %v1797_v0  ;;  %v1836_v5 = vadd.f32 %v1835_v62, %v1834_v1  ;;  %v1837_v6 = vpop.f32.mrb[10].mxu1 }
 0x10e   : > { %v1838_v8 = vpop.f32.mrb[11].mxu1 }
 0x10f   : > { %v1000_v7 = vadd.f32 %v1799_v4, %v1681_v28  ;;  %v1062_v9 = vadd.f32 %v1836_v5, %v997_v3  ;;  %v1839_v10 = vadd.f32 %v1838_v8, %v1837_v6 }
 0x111   : > { %v1065_v11 = vadd.f32 %v1839_v10, %v1000_v7  ;;  %v1800_v12 = vpop.f32.mrb[12].mxu0 }
 0x112   : > { %v1801_v13 = vpop.f32.mrb[13].mxu0 }
 0x113   : > { %v1802_v14 = vadd.f32 %v1801_v13, %v1800_v12  ;;  %v1803_v15 = vpop.f32.mrb[14].mxu0  ;;  %v1840_v16 = vpop.f32.mrb[12].mxu1 }
 0x114   : > { %v1804_v17 = vpop.f32.mrb[15].mxu0  ;;  %v1841_v20 = vpop.f32.mrb[13].mxu1 }
 0x115   : > { %v1005_v18 = vadd.f32 %v1802_v14, %v1681_v28  ;;  %v1805_v19 = vadd.f32 %v1804_v17, %v1803_v15  ;;  %v1842_v21 = vadd.f32 %v1841_v20, %v1840_v16  ;;  %v1843_v22 = vpop.f32.mrb[14].mxu1 }
 0x116   : > { %v1844_v24 = vpop.f32.mrb[15].mxu1 }
 0x117   : > { %v1008_v23 = vadd.f32 %v1805_v19, %v1681_v28  ;;  %v1070_v25 = vadd.f32 %v1842_v21, %v1005_v18  ;;  %v1845_v26 = vadd.f32 %v1844_v24, %v1843_v22 }
 0x119   : > { %v1073_v27 = vadd.f32 %v1845_v26, %v1008_v23  ;;  %v1862_v29 = vpop.f32.mrb[16].mxu0 }
 0x11a   : > { %v1863_v30 = vpop.f32.mrb[17].mxu0 }
 0x11b   : > { %v1864_v31 = vadd.f32 %v1863_v30, %v1862_v29  ;;  %v1865_v33 = vpop.f32.mrb[18].mxu0  ;;  %v1902_v34 = vpop.f32.mrb[16].mxu1 }
 0x11c   : > { %v1866_v35 = vpop.f32.mrb[19].mxu0  ;;  %v1903_v36 = vpop.f32.mrb[17].mxu1 }
 0x11d   : > { %v1111_v37 = vadd.f32 %v1864_v31, %v1046_v42  ;;  %v1867_v38 = vadd.f32 %v1866_v35, %v1865_v33  ;;  %v1904_v39 = vadd.f32 %v1903_v36, %v1902_v34  ;;  %v1905_v40 = vpop.f32.mrb[18].mxu1 }
 0x11e   : > { %v1906_v41 = vpop.f32.mrb[19].mxu1 }
 0x11f   : > { %v1114_v43 = vadd.f32 %v1867_v38, %v1049_v44  ;;  %v1907_v45 = vadd.f32 %v1906_v41, %v1905_v40  ;;  %v1176_v46 = vadd.f32 %v1904_v39, %v1111_v37 }
 0x121   : > { %v1868_v28 = vpop.f32.mrb[20].mxu0  ;;  %v1179_v32 = vadd.f32 %v1907_v45, %v1114_v43 }
 0x122   : > { %v1869_v47 = vpop.f32.mrb[21].mxu0 }
 0x123   : > { %v1870_v48 = vadd.f32 %v1869_v47, %v1868_v28  ;;  %v1871_v49 = vpop.f32.mrb[22].mxu0  ;;  %v1908_v50 = vpop.f32.mrb[20].mxu1 }
 0x124   : > { %v1872_v52 = vpop.f32.mrb[23].mxu0  ;;  %v1909_v51 = vpop.f32.mrb[21].mxu1 }
 0x125   : > { %v1119_v53 = vadd.f32 %v1870_v48, %v1054_v57  ;;  %v1873_v54 = vadd.f32 %v1872_v52, %v1871_v49  ;;  %v1910_v55 = vadd.f32 %v1909_v51, %v1908_v50  ;;  %v1911_v56 = vpop.f32.mrb[22].mxu1 }
 0x126   : > { %v1912_v42 = vpop.f32.mrb[23].mxu1 }
 0x127   : > { %v1122_v58 = vadd.f32 %v1873_v54, %v1057_v59  ;;  %v1913_v60 = vadd.f32 %v1912_v42, %v1911_v56  ;;  %v1184_v61 = vadd.f32 %v1910_v55, %v1119_v53 }
 0x129   : > { %v1874_v63 = vpop.f32.mrb[24].mxu0  ;;  %v1187_v44 = vadd.f32 %v1913_v60, %v1122_v58  ;;  %v1371_v60 = vlaneseq }
 0x12a   : > { %v1875_v0 = vpop.f32.mrb[25].mxu0 }
 0x12b   : > { %v1876_v1 = vadd.f32 %v1875_v0, %v1874_v63  ;;  %v1877_v2 = vpop.f32.mrb[26].mxu0  ;;  %v1914_v3 = vpop.f32.mrb[24].mxu1 }
 0x12c   : > { %v1878_v4 = vpop.f32.mrb[27].mxu0  ;;  %v1915_v62 = vpop.f32.mrb[25].mxu1 }
 0x12d   : > { %v1127_v5 = vadd.f32 %v1876_v1, %v1062_v9  ;;  %v1879_v6 = vadd.f32 %v1878_v4, %v1877_v2  ;;  %v1916_v7 = vadd.f32 %v1915_v62, %v1914_v3  ;;  %v1917_v8 = vpop.f32.mrb[26].mxu1 }
 0x12e   : > { %v1918_v57 = vpop.f32.mrb[27].mxu1 }
 0x12f   : > { %v1130_v10 = vadd.f32 %v1879_v6, %v1065_v11  ;;  %v1919_v12 = vadd.f32 %v1918_v57, %v1917_v8  ;;  %v1192_v13 = vadd.f32 %v1916_v7, %v1127_v5 }
 0x131   : > { %v1880_v14 = vpop.f32.mrb[28].mxu0  ;;  %v1195_v59 = vadd.f32 %v1919_v12, %v1130_v10 }
 0x132   : > { %v1881_v15 = vpop.f32.mrb[29].mxu0 }
 0x133   : > { %v1882_v16 = vadd.f32 %v1881_v15, %v1880_v14  ;;  %v1883_v17 = vpop.f32.mrb[30].mxu0  ;;  %v1920_v18 = vpop.f32.mrb[28].mxu1 }
 0x134   : > { %v1884_v19 = vpop.f32.mrb[31].mxu0  ;;  %v1921_v20 = vpop.f32.mrb[29].mxu1 }
 0x135   : > { %v1135_v21 = vadd.f32 %v1882_v16, %v1070_v25  ;;  %v1885_v22 = vadd.f32 %v1884_v19, %v1883_v17  ;;  %v1922_v23 = vadd.f32 %v1921_v20, %v1920_v18  ;;  %v1923_v24 = vpop.f32.mrb[30].mxu1 }
 0x136   : > { %v1924_v9 = vpop.f32.mrb[31].mxu1 }
 0x137   : > { %v1138_v26 = vadd.f32 %v1885_v22, %v1073_v27  ;;  %v1925_v29 = vadd.f32 %v1924_v9, %v1923_v24  ;;  %v1200_v30 = vadd.f32 %v1922_v23, %v1135_v21 }
 0x139   : > { %v1990_v31 = vpop.f32.mrb[32].mxu0  ;;  %v1203_v11 = vadd.f32 %v1925_v29, %v1138_v26 }
 0x13a   : > { %v1249_v33 = vadd.f32 %v1990_v31, %v1184_v61  ;;  %v1240_v34 = vpop.f32.mrb[33].mxu0  ;;  %v1372_v61 = vshrl.u32 %v1371_v60, 7 }
 0x13b   : > { %v1241_v35 = vadd.f32 %v1240_v34, %v1176_v46  ;;  %v1991_v36 = vpop.f32.mrb[34].mxu0 }
 0x13c   : > { %v1252_v37 = vadd.f32 %v1991_v36, %v1187_v44  ;;  %v1243_v38 = vpop.f32.mrb[35].mxu0  ;;  %v1373_v63 = vsub.s32 0, %v1372_v61 }
 0x13d   : > { %v1244_v39 = vadd.f32 %v1243_v38, %v1179_v32 }
 0x13f   : > { %v1271_v40 = vadd.f32 %v1244_v39, %v1241_v35 }
 0x141   : > { %v1272_v41 = vadd.f32 %v1271_v40, %v1249_v33  ;;  %v1994_v43 = vpop.f32.mrb[36].mxu0 }
 0x142   : > { %v1265_v25 = vadd.f32 %v1994_v43, %v1200_v30  ;;  %v1256_v45 = vpop.f32.mrb[37].mxu0 }
 0x143   : > { %v1257_v28 = vadd.f32 %v1256_v45, %v1192_v13  ;;  %v1273_v47 = vadd.f32 %v1272_v41, %v1252_v37  ;;  %v1995_v48 = vpop.f32.mrb[38].mxu0  ;;  %v1754_v41 = vld [vmem:[%s2692_s4] ss:$0 sm:$0xff] }
 0x144   : > { %v1268_v27 = vadd.f32 %v1995_v48, %v1203_v11  ;;  %v1259_v49 = vpop.f32.mrb[39].mxu0 }
 0x145   : > { %v1274_v50 = vadd.f32 %v1273_v47, %v1257_v28  ;;  %v1260_v52 = vadd.f32 %v1259_v49, %v1195_v59 }
 0x147   : > { %v1275_v51 = vadd.f32 %v1274_v50, %v1260_v52 }
 0x149   : > { %v1276_v53 = vadd.f32 %v1275_v51, %v1265_v25 }
 0x14b   : > { %v1277_v54 = vadd.f32 %v1276_v53, %v1268_v27 }
 0x14d   : > { %v1278_v46 = vrot.slane %v1277_v54, 4 }
 0x14f   : > { %v1279_v55 = vadd.f32 %v1278_v46, %v1277_v54 }
 0x151   : > { %v1280_v56 = vrot.slane %v1279_v55, 2 }
 0x153   : > { %v1281_v42 = vadd.f32 %v1280_v56, %v1279_v55 }
 0x155   : > { %v1282_v32 = vrot.slane %v1281_v42, 1 }
 0x157   : > { %v1283_v58 = vadd.f32 %v1282_v32, %v1281_v42 }
 0x159   : > { %2029 = vmatmul.mubr.f32.vlgmr.msra.gmra.mrb[32].mxu1 %v1283_v58 }
 0x22c   : > { %v1366_v44 = vpop.f32.mrb[32].mxu1 }
 0x22d   : > { %v1370_v0 = vmul.f32 0.015625, %v1366_v44  ;;  %v2030_v1 = vpop.f32.mrb[33].mxu1 }
 0x22f   : > { %v1374_v2 = vrot.slane %v1370_v0, %v1373_v63 }
 0x231   : > { %v1375_v3 = vsub.f32 %v1241_v35, %v1374_v2  ;;  %v1376_v4 = vsub.f32 %v1244_v39, %v1374_v2  ;;  %v1377_v62 = vsub.f32 %v1249_v33, %v1374_v2  ;;  %v1378_v5 = vsub.f32 %v1252_v37, %v1374_v2  ;;  %v1477_v37 = vld [vmem:[%s2691_s3] sm:$0x1] }
 0x232   : > { %v1379_v8 = vsub.f32 %v1257_v28, %v1374_v2  ;;  %v1380_v12 = vsub.f32 %v1260_v52, %v1374_v2  ;;  %v1381_v59 = vsub.f32 %v1265_v25, %v1374_v2  ;;  %v1382_v17 = vsub.f32 %v1268_v27, %v1374_v2 }
 0x233   : > { %v1383_v6 = vmul.f32 %v1375_v3, %v1375_v3  ;;  %v1384_v7 = vmul.f32 %v1376_v4, %v1376_v4  ;;  %v1385_v57 = vmul.f32 %v1377_v62, %v1377_v62  ;;  %v1386_v13 = vmul.f32 %v1378_v5, %v1378_v5 }
 0x234   : > { %v1387_v15 = vmul.f32 %v1379_v8, %v1379_v8  ;;  %v1388_v18 = vmul.f32 %v1380_v12, %v1380_v12  ;;  %v1389_v20 = vmul.f32 %v1381_v59, %v1381_v59  ;;  %v1390_v22 = vmul.f32 %v1382_v17, %v1382_v17 }
 0x235   : > { %v1391_v10 = vadd.f32 %v1384_v7, %v1383_v6 }
 0x237   : > { %v1392_v14 = vadd.f32 %v1391_v10, %v1385_v57 }
 0x239   : > { %v1393_v16 = vadd.f32 %v1392_v14, %v1386_v13 }
 0x23b   : > { %v1394_v19 = vadd.f32 %v1393_v16, %v1387_v15 }
 0x23d   : > { %v1395_v21 = vadd.f32 %v1394_v19, %v1388_v18 }
 0x23f   : > { %v1396_v23 = vadd.f32 %v1395_v21, %v1389_v20 }
 0x241   : > { %v1397_v24 = vadd.f32 %v1396_v23, %v1390_v22 }
 0x243   : > { %v1398_v9 = vrot.slane %v1397_v24, 4 }
 0x245   : > { %v1399_v26 = vadd.f32 %v1398_v9, %v1397_v24 }
 0x247   : > { %v1400_v29 = vrot.slane %v1399_v26, 2 }
 0x249   : > { %v1401_v30 = vadd.f32 %v1400_v29, %v1399_v26 }
 0x24b   : > { %v1402_v31 = vrot.slane %v1401_v30, 1 }
 0x24d   : > { %v1403_v11 = vadd.f32 %v1402_v31, %v1401_v30 }
 0x24f   : > { %2064 = vmatmul.mubr.f32.vlgmr.msra.gmra.mrb[40].mxu0 %v1403_v11 }
 0x322   : > { %v1470_v33 = vpop.f32.mrb[40].mxu0 }
 0x323   : > { %v1474_v34 = vmul.f32 0.015625, %v1470_v33  ;;  %v2065_v35 = vpop.f32.mrb[41].mxu0 }
 0x325   : > { %v1475_v36 = vadd.f32 1e-05, %v1474_v34 }
 0x327   : > { %2198 = vrsqrt.f32 %v1475_v36 }
 0x331   : > { %v2199_v38 = vpop.eup %2198 }
 0x332   : > { %v1478_v39 = vmul.f32 %v2199_v38, %v1477_v37 }
 0x334   : > { %v1482_v40 = vrot.slane %v1478_v39, %v1373_v63 }
 0x336   : > { %v1483_v43 = vmul.f32 %v1482_v40, %v1375_v3  ;;  %v1484_v25 = vmul.f32 %v1482_v40, %v1376_v4  ;;  %v1485_v45 = vmul.f32 %v1482_v40, %v1377_v62  ;;  %v1486_v28 = vmul.f32 %v1482_v40, %v1378_v5 }
 0x337   : > { %v1487_v47 = vmul.f32 %v1482_v40, %v1379_v8  ;;  %v1488_v48 = vmul.f32 %v1482_v40, %v1380_v12  ;;  %v1489_v27 = vmul.f32 %v1482_v40, %v1381_v59  ;;  %v1490_v49 = vmul.f32 %v1482_v40, %v1382_v17 }
 0x338   : > { %v1498_v50 = vadd.f32 %v1754_v41, %v1483_v43  ;;  %v1499_v52 = vadd.f32 %v1754_v41, %v1484_v25  ;;  %v1500_v51 = vadd.f32 %v1754_v41, %v1485_v45  ;;  %v1501_v53 = vadd.f32 %v1754_v41, %v1486_v28 }
 0x339   : > { %v1502_v54 = vadd.f32 %v1754_v41, %v1487_v47  ;;  %v1503_v46 = vadd.f32 %v1754_v41, %v1488_v48  ;;  %v1504_v55 = vadd.f32 %v1754_v41, %v1489_v27  ;;  %v1505_v58 = vadd.f32 %v1754_v41, %v1490_v49 }
 0x33a   : > { %v1755_v56 = vmul.f32 -1.442695, %v1498_v50  ;;  %v1756_v42 = vmul.f32 -1.442695, %v1499_v52  ;;  %v1757_v32 = vmul.f32 -1.442695, %v1500_v51 }
 0x33b   : > { %v1758_v60 = vmul.f32 -1.442695, %v1501_v53  ;;  %v1759_v61 = vmul.f32 -1.442695, %v1502_v54  ;;  %v1760_v63 = vmul.f32 -1.442695, %v1503_v46 }
 0x33c   : > { %2200 = vpow2.f32 %v1755_v56  ;;  %v1761_v44 = vmul.f32 -1.442695, %v1504_v55  ;;  %v1762_v0 = vmul.f32 -1.442695, %v1505_v58 }
 0x33d   : > { %2202 = vpow2.f32 %v1756_v42 }
 0x33e   : > { %2204 = vpow2.f32 %v1757_v32 }
 0x33f   : > { %2206 = vpow2.f32 %v1758_v60 }
 0x340   : > { %2208 = vpow2.f32 %v1759_v61 }
 0x341   : > { %2210 = vpow2.f32 %v1760_v63 }
 0x342   : > { %2212 = vpow2.f32 %v1761_v44 }
 0x343   : > { %2214 = vpow2.f32 %v1762_v0 }
 0x346   : > { %v2201_v1 = vpop.eup %2200 }
 0x347   : > { %v2203_v2 = vpop.eup %2202  ;;  %v1530_v3 = vadd.f32 1.0, %v2201_v1 }
 0x348   : > { %v2205_v4 = vpop.eup %2204  ;;  %v1531_v62 = vadd.f32 1.0, %v2203_v2 }
 0x349   : > { %v2207_v5 = vpop.eup %2206  ;;  %v1532_v6 = vadd.f32 1.0, %v2205_v4  ;;  %2216 = vrcp.f32 %v1530_v3 }
 0x34a   : > { %v2209_v7 = vpop.eup %2208  ;;  %v1533_v8 = vadd.f32 1.0, %v2207_v5  ;;  %2218 = vrcp.f32 %v1531_v62 }
 0x34b   : > { %v2211_v57 = vpop.eup %2210  ;;  %v1534_v10 = vadd.f32 1.0, %v2209_v7  ;;  %2220 = vrcp.f32 %v1532_v6 }
 0x34c   : > { %v2213_v12 = vpop.eup %2212  ;;  %v1535_v13 = vadd.f32 1.0, %v2211_v57  ;;  %2222 = vrcp.f32 %v1533_v8 }
 0x34d   : > { %v2215_v14 = vpop.eup %2214  ;;  %v1536_v59 = vadd.f32 1.0, %v2213_v12  ;;  %2224 = vrcp.f32 %v1534_v10 }
 0x34e   : > { %v1537_v15 = vadd.f32 1.0, %v2215_v14  ;;  %2226 = vrcp.f32 %v1535_v13 }
 0x34f   : > { %2228 = vrcp.f32 %v1536_v59 }
 0x350   : > { %2230 = vrcp.f32 %v1537_v15 }
 0x353   : > { %v2217_v16 = vpop.eup %2216 }
 0x354   : > { %v2219_v17 = vpop.eup %2218  ;;  %v1554_v18 = vmul.f32 %v2217_v16, %v1498_v50 }
 0x355   : > { %v2221_v19 = vpop.eup %2220  ;;  %v1555_v20 = vmul.f32 %v2219_v17, %v1499_v52 }
 0x356   : > { %v2223_v21 = vpop.eup %2222  ;;  %v1556_v22 = vmul.f32 %v2221_v19, %v1500_v51  ;;  %1562 = vst [vmem:[%s251_s15] sm:$0xff] %v1554_v18 }
 0x357   : > { %v2225_v23 = vpop.eup %2224  ;;  %v1557_v24 = vmul.f32 %v2223_v21, %v1501_v53  ;;  %1563 = vst [vmem:[%s251_s15 + $0x8] sm:$0xff] %v1555_v20 }
 0x358   : > { %v2227_v9 = vpop.eup %2226  ;;  %v1558_v26 = vmul.f32 %v2225_v23, %v1502_v54  ;;  %1564 = vst [vmem:[%s251_s15 + $0x10] sm:$0xff] %v1556_v22 }
 0x359   : > { %v2229_v29 = vpop.eup %2228  ;;  %v1559_v30 = vmul.f32 %v2227_v9, %v1503_v46  ;;  %1565 = vst [vmem:[%s251_s15 + $0x18] sm:$0xff] %v1557_v24 }
 0x35a   : > { %v2231_v31 = vpop.eup %2230  ;;  %v1560_v11 = vmul.f32 %v2229_v29, %v1504_v55  ;;  %1566 = vst [vmem:[%s251_s15 + $0x20] sm:$0xff] %v1558_v26 }
 0x35b   : > { %v1561_v33 = vmul.f32 %v2231_v31, %v1505_v58  ;;  %1567 = vst [vmem:[%s251_s15 + $0x28] sm:$0xff] %v1559_v30 }
 0x35c   : > { %1568 = vst [vmem:[%s251_s15 + $0x30] sm:$0xff] %v1560_v11 }
 0x35d   : > { %1569 = vst [vmem:[%s251_s15 + $0x38] sm:$0xff] %v1561_v33 }
 0x35e PF: > { %s16_s21 = sadd.s32 1, %s2238_s21  }
 0x35f   : > { %p13_p4 = scmp.ge.s32.totalorder %s16_s21, 4  }
 0x361   :  { %15 = sbr.rel (!%p13_p4) target bundleno = 1 (0x1), region = 76 }

// kernel: encoder_block_forward.5
= control target key start
LH: loop header
LB: loop body
LE: loop exit
PB: predicated region body
PF: predicated region fallthrough
CT: control target
= control target key end

     0   :  { %s2540_s30 = smov 0   ;;  %s2967_s0 = inlined_call_operand.vmem [shape: f32[2,10,10,128], index: 0, kind: input, shape index: {}]   ;;  %s2968_s1 = inlined_call_operand.vmem [shape: bf16[1152,128], index: 1, kind: input, shape index: {}]   ;;  %s2969_s2 = inlined_call_operand.vmem [shape: f32[1,128], index: 2, kind: input, shape index: {}]   ;;  %s2970_s3 = inlined_call_operand.vmem [shape: f32[1,128], index: 3, kind: input, shape index: {}]   ;;  %s2971_s4 = inlined_call_operand.vmem [shape: f32[1,128], index: 4, kind: input, shape index: {}]   ;;  %s2972_s5 = inlined_call_operand.vmem [shape: f32[128,128], index: 5, kind: input, shape index: {}]   ;;  %s2973_s6 = inlined_call_operand.vmem [shape: f32[2,64,4], index: 6, kind: input, shape index: {}]   ;;  %s2974_s7 = inlined_call_operand.vmem [shape: bf16[4,128], index: 7, kind: input, shape index: {}]   ;;  %s2975_s8 = inlined_call_operand.vmem [shape: f32[1,128], index: 8, kind: input, shape index: {}]   ;;  %s2976_s9 = inlined_call_operand.vmem [shape: f32[2,64,128], index: 9, kind: output, shape index: {}]  }
   0x1 LB: > { %s1848_s10 = sadd.s32 4294967295, %s2485_s30   ;;  %p1852_p0 = scmp.ge.s32.totalorder %s2485_s30, 1  ;;  %s2485_s30 = sphi %s2540_s30, %s19_s30  }
   0x2   : > { %p297_p1 = scmp.lt.s32.totalorder %s2485_s30, 3 }
   0x4   : > { %p298_p2 = pnand %p1852_p0, %p297_p1 }
   0x5   : > { %v2373_v0 = vld [vmem:[%s2968_s1 + $0x40] sm:$0xff] (!%p298_p2)   ;;  %v2377_v4 = vld [vmem:[%s2968_s1 + $0x48] sm:$0xff] (!%p298_p2)   ;;  %v2381_v8 = vld [vmem:[%s2968_s1 + $0x50] sm:$0xff] (!%p298_p2)   ;;  %p338_p3 = scmp.lt.s32.totalorder (!%p298_p2), %s1848_s10, 1  ;;  %vm2488_vm0 = vmmov (!%p298_p2), 0   ;;  %vm1640_vm1 = vcmask (!%p298_p2), 1041408  }
   0x6   : > { %301 = sbr.rel (%p298_p2) target bundleno = 864 (0x360), region = 56  ;;  %v2374_v1 = vld [vmem:[%s2968_s1] sm:$0xff] (!%p298_p2)   ;;  %1997 = vmatprep.subr.bf16.mxu0 (!%p298_p2), %v2373_v0  ;;  %v2378_v5 = vld [vmem:[%s2968_s1 + $0x8] sm:$0xff] (!%p298_p2)   ;;  %v2382_v9 = vld [vmem:[%s2968_s1 + $0x10] sm:$0xff] (!%p298_p2)   ;;  %vm1627_vm2 = vcmask (!%p298_p2), 31744  }
   0x7   : > { %v2375_v2 = vld [vmem:[%s2968_s1 + $0xc0] sm:$0xff] (!%p298_p2)   ;;  %1998 = vmatpush3.bf16.msra.mxu0 (!%p298_p2), %v2374_v1  ;;  %v2379_v6 = vld [vmem:[%s2968_s1 + $0xc8] sm:$0xff] (!%p298_p2)   ;;  %v2383_v10 = vld [vmem:[%s2968_s1 + $0xd0] sm:$0xff] (!%p298_p2)  }
   0x8   : > { %v2376_v3 = vld [vmem:[%s2968_s1 + $0x80] sm:$0xff] (!%p298_p2)   ;;  %2037 = vmatprep.subr.bf16.mxu1 (!%p298_p2), %v2375_v2  ;;  %1999 = vmatprep.subr.bf16.mxu0 (!%p298_p2), %v2377_v4  ;;  %v2380_v7 = vld [vmem:[%s2968_s1 + $0x88] sm:$0xff] (!%p298_p2)   ;;  %v2384_v11 = vld [vmem:[%s2968_s1 + $0x90] sm:$0xff] (!%p298_p2)  }
   0x9   : > { %2038 = vmatpush3.bf16.msra.mxu1 (!%p298_p2), %v2376_v3  ;;  %v2385_v12 = vld [vmem:[%s2968_s1 + $0x58] sm:$0xff] (!%p298_p2)   ;;  %v2389_v16 = vld [vmem:[%s2968_s1 + $0x60] sm:$0xff] (!%p298_p2)   ;;  %v2393_v20 = vld [vmem:[%s2968_s1 + $0x68] sm:$0xff] (!%p298_p2)  }
   0xa   : > { %2039 = vmatprep.subr.bf16.mxu1 (!%p298_p2), %v2379_v6  ;;  %v2386_v13 = vld [vmem:[%s2968_s1 + $0x18] sm:$0xff] (!%p298_p2)   ;;  %v2390_v17 = vld [vmem:[%s2968_s1 + $0x20] sm:$0xff] (!%p298_p2)   ;;  %v2394_v21 = vld [vmem:[%s2968_s1 + $0x28] sm:$0xff] (!%p298_p2)  }
   0xb   : > { %2000 = vmatpush3.bf16.msra.mxu0 (!%p298_p2), %v2378_v5  ;;  %v2387_v14 = vld [vmem:[%s2968_s1 + $0xd8] sm:$0xff] (!%p298_p2)   ;;  %v2391_v18 = vld [vmem:[%s2968_s1 + $0xe0] sm:$0xff] (!%p298_p2)   ;;  %v2395_v22 = vld [vmem:[%s2968_s1 + $0xe8] sm:$0xff] (!%p298_p2)  }
   0xc   : > { %2001 = vmatprep.subr.bf16.mxu0 (!%p298_p2), %v2381_v8  ;;  %v2388_v15 = vld [vmem:[%s2968_s1 + $0x98] sm:$0xff] (!%p298_p2)   ;;  %v2392_v19 = vld [vmem:[%s2968_s1 + $0xa0] sm:$0xff] (!%p298_p2)   ;;  %v2396_v23 = vld [vmem:[%s2968_s1 + $0xa8] sm:$0xff] (!%p298_p2)  }
   0xd   : > { %2040 = vmatpush3.bf16.msra.mxu1 %v2380_v7  ;;  %s2978_s10 = smov (!%p338_p3, %s1848_s10), 1  ;;  %v2397_v24 = vld [vmem:[%s2968_s1 + $0x70] sm:$0xff]   ;;  %v2401_v28 = vld [vmem:[%s2968_s1 + $0x78] sm:$0xff]   ;;  %v2405_v38 = vld [vmem:[%s2968_s1 + $0x140] sm:$0xff]  }
   0xe   : > { %2041 = vmatprep.subr.bf16.mxu1 %v2383_v10  ;;  %s2361_s23 = smul.u32 160, %s2978_s10  ;;  %v2398_v25 = vld [vmem:[%s2968_s1 + $0x30] sm:$0xff]   ;;  %v2402_v29 = vld [vmem:[%s2968_s1 + $0x38] sm:$0xff]   ;;  %v2406_v41 = vld [vmem:[%s2968_s1 + $0x100] sm:$0xff]   ;;  %s1995_s28 = sshll.u32 %s2978_s10, 6 }
   0xf   : > { %2002 = vmatpush3.bf16.msra.mxu0 %v2382_v9  ;;  %v2399_v26 = vld [vmem:[%s2968_s1 + $0xf0] sm:$0xff]   ;;  %v2403_v30 = vld [vmem:[%s2968_s1 + $0xf8] sm:$0xff]   ;;  %v2407_v45 = vld [vmem:[%s2968_s1 + $0x1c0] sm:$0xff]   ;;  %s347_s12 = scalar_lea.vmem %s2973_s6, %s1995_s28  ;;  %s352_s21 = scalar_lea.vmem %s2976_s9, %s1995_s28 }
  0x10   : > { %2003 = vmatprep.subr.bf16.mxu0 %v2385_v12  ;;  %v2400_v27 = vld [vmem:[%s2968_s1 + $0xb0] sm:$0xff]   ;;  %s2645_s15 = scalar_lea.vmem %s2967_s0, %s2361_s23  ;;  %v2404_v34 = vld [vmem:[%s2968_s1 + $0xb8] sm:$0xff]   ;;  %v2408_v46 = vld [vmem:[%s2968_s1 + $0x180] sm:$0xff]  }
  0x11   : > { %2042 = vmatpush3.bf16.msra.mxu1 %v2384_v11  ;;  %v362_v31 = vld [vmem:[%s2645_s15 + $0x1] sm:$0xff]  ;;  %v2655_v32 = vld [vmem:[%s2645_s15 + $0x11] sm:$0xff] }
  0x12   : > { %2043 = vmatprep.subr.bf16.mxu1 %v2387_v14  ;;  %v429_v33 = vpack.c.bf16 %v2655_v32, %v362_v31  ;;  %v354_v35 = vld [vmem:[%s2645_s15] sm:$0xff]  ;;  %v355_v36 = vld [vmem:[%s2645_s15 + $0x10] sm:$0xff]  ;;  %v2409_v47 = vld [vmem:[%s2968_s1 + $0x148] sm:$0xff]  }
  0x13   : > { %2004 = vmatpush3.bf16.msra.mxu0 %v2386_v13  ;;  %v428_v37 = vpack.c.bf16 %v355_v36, %v354_v35  ;;  %v1859_v39 = vld [vmem:[%s2645_s15 + $0x20] sm:$0xff]  ;;  %v2672_v43 = vld [vmem:[%s2645_s15 + $0x12] sm:$0xff]  ;;  %v2410_v48 = vld [vmem:[%s2968_s1 + $0x108] sm:$0xff]  }
  0x14   : > { %2005 = vmatprep.subr.bf16.mxu0 %v2389_v16  ;;  %1079 = vmatprep.mubr.bf16.mxu0 %v429_v33  ;;  %v431_v40 = vpack.c.bf16 %v1859_v39, %v355_v36  ;;  %v370_v42 = vld [vmem:[%s2645_s15 + $0x2] sm:$0xff]  ;;  %v2694_v51 = vld [vmem:[%s2645_s15 + $0x31] sm:$0xff] }
  0x15   : > { %2044 = vmatpush3.bf16.msra.mxu1 %v2388_v15  ;;  %v430_v44 = vpack.c.bf16 %v2672_v43, %v370_v42  ;;  %v2411_v49 = vld [vmem:[%s2968_s1 + $0x1c8] sm:$0xff]   ;;  %v357_v54 = vld [vmem:[%s2645_s15 + $0x30] sm:$0xff]  ;;  %v1861_v57 = vld [vmem:[%s2645_s15 + $0x40] sm:$0xff] }
  0x16   : > { %2045 = vmatprep.subr.bf16.mxu1 %v2391_v18  ;;  %1144 = vmatprep.mubr.bf16.mxu1 %v431_v40  ;;  %v2691_v50 = vld [vmem:[%s2645_s15 + $0x21] sm:$0xff]  ;;  %v2705_v55 = vpack.c.bf16 %v357_v54, %v1859_v39  ;;  %v2413_v56 = vld [vmem:[%s2968_s1 + $0x150] sm:$0xff]   ;;  %v440_v58 = vpack.c.bf16 %v1861_v57, %v357_v54  ;;  %v2417_v1 = vld [vmem:[%s2968_s1 + $0x158] sm:$0xff]  }
  0x17   : > { %2006 = vmatpush3.bf16.msra.mxu0 %v2390_v17  ;;  %v2698_v52 = vpack.c.bf16 %v2694_v51, %v2691_v50  ;;  %v2412_v53 = vld [vmem:[%s2968_s1 + $0x188] sm:$0xff]   ;;  %v2414_v59 = vld [vmem:[%s2968_s1 + $0x110] sm:$0xff]   ;;  %v2418_v2 = vld [vmem:[%s2968_s1 + $0x118] sm:$0xff]   ;;  %v432_v42 = vpack.c.bf16 %v2691_v50, %v2655_v32 }
  0x18   : > { %2007 = vmatprep.subr.bf16.mxu0 %v2393_v20  ;;  %v2715_v60 = vld [vmem:[%s2645_s15 + $0x22] sm:$0xff]  ;;  %v2719_v61 = vld [vmem:[%s2645_s15 + $0x32] sm:$0xff] }
  0x19   : > { %2046 = vmatpush3.bf16.msra.mxu1 %v2392_v19  ;;  %v2723_v62 = vpack.c.bf16 %v2719_v61, %v2715_v60  ;;  %v2415_v63 = vld [vmem:[%s2968_s1 + $0x1d0] sm:$0xff]   ;;  %v2419_v3 = vld [vmem:[%s2968_s1 + $0x1d8] sm:$0xff]   ;;  %v2742_v4 = vld [vmem:[%s2645_s15 + $0x41] sm:$0xff] }
  0x1a   : > { %2047 = vmatprep.subr.bf16.mxu1 %v2395_v22  ;;  %v2416_v0 = vld [vmem:[%s2968_s1 + $0x190] sm:$0xff]   ;;  %v2420_v7 = vld [vmem:[%s2968_s1 + $0x198] sm:$0xff]   ;;  %v2421_v10 = vld [vmem:[%s2968_s1 + $0x160] sm:$0xff]  }
  0x1b   : > { %2008 = vmatpush3.bf16.msra.mxu0 %v2394_v21  ;;  %v2745_v5 = vld [vmem:[%s2645_s15 + $0x51] sm:$0xff]  ;;  %v1863_v11 = vld [vmem:[%s2645_s15 + $0x60] sm:$0xff]  ;;  %v2425_v19 = vld [vmem:[%s2968_s1 + $0x168] sm:$0xff]  }
  0x1c   : > { %2009 = vmatprep.subr.bf16.mxu0 %v2397_v24  ;;  %v2749_v6 = vpack.c.bf16 %v2745_v5, %v2742_v4  ;;  %v359_v8 = vld [vmem:[%s2645_s15 + $0x50] sm:$0xff]  ;;  %v2422_v13 = vld [vmem:[%s2968_s1 + $0x120] sm:$0xff]   ;;  %v2426_v20 = vld [vmem:[%s2968_s1 + $0x128] sm:$0xff]  }
  0x1d   : > { %2048 = vmatpush3.bf16.msra.mxu1 %v2396_v23  ;;  %v2756_v9 = vpack.c.bf16 %v359_v8, %v1861_v57  ;;  %v449_v12 = vpack.c.bf16 %v1863_v11, %v359_v8  ;;  %v374_v14 = vld [vmem:[%s2645_s15 + $0x42] sm:$0xff]  ;;  %v2768_v15 = vld [vmem:[%s2645_s15 + $0x52] sm:$0xff] }
  0x1e   : > { %2049 = vmatprep.subr.bf16.mxu1 %v2399_v26  ;;  %v2771_v16 = vpack.c.bf16 %v2768_v15, %v374_v14  ;;  %v2423_v17 = vld [vmem:[%s2968_s1 + $0x1e0] sm:$0xff]   ;;  %v2427_v21 = vld [vmem:[%s2968_s1 + $0x1e8] sm:$0xff]   ;;  %v2793_v23 = vld [vmem:[%s2645_s15 + $0x71] sm:$0xff] }
  0x1f   : > { %2010 = vmatpush3.bf16.msra.mxu0 %v2398_v25  ;;  %v2424_v18 = vld [vmem:[%s2968_s1 + $0x1a0] sm:$0xff]   ;;  %v2428_v25 = vld [vmem:[%s2968_s1 + $0x1a8] sm:$0xff]   ;;  %v361_v26 = vld [vmem:[%s2645_s15 + $0x70] sm:$0xff] }
  0x20   : > { %2011 = vmatprep.subr.bf16.mxu0 %v2401_v28  ;;  %v2790_v22 = vld [vmem:[%s2645_s15 + $0x61] sm:$0xff]  ;;  %v2429_v28 = vld [vmem:[%s2968_s1 + $0x170] sm:$0xff]   ;;  %v2433_v39 = vld [vmem:[%s2968_s1 + $0x178] sm:$0xff]  }
  0x21   : > { %2050 = vmatpush3.bf16.msra.mxu1 %v2400_v27  ;;  %v456_v24 = vpack.c.bf16 %v2793_v23, %v2790_v22  ;;  %v2801_v27 = vpack.c.bf16 %v361_v26, %v1863_v11  ;;  %v2430_v33 = vld [vmem:[%s2968_s1 + $0x130] sm:$0xff]   ;;  %v2434_v40 = vld [vmem:[%s2968_s1 + $0x138] sm:$0xff]   ;;  %v2441_v50 = vld [vmem:[%s2968_s1 + $0x220] sm:$0xff]  }
  0x22   : > { %2051 = vmatprep.subr.bf16.mxu1 %v2403_v30  ;;  %v433_v30 = vpack.c.bf16 %v2715_v60, %v2672_v43  ;;  %v377_v35 = vld [vmem:[%s2645_s15 + $0x72] sm:$0xff]  ;;  %v1389_v8 = vld [vmem:[%s2972_s5 + $0x20] sm:$0xff] }
  0x23   : > { %2012 = vmatpush3.bf16.msra.mxu0 %v2402_v29  ;;  %v2807_v29 = vld [vmem:[%s2645_s15 + $0x80] sm:$0xff]  ;;  %v2436_v43 = vld [vmem:[%s2968_s1 + $0x1b8] sm:$0xff]   ;;  %v2439_v32 = vld [vmem:[%s2968_s1 + $0x210] sm:$0xff]  }
  0x24   : > { %2077 = vmatprep.subr.bf16.mxu0 %v2405_v38  ;;  %v458_v31 = vpack.c.bf16 %v2807_v29, %v361_v26  ;;  %v2432_v38 = vld [vmem:[%s2968_s1 + $0x1b0] sm:$0xff]   ;;  %v2489_v26 = vmov 0.0  }
  0x25   : > { %2052 = vmatpush3.bf16.msra.mxu1 %v2404_v34  ;;  %v376_v34 = vld [vmem:[%s2645_s15 + $0x62] sm:$0xff]  ;;  %v1897_v54 = vld [vmem:[%s2645_s15 + $0x91] sm:$0xff] }
  0x26   : > { %1080 = vmatmul.mubr.bf16.vlgmr.msra.gmra.mrb[0].mxu0 %v428_v37  ;;  %2117 = vmatprep.subr.bf16.mxu1 %v2407_v45  ;;  %v2818_v36 = vpack.c.bf16 %v377_v35, %v376_v34  ;;  %v2431_v37 = vld [vmem:[%s2968_s1 + $0x1f0] sm:$0xff]   ;;  %v2437_v45 = vld [vmem:[%s2968_s1 + $0x200] sm:$0xff]  }
  0x27   : > { %2078 = vmatpush3.bf16.msra.mxu0 %v2406_v41  ;;  %1087 = vmatprep.mubr.bf16.mxu0 %v2698_v52  ;;  %v2435_v41 = vld [vmem:[%s2968_s1 + $0x1f8] sm:$0xff]   ;;  %v1391_v11 = vld [vmem:[%s2972_s5 + $0x30] sm:$0xff] }
  0x28   : > { %1145 = vmatmul.mubr.bf16.vlgmr.msra.gmra.mrb[0].mxu1 %v430_v44  ;;  %2079 = vmatprep.subr.bf16.mxu0 %v2409_v47  ;;  %v442_v44 = vpack.c.bf16 %v374_v14, %v2719_v61  ;;  %v441_v47 = vpack.c.bf16 %v2742_v4, %v2694_v51  ;;  %v450_v51 = vpack.c.bf16 %v2790_v22, %v2745_v5  ;;  %v1387_v5 = vld [vmem:[%s2972_s5 + $0x10] sm:$0xff]  ;;  %v1393_v14 = vld [vmem:[%s2972_s5 + $0x40] sm:$0xff] }
  0x29   : > { %2118 = vmatpush3.bf16.msra.mxu1 %v2408_v46  ;;  %1152 = vmatprep.mubr.bf16.mxu1 %v440_v58  ;;  %v2438_v46 = vld [vmem:[%s2968_s1 + $0x208] sm:$0xff]   ;;  %v2443_v58 = vld [vmem:[%s2968_s1 + $0x230] sm:$0xff]  }
  0x2a   : > { %2119 = vmatprep.subr.bf16.mxu1 %v2411_v49  ;;  %v2440_v49 = vld [vmem:[%s2968_s1 + $0x218] sm:$0xff]  }
  0x2b   : > { %2080 = vmatpush3.bf16.msra.mxu0 %v2410_v48  ;;  %v451_v48 = vpack.c.bf16 %v376_v34, %v2768_v15  ;;  %v1394_v15 = vld [vmem:[%s2972_s5 + $0x48] sm:$0xff] }
  0x2c   : > { %2081 = vmatprep.subr.bf16.mxu0 %v2413_v56  ;;  %v2442_v56 = vld [vmem:[%s2968_s1 + $0x228] sm:$0xff]  }
  0x2d   : > { %2120 = vmatpush3.bf16.msra.mxu1 %v2412_v53  ;;  %v1873_v53 = vld [vmem:[%s2645_s15 + $0x81] sm:$0xff] }
  0x2e   : > { %1088 = vmatmul.mubr.bf16.gmra.mrb[4].mxu0 %v2705_v55  ;;  %2121 = vmatprep.subr.bf16.mxu1 %v2415_v63  ;;  %v462_v57 = vpack.c.bf16 %v1897_v54, %v1873_v53  ;;  %v459_v60 = vpack.c.bf16 %v1873_v53, %v2793_v23  ;;  %v2444_v63 = vld [vmem:[%s2968_s1 + $0x238] sm:$0xff]   ;;  %v1399_v23 = vld [vmem:[%s2972_s5 + $0x70] sm:$0xff] }
  0x2f   : > { %2082 = vmatpush3.bf16.msra.mxu0 %v2414_v59  ;;  %1095 = vmatprep.mubr.bf16.mxu0 %v2749_v6  ;;  %v1889_v59 = vld [vmem:[%s2645_s15 + $0x90] sm:$0xff] }
  0x30   : > { %1153 = vmatmul.mubr.bf16.gmra.mrb[4].mxu1 %v2723_v62  ;;  %2083 = vmatprep.subr.bf16.mxu0 %v2417_v1  ;;  %v461_v61 = vpack.c.bf16 %v1889_v59, %v2807_v29 }
  0x31   : > { %2122 = vmatpush3.bf16.msra.mxu1 %v2416_v0  ;;  %1160 = vmatprep.mubr.bf16.mxu1 %v449_v12  ;;  %v1905_v0 = vld [vmem:[%s2645_s15 + $0x92] sm:$0xff] }
  0x32   : > { %2123 = vmatprep.subr.bf16.mxu1 %v2419_v3  ;;  %v1386_v3 = vld [vmem:[%s2972_s5 + $0x8] sm:$0xff]  ;;  %v1392_v12 = vld [vmem:[%s2972_s5 + $0x38] sm:$0xff] }
  0x33   : > { %2084 = vmatpush3.bf16.msra.mxu0 %v2418_v2  ;;  %v1385_v2 = vld [vmem:[%s2972_s5] sm:$0xff] }
  0x34   : > { %2085 = vmatprep.subr.bf16.mxu0 %v2421_v10  ;;  %v2313_v4 = vpack.c.bf16 %v1386_v3, %v1385_v2 }
  0x35   : > { %2124 = vmatpush3.bf16.msra.mxu1 %v2420_v7 }
  0x36   : > { %1096 = vmatmul.mubr.bf16.gmra.mrb[8].mxu0 %v2756_v9  ;;  %2125 = vmatprep.subr.bf16.mxu1 %v2423_v17  ;;  %v1395_v17 = vld [vmem:[%s2972_s5 + $0x50] sm:$0xff] }
  0x37   : > { %2086 = vmatpush3.bf16.msra.mxu0 %v2422_v13  ;;  %1103 = vmatprep.mubr.bf16.mxu0 %v456_v24  ;;  %v2322_v13 = vpack.c.bf16 %v1392_v12, %v1391_v11 }
  0x38   : > { %1161 = vmatmul.mubr.bf16.gmra.mrb[8].mxu1 %v2771_v16  ;;  %2087 = vmatprep.subr.bf16.mxu0 %v2425_v19 }
  0x39   : > { %2126 = vmatpush3.bf16.msra.mxu1 %v2424_v18  ;;  %1168 = vmatprep.mubr.bf16.mxu1 %v458_v31  ;;  %v1396_v18 = vld [vmem:[%s2972_s5 + $0x58] sm:$0xff] }
  0x3a   : > { %2127 = vmatprep.subr.bf16.mxu1 %v2427_v21  ;;  %v2328_v19 = vpack.c.bf16 %v1396_v18, %v1395_v17  ;;  %v1398_v21 = vld [vmem:[%s2972_s5 + $0x68] sm:$0xff] }
  0x3b   : > { %2088 = vmatpush3.bf16.msra.mxu0 %v2426_v20  ;;  %v1397_v20 = vld [vmem:[%s2972_s5 + $0x60] sm:$0xff] }
  0x3c   : > { %2089 = vmatprep.subr.bf16.mxu0 %v2429_v28  ;;  %v2331_v22 = vpack.c.bf16 %v1398_v21, %v1397_v20  ;;  %v1906_v28 = vld [vmem:[%s2969_s2] ss:$0 sm:$0xff] }
  0x3d   : > { %2128 = vmatpush3.bf16.msra.mxu1 %v2428_v25 }
  0x3e   : > { %1104 = vmatmul.mubr.bf16.gmra.mrb[12].mxu0 %v2801_v27  ;;  %2129 = vmatprep.subr.bf16.mxu1 %v2431_v37 }
  0x3f   : > { %2090 = vmatpush3.bf16.msra.mxu0 %v2430_v33  ;;  %1209 = vmatprep.mubr.bf16.mxu0 %v433_v30 }
  0x40   : > { %1169 = vmatmul.mubr.bf16.gmra.mrb[12].mxu1 %v2818_v36  ;;  %2091 = vmatprep.subr.bf16.mxu0 %v2433_v39 }
  0x41   : > { %2130 = vmatpush3.bf16.msra.mxu1 %v2432_v38  ;;  %1274 = vmatprep.mubr.bf16.mxu1 %v2698_v52  ;;  %v1881_v52 = vld [vmem:[%s2645_s15 + $0x82] sm:$0xff] }
  0x42   : > { %2131 = vmatprep.subr.bf16.mxu1 %v2435_v41  ;;  %v463_v1 = vpack.c.bf16 %v1905_v0, %v1881_v52 }
  0x43   : > { %2092 = vmatpush3.bf16.msra.mxu0 %v2434_v40 }
  0x44   : > { %2208 = vmatprep.subr.bf16.mxu0 %v2437_v45 }
  0x45   : > { %2132 = vmatpush3.bf16.msra.mxu1 %v2436_v43 }
  0x46   : > { %1210 = vmatmul.mubr.bf16.vlgmr.msra.gmra.mrb[16].mxu0 %v432_v42 }
  0x47   : > { %2209 = vmatpush3.bf16.msra.mxu0 %v2437_v45  ;;  %1217 = vmatprep.mubr.bf16.mxu0 %v442_v44 }
  0x48   : > { %1275 = vmatmul.mubr.bf16.vlgmr.msra.gmra.mrb[16].mxu1 %v2705_v55  ;;  %2210 = vmatprep.subr.bf16.mxu0 %v2438_v46  ;;  %v460_v55 = vpack.c.bf16 %v1881_v52, %v377_v35 }
  0x49   : > { %1282 = vmatprep.mubr.bf16.mxu1 %v2749_v6  ;;  %v1388_v6 = vld [vmem:[%s2972_s5 + $0x18] sm:$0xff] }
  0x4a   : > { %v2316_v7 = vpack.c.bf16 %v1388_v6, %v1387_v5 }
  0x4b   : > { %2211 = vmatpush3.bf16.msra.mxu0 %v2438_v46 }
  0x4c   : > { %2212 = vmatprep.subr.bf16.mxu0 %v2439_v32 }
  0x4e   : > { %1218 = vmatmul.mubr.bf16.gmra.mrb[20].mxu0 %v441_v47 }
  0x4f   : > { %2213 = vmatpush3.bf16.msra.mxu0 %v2439_v32  ;;  %1225 = vmatprep.mubr.bf16.mxu0 %v451_v48 }
  0x50   : > { %1283 = vmatmul.mubr.bf16.gmra.mrb[20].mxu1 %v2756_v9  ;;  %2214 = vmatprep.subr.bf16.mxu0 %v2440_v49  ;;  %v1390_v9 = vld [vmem:[%s2972_s5 + $0x28] sm:$0xff] }
  0x51   : > { %1290 = vmatprep.mubr.bf16.mxu1 %v456_v24  ;;  %v2319_v10 = vpack.c.bf16 %v1390_v9, %v1389_v8  ;;  %v1400_v24 = vld [vmem:[%s2972_s5 + $0x78] sm:$0xff] }
  0x52   : > { %v2334_v25 = vpack.c.bf16 %v1400_v24, %v1399_v23 }
  0x53   : > { %2215 = vmatpush3.bf16.msra.mxu0 %v2440_v49 }
  0x54   : > { %2216 = vmatprep.subr.bf16.mxu0 %v2441_v50 }
  0x56   : > { %1226 = vmatmul.mubr.bf16.gmra.mrb[24].mxu0 %v450_v51 }
  0x57   : > { %2217 = vmatpush3.bf16.msra.mxu0 %v2441_v50  ;;  %1233 = vmatprep.mubr.bf16.mxu0 %v460_v55 }
  0x58   : > { %1291 = vmatmul.mubr.bf16.gmra.mrb[24].mxu1 %v2801_v27  ;;  %2218 = vmatprep.subr.bf16.mxu0 %v2442_v56 }
  0x59   : > { %1298 = vmatprep.mubr.bf16.mxu1 %v462_v57 }
  0x5b   : > { %2219 = vmatpush3.bf16.msra.mxu0 %v2442_v56 }
  0x5c   : > { %2220 = vmatprep.subr.bf16.mxu0 %v2443_v58 }
  0x5e   : > { %1234 = vmatmul.mubr.bf16.gmra.mrb[28].mxu0 %v459_v60 }
  0x5f   : > { %2221 = vmatpush3.bf16.msra.mxu0 %v2443_v58  ;;  %2224 = vmatprep.mubr.bf16.mxu0 %v2723_v62  ;;  %v2487_v62 = vmov 0.0|0.0  }
  0x60   : > { %1299 = vmatmul.mubr.bf16.gmra.mrb[28].mxu1 %v461_v61  ;;  %2222 = vmatprep.subr.bf16.mxu0 %v2444_v63 }
  0x61   : > { %2312 = vmatprep.subr.bf16.mxu1 %v2487_v62  ;;  %2264 = vmatprep.mubr.msk.f32.mxu1 %vm2488_vm0, %v2489_v26 }
  0x62   : > { %2314 = vmatpush3.bf16.msra.mxu1 %v2313_v4 }
  0x63   : > { %2223 = vmatpush3.bf16.msra.mxu0 %v2444_v63  ;;  %2315 = vmatprep.subr.bf16.mxu1 %v2487_v62 }
  0x64   : > { %2336 = vmatprep.subr.bf16.mxu0 %v2487_v62 }
  0x66   : > { %2225 = vmatmul.mubr.bf16.vlgmr.msra.gmra.mrb[32].mxu0 %v2771_v16  ;;  %2317 = vmatpush3.bf16.msra.mxu1 %v2316_v7  ;;  %v2325_v16 = vpack.c.bf16 %v1394_v15, %v1393_v14 }
  0x67   : > { %2228 = vmatprep.mubr.bf16.mxu0 %v2818_v36  ;;  %2338 = vmatpush3.bf16.msra.mxu0 %v2313_v4 }
  0x68   : > { %2339 = vmatprep.subr.bf16.mxu0 %v2487_v62  ;;  %2318 = vmatprep.subr.bf16.mxu1 %v2487_v62 }
  0x6a   : > { %2320 = vmatpush3.bf16.msra.mxu1 %v2319_v10 }
  0x6b   : > { %2341 = vmatpush3.bf16.msra.mxu0 %v2316_v7  ;;  %2321 = vmatprep.subr.bf16.mxu1 %v2487_v62 }
  0x6c   : > { %2342 = vmatprep.subr.bf16.mxu0 %v2487_v62 }
  0x6e   : > { %2229 = vmatmul.mubr.bf16.gmra.mrb[36].mxu0 %v463_v1  ;;  %2323 = vmatpush3.bf16.msra.mxu1 %v2322_v13 }
  0x6f   : > { %2344 = vmatpush3.bf16.msra.mxu0 %v2319_v10  ;;  %2324 = vmatprep.subr.bf16.mxu1 %v2487_v62 }
  0x70   : > { %2345 = vmatprep.subr.bf16.mxu0 %v2487_v62  ;;  %2299 = vmatprep.mubr.msk.f32.mxu0 %vm2488_vm0, %v2489_v26 }
  0x72   : > { %2326 = vmatpush3.bf16.msra.mxu1 %v2325_v16 }
  0x73   : > { %2347 = vmatpush3.bf16.msra.mxu0 %v2322_v13  ;;  %2327 = vmatprep.subr.bf16.mxu1 %v2487_v62 }
  0x74   : > { %2348 = vmatprep.subr.bf16.mxu0 %v2487_v62 }
  0x76   : > { %2329 = vmatpush3.bf16.msra.mxu1 %v2328_v19 }
  0x77   : > { %2350 = vmatpush3.bf16.msra.mxu0 %v2325_v16  ;;  %2330 = vmatprep.subr.bf16.mxu1 %v2487_v62 }
  0x78   : > { %2351 = vmatprep.subr.bf16.mxu0 %v2487_v62 }
  0x7a   : > { %2332 = vmatpush3.bf16.msra.mxu1 %v2331_v22 }
  0x7b   : > { %2353 = vmatpush3.bf16.msra.mxu0 %v2328_v19  ;;  %2333 = vmatprep.subr.bf16.mxu1 %v2487_v62 }
  0x7c   : > { %2354 = vmatprep.subr.bf16.mxu0 %v2487_v62 }
  0x7e   : > { %2335 = vmatpush3.bf16.msra.mxu1 %v2334_v25 }
  0x7f   : > { %2356 = vmatpush3.bf16.msra.mxu0 %v2331_v22 }
  0x80   : > { %2357 = vmatprep.subr.bf16.mxu0 %v2487_v62 }
  0x83   : > { %2359 = vmatpush3.bf16.msra.mxu0 %v2334_v25 }
  0xf9   : > { %v2013_v27 = vpop.f32.mrb[0].mxu0 }
  0xfa   : > { %v2014_v29 = vpop.f32.mrb[1].mxu0 }
  0xfb   : > { %v2015_v30 = vadd.f32 %v2014_v29, %v2013_v27  ;;  %v2016_v31 = vpop.f32.mrb[2].mxu0  ;;  %v2053_v33 = vpop.f32.mrb[0].mxu1 }
  0xfc   : > { %v2017_v34 = vpop.f32.mrb[3].mxu0  ;;  %v2054_v37 = vpop.f32.mrb[1].mxu1 }
  0xfd   : > { %v1082_v35 = vadd.f32 %v2015_v30, %v1906_v28  ;;  %v2018_v36 = vadd.f32 %v2017_v34, %v2016_v31  ;;  %v2055_v38 = vadd.f32 %v2054_v37, %v2053_v33  ;;  %v2056_v39 = vpop.f32.mrb[2].mxu1 }
  0xfe   : > { %v2057_v41 = vpop.f32.mrb[3].mxu1 }
  0xff   : > { %v1085_v40 = vadd.f32 %v2018_v36, %v1906_v28  ;;  %v1147_v42 = vadd.f32 %v2055_v38, %v1082_v35  ;;  %v2058_v43 = vadd.f32 %v2057_v41, %v2056_v39 }
 0x101   : > { %v1150_v44 = vadd.f32 %v2058_v43, %v1085_v40  ;;  %v2019_v45 = vpop.f32.mrb[4].mxu0 }
 0x102   : > { %v2020_v46 = vpop.f32.mrb[5].mxu0 }
 0x103   : > { %v2021_v32 = vadd.f32 %v2020_v46, %v2019_v45  ;;  %v2022_v47 = vpop.f32.mrb[6].mxu0  ;;  %v2059_v48 = vpop.f32.mrb[4].mxu1 }
 0x104   : > { %v2023_v49 = vpop.f32.mrb[7].mxu0  ;;  %v2060_v51 = vpop.f32.mrb[5].mxu1 }
 0x105   : > { %v1090_v50 = vadd.f32 %v2021_v32, %v1906_v28  ;;  %v2024_v52 = vadd.f32 %v2023_v49, %v2022_v47  ;;  %v2061_v53 = vadd.f32 %v2060_v51, %v2059_v48  ;;  %v2062_v54 = vpop.f32.mrb[6].mxu1 }
 0x106   : > { %v2063_v56 = vpop.f32.mrb[7].mxu1 }
 0x107   : > { %v1093_v55 = vadd.f32 %v2024_v52, %v1906_v28  ;;  %v1155_v57 = vadd.f32 %v2061_v53, %v1090_v50  ;;  %v2064_v58 = vadd.f32 %v2063_v56, %v2062_v54 }
 0x109   : > { %v1158_v59 = vadd.f32 %v2064_v58, %v1093_v55  ;;  %v2025_v60 = vpop.f32.mrb[8].mxu0 }
 0x10a   : > { %v2026_v61 = vpop.f32.mrb[9].mxu0 }
 0x10b   : > { %v2027_v63 = vadd.f32 %v2026_v61, %v2025_v60  ;;  %v2028_v0 = vpop.f32.mrb[10].mxu0  ;;  %v2065_v1 = vpop.f32.mrb[8].mxu1 }
 0x10c   : > { %v2029_v2 = vpop.f32.mrb[11].mxu0  ;;  %v2066_v62 = vpop.f32.mrb[9].mxu1 }
 0x10d   : > { %v1098_v3 = vadd.f32 %v2027_v63, %v1906_v28  ;;  %v2030_v4 = vadd.f32 %v2029_v2, %v2028_v0  ;;  %v2067_v5 = vadd.f32 %v2066_v62, %v2065_v1  ;;  %v2068_v6 = vpop.f32.mrb[10].mxu1 }
 0x10e   : > { %v2069_v8 = vpop.f32.mrb[11].mxu1 }
 0x10f   : > { %v1101_v7 = vadd.f32 %v2030_v4, %v1906_v28  ;;  %v1163_v9 = vadd.f32 %v2067_v5, %v1098_v3  ;;  %v2070_v10 = vadd.f32 %v2069_v8, %v2068_v6 }
 0x111   : > { %v1166_v11 = vadd.f32 %v2070_v10, %v1101_v7  ;;  %v2031_v12 = vpop.f32.mrb[12].mxu0 }
 0x112   : > { %v2032_v13 = vpop.f32.mrb[13].mxu0 }
 0x113   : > { %v2033_v14 = vadd.f32 %v2032_v13, %v2031_v12  ;;  %v2034_v15 = vpop.f32.mrb[14].mxu0  ;;  %v2071_v16 = vpop.f32.mrb[12].mxu1 }
 0x114   : > { %v2035_v17 = vpop.f32.mrb[15].mxu0  ;;  %v2072_v20 = vpop.f32.mrb[13].mxu1 }
 0x115   : > { %v1106_v18 = vadd.f32 %v2033_v14, %v1906_v28  ;;  %v2036_v19 = vadd.f32 %v2035_v17, %v2034_v15  ;;  %v2073_v21 = vadd.f32 %v2072_v20, %v2071_v16  ;;  %v2074_v22 = vpop.f32.mrb[14].mxu1 }
 0x116   : > { %v2075_v24 = vpop.f32.mrb[15].mxu1 }
 0x117   : > { %v1109_v23 = vadd.f32 %v2036_v19, %v1906_v28  ;;  %v1171_v25 = vadd.f32 %v2073_v21, %v1106_v18  ;;  %v2076_v26 = vadd.f32 %v2075_v24, %v2074_v22 }
 0x119   : > { %v1174_v27 = vadd.f32 %v2076_v26, %v1109_v23  ;;  %v2093_v29 = vpop.f32.mrb[16].mxu0 }
 0x11a   : > { %v2094_v30 = vpop.f32.mrb[17].mxu0 }
 0x11b   : > { %v2095_v31 = vadd.f32 %v2094_v30, %v2093_v29  ;;  %v2096_v33 = vpop.f32.mrb[18].mxu0  ;;  %v2133_v34 = vpop.f32.mrb[16].mxu1 }
 0x11c   : > { %v2097_v35 = vpop.f32.mrb[19].mxu0  ;;  %v2134_v36 = vpop.f32.mrb[17].mxu1 }
 0x11d   : > { %v1212_v37 = vadd.f32 %v2095_v31, %v1147_v42  ;;  %v2098_v38 = vadd.f32 %v2097_v35, %v2096_v33  ;;  %v2135_v39 = vadd.f32 %v2134_v36, %v2133_v34  ;;  %v2136_v40 = vpop.f32.mrb[18].mxu1 }
 0x11e   : > { %v2137_v41 = vpop.f32.mrb[19].mxu1 }
 0x11f   : > { %v1215_v43 = vadd.f32 %v2098_v38, %v1150_v44  ;;  %v2138_v45 = vadd.f32 %v2137_v41, %v2136_v40  ;;  %v1277_v46 = vadd.f32 %v2135_v39, %v1212_v37 }
 0x121   : > { %v2099_v28 = vpop.f32.mrb[20].mxu0  ;;  %v1280_v32 = vadd.f32 %v2138_v45, %v1215_v43 }
 0x122   : > { %v2100_v47 = vpop.f32.mrb[21].mxu0 }
 0x123   : > { %v2101_v48 = vadd.f32 %v2100_v47, %v2099_v28  ;;  %v2102_v49 = vpop.f32.mrb[22].mxu0  ;;  %v2139_v50 = vpop.f32.mrb[20].mxu1 }
 0x124   : > { %v2103_v52 = vpop.f32.mrb[23].mxu0  ;;  %v2140_v51 = vpop.f32.mrb[21].mxu1 }
 0x125   : > { %v1220_v53 = vadd.f32 %v2101_v48, %v1155_v57  ;;  %v2104_v54 = vadd.f32 %v2103_v52, %v2102_v49  ;;  %v2141_v55 = vadd.f32 %v2140_v51, %v2139_v50  ;;  %v2142_v56 = vpop.f32.mrb[22].mxu1 }
 0x126   : > { %v2143_v42 = vpop.f32.mrb[23].mxu1 }
 0x127   : > { %v1223_v58 = vadd.f32 %v2104_v54, %v1158_v59  ;;  %v2144_v60 = vadd.f32 %v2143_v42, %v2142_v56  ;;  %v1285_v61 = vadd.f32 %v2141_v55, %v1220_v53 }
 0x129   : > { %v2105_v63 = vpop.f32.mrb[24].mxu0  ;;  %v1288_v44 = vadd.f32 %v2144_v60, %v1223_v58  ;;  %v1619_v60 = vld [vmem:[%s2974_s7] sm:$0x3] }
 0x12a   : > { %v2106_v0 = vpop.f32.mrb[25].mxu0  ;;  %2360 = vmatprep.subr.msk.bf16.mxu1 %vm1640_vm1, %v1619_v60 }
 0x12b   : > { %v2107_v1 = vadd.f32 %v2106_v0, %v2105_v63  ;;  %v2108_v2 = vpop.f32.mrb[26].mxu0  ;;  %v2145_v3 = vpop.f32.mrb[24].mxu1  ;;  %v1607_v63 = vld [vmem:[%s347_s12] sm:$0xff]  ;;  %v1609_v0 = vld [vmem:[%s347_s12 + $0x10] sm:$0xff] }
 0x12c   : > { %v2109_v4 = vpop.f32.mrb[27].mxu0  ;;  %v2146_v62 = vpop.f32.mrb[25].mxu1 }
 0x12d   : > { %v1228_v5 = vadd.f32 %v2107_v1, %v1163_v9  ;;  %v2110_v6 = vadd.f32 %v2109_v4, %v2108_v2  ;;  %v2147_v7 = vadd.f32 %v2146_v62, %v2145_v3  ;;  %v2148_v8 = vpop.f32.mrb[26].mxu1  ;;  %v1610_v2 = vld [vmem:[%s347_s12 + $0x18] sm:$0xff]  ;;  %v1611_v3 = vld [vmem:[%s347_s12 + $0x20] sm:$0xff]  ;;  %v1612_v4 = vld [vmem:[%s347_s12 + $0x28] sm:$0xff] }
 0x12e   : > { %v2149_v57 = vpop.f32.mrb[27].mxu1  ;;  %v1616_v62 = vpack.c.bf16 %v1610_v2, %v1609_v0 }
 0x12f   : > { %v1231_v10 = vadd.f32 %v2110_v6, %v1166_v11  ;;  %v2150_v12 = vadd.f32 %v2149_v57, %v2148_v8  ;;  %v1293_v13 = vadd.f32 %v2147_v7, %v1228_v5  ;;  %v1617_v5 = vpack.c.bf16 %v1612_v4, %v1611_v3  ;;  %v1613_v6 = vld [vmem:[%s347_s12 + $0x30] sm:$0xff]  ;;  %v1614_v7 = vld [vmem:[%s347_s12 + $0x38] sm:$0xff]  ;;  %v1979_v3 = vld [vmem:[%s2971_s4] ss:$0 sm:$0xff] }
 0x130   : > { %v1618_v8 = vpack.c.bf16 %v1614_v7, %v1613_v6  ;;  %v1472_v57 = vlaneseq }
 0x131   : > { %v2111_v14 = vpop.f32.mrb[28].mxu0  ;;  %v1296_v59 = vadd.f32 %v2150_v12, %v1231_v10 }
 0x132   : > { %v2112_v15 = vpop.f32.mrb[29].mxu0  ;;  %v1473_v10 = vshrl.u32 %v1472_v57, 7 }
 0x133   : > { %v2113_v16 = vadd.f32 %v2112_v15, %v2111_v14  ;;  %v2114_v17 = vpop.f32.mrb[30].mxu0  ;;  %v2151_v18 = vpop.f32.mrb[28].mxu1 }
 0x134   : > { %v2115_v19 = vpop.f32.mrb[31].mxu0  ;;  %v2152_v20 = vpop.f32.mrb[29].mxu1  ;;  %v1474_v12 = vsub.s32 0, %v1473_v10 }
 0x135   : > { %v1236_v21 = vadd.f32 %v2113_v16, %v1171_v25  ;;  %v2116_v22 = vadd.f32 %v2115_v19, %v2114_v17  ;;  %v2153_v23 = vadd.f32 %v2152_v20, %v2151_v18  ;;  %v2154_v24 = vpop.f32.mrb[30].mxu1 }
 0x136   : > { %v2155_v9 = vpop.f32.mrb[31].mxu1 }
 0x137   : > { %v1239_v26 = vadd.f32 %v2116_v22, %v1174_v27  ;;  %v2156_v29 = vadd.f32 %v2155_v9, %v2154_v24  ;;  %v1301_v30 = vadd.f32 %v2153_v23, %v1236_v21 }
 0x139   : > { %v2226_v31 = vpop.f32.mrb[32].mxu0  ;;  %v1304_v11 = vadd.f32 %v2156_v29, %v1239_v26 }
 0x13a   : > { %v1350_v33 = vadd.f32 %v2226_v31, %v1285_v61  ;;  %v1341_v34 = vpop.f32.mrb[33].mxu0  ;;  %v1642_v61 = vsel %vm1640_vm1, %v1619_v60, 0 }
 0x13b   : > { %v1342_v35 = vadd.f32 %v1341_v34, %v1277_v46  ;;  %v2227_v36 = vpop.f32.mrb[34].mxu0 }
 0x13c   : > { %v1353_v37 = vadd.f32 %v2227_v36, %v1288_v44  ;;  %v1344_v38 = vpop.f32.mrb[35].mxu0  ;;  %v1608_v44 = vld [vmem:[%s347_s12 + $0x8] sm:$0xff] }
 0x13d   : > { %v1345_v39 = vadd.f32 %v1344_v38, %v1280_v32  ;;  %v1615_v1 = vpack.c.bf16 %v1608_v44, %v1607_v63 }
 0x13f   : > { %v1372_v40 = vadd.f32 %v1345_v39, %v1342_v35 }
 0x141   : > { %v1373_v41 = vadd.f32 %v1372_v40, %v1350_v33  ;;  %v2230_v43 = vpop.f32.mrb[36].mxu0 }
 0x142   : > { %v1366_v25 = vadd.f32 %v2230_v43, %v1301_v30  ;;  %v1357_v45 = vpop.f32.mrb[37].mxu0 }
 0x143   : > { %v1358_v28 = vadd.f32 %v1357_v45, %v1293_v13  ;;  %v1374_v47 = vadd.f32 %v1373_v41, %v1353_v37  ;;  %v2231_v48 = vpop.f32.mrb[38].mxu0 }
 0x144   : > { %v1369_v27 = vadd.f32 %v2231_v48, %v1304_v11  ;;  %v1360_v49 = vpop.f32.mrb[39].mxu0 }
 0x145   : > { %v1375_v50 = vadd.f32 %v1374_v47, %v1358_v28  ;;  %v1361_v52 = vadd.f32 %v1360_v49, %v1296_v59 }
 0x147   : > { %v1376_v51 = vadd.f32 %v1375_v50, %v1361_v52 }
 0x149   : > { %v1377_v46 = vadd.f32 %v1376_v51, %v1366_v25 }
 0x14b   : > { %v1378_v53 = vadd.f32 %v1377_v46, %v1369_v27 }
 0x14d   : > { %v1379_v54 = vrot.slane %v1378_v53, 4 }
 0x14f   : > { %v1380_v55 = vadd.f32 %v1379_v54, %v1378_v53 }
 0x151   : > { %v1381_v32 = vrot.slane %v1380_v55, 2 }
 0x153   : > { %v1382_v56 = vadd.f32 %v1381_v32, %v1380_v55 }
 0x155   : > { %v1383_v42 = vrot.slane %v1382_v56, 1 }
 0x157   : > { %v1384_v58 = vadd.f32 %v1383_v42, %v1382_v56  ;;  %v1578_v42 = vld [vmem:[%s2970_s3] sm:$0x1] }
 0x159   : > { %2265 = vmatmul.mubr.f32.vlgmr.msra.gmra.mrb[32].mxu1 %v1384_v58  ;;  %v1980_v58 = vld [vmem:[%s2975_s8] ss:$0 sm:$0xff] }
 0x15a   : > { %2303 = vmatpush3.bf16.msra.mxu1 %v1642_v61  ;;  %2304 = vmatprep.mubr.msk.bf16.mxu1 %vm1627_vm2, %v1615_v1 }
 0x15d   : > { %2305 = vmatmul.mubr.msk.bf16.vlgmr.msra.gmra.mrb[36].mxu1 %vm1627_vm2, %v1616_v62 }
 0x15e   : > { %2308 = vmatprep.mubr.msk.bf16.mxu1 %vm1627_vm2, %v1617_v5 }
 0x165   : > { %2309 = vmatmul.mubr.msk.bf16.gmra.mrb[40].mxu1 %vm1627_vm2, %v1618_v8 }
 0x22c   : > { %v1467_v13 = vpop.f32.mrb[32].mxu1 }
 0x22d   : > { %v1471_v14 = vmul.f32 0.015625, %v1467_v13  ;;  %v2266_v59 = vpop.f32.mrb[33].mxu1 }
 0x22f   : > { %v1475_v15 = vrot.slane %v1471_v14, %v1474_v12 }
 0x230   : > { %v2306_v49 = vpop.f32.mrb[36].mxu1 }
 0x231   : > { %v1476_v16 = vsub.f32 %v1342_v35, %v1475_v15  ;;  %v1477_v17 = vsub.f32 %v1345_v39, %v1475_v15  ;;  %v1478_v18 = vsub.f32 %v1350_v33, %v1475_v15  ;;  %v1479_v19 = vsub.f32 %v1353_v37, %v1475_v15  ;;  %v1678_v50 = vpop.f32.mrb[37].mxu1 }
 0x232   : > { %v1480_v22 = vsub.f32 %v1358_v28, %v1475_v15  ;;  %v1481_v9 = vsub.f32 %v1361_v52, %v1475_v15  ;;  %v1482_v30 = vsub.f32 %v1366_v25, %v1475_v15  ;;  %v1483_v34 = vsub.f32 %v1369_v27, %v1475_v15  ;;  %v2307_v25 = vpop.f32.mrb[38].mxu1 }
 0x233   : > { %v1484_v20 = vmul.f32 %v1476_v16, %v1476_v16  ;;  %v1485_v21 = vmul.f32 %v1477_v17, %v1477_v17  ;;  %v1486_v23 = vmul.f32 %v1478_v18, %v1478_v18  ;;  %v1487_v26 = vmul.f32 %v1479_v19, %v1479_v19  ;;  %v1681_v52 = vpop.f32.mrb[39].mxu1 }
 0x234   : > { %v1488_v31 = vmul.f32 %v1480_v22, %v1480_v22  ;;  %v1489_v36 = vmul.f32 %v1481_v9, %v1481_v9  ;;  %v1490_v40 = vmul.f32 %v1482_v30, %v1482_v30  ;;  %v1491_v35 = vmul.f32 %v1483_v34, %v1483_v34 }
 0x235   : > { %v1492_v24 = vadd.f32 %v1485_v21, %v1484_v20  ;;  %v1687_v63 = vadd.f32 %v2306_v49, %v1980_v58  ;;  %v1679_v0 = vadd.f32 %v1980_v58, %v1678_v50  ;;  %v1690_v1 = vadd.f32 %v2307_v25, %v1980_v58 }
 0x236   : > { %v1682_v2 = vadd.f32 %v1980_v58, %v1681_v52 }
 0x237   : > { %v1493_v29 = vadd.f32 %v1492_v24, %v1486_v23 }
 0x238   : > { %v2310_v51 = vpop.f32.mrb[40].mxu1 }
 0x239   : > { %v1494_v11 = vadd.f32 %v1493_v29, %v1487_v26  ;;  %v1694_v27 = vpop.f32.mrb[41].mxu1  ;;  %v1703_v4 = vadd.f32 %v2310_v51, %v1980_v58 }
 0x23a   : > { %v2311_v46 = vpop.f32.mrb[42].mxu1  ;;  %v1695_v62 = vadd.f32 %v1980_v58, %v1694_v27 }
 0x23b   : > { %v1495_v38 = vadd.f32 %v1494_v11, %v1488_v31  ;;  %v1697_v53 = vpop.f32.mrb[43].mxu1  ;;  %v1706_v5 = vadd.f32 %v2311_v46, %v1980_v58 }
 0x23c   : > { %v1698_v6 = vadd.f32 %v1980_v58, %v1697_v53 }
 0x23d   : > { %v1496_v41 = vadd.f32 %v1495_v38, %v1489_v36 }
 0x23f   : > { %v1497_v39 = vadd.f32 %v1496_v41, %v1490_v40 }
 0x241   : > { %v1498_v33 = vadd.f32 %v1497_v39, %v1491_v35 }
 0x243   : > { %v1499_v37 = vrot.slane %v1498_v33, 4 }
 0x245   : > { %v1500_v43 = vadd.f32 %v1499_v37, %v1498_v33 }
 0x247   : > { %v1501_v45 = vrot.slane %v1500_v43, 2 }
 0x249   : > { %v1502_v28 = vadd.f32 %v1501_v45, %v1500_v43 }
 0x24b   : > { %v1503_v47 = vrot.slane %v1502_v28, 1 }
 0x24d   : > { %v1504_v48 = vadd.f32 %v1503_v47, %v1502_v28 }
 0x24f   : > { %2300 = vmatmul.mubr.f32.vlgmr.msra.gmra.mrb[40].mxu0 %v1504_v48 }
 0x322   : > { %v1571_v54 = vpop.f32.mrb[40].mxu0 }
 0x323   : > { %v1575_v55 = vmul.f32 0.015625, %v1571_v54  ;;  %v2301_v32 = vpop.f32.mrb[41].mxu0 }
 0x325   : > { %v1576_v56 = vadd.f32 1e-05, %v1575_v55 }
 0x327   : > { %2445 = vrsqrt.f32 %v1576_v56 }
 0x331   : > { %v2446_v60 = vpop.eup %2445 }
 0x332   : > { %v1579_v61 = vmul.f32 %v2446_v60, %v1578_v42 }
 0x334   : > { %v1583_v44 = vrot.slane %v1579_v61, %v1474_v12 }
 0x336   : > { %v1586_v7 = vmul.f32 %v1583_v44, %v1478_v18  ;;  %v1584_v8 = vmul.f32 %v1583_v44, %v1476_v16  ;;  %v1587_v57 = vmul.f32 %v1583_v44, %v1479_v19  ;;  %v1585_v10 = vmul.f32 %v1583_v44, %v1477_v17 }
 0x337   : > { %v1590_v13 = vmul.f32 %v1583_v44, %v1482_v30  ;;  %v1588_v14 = vmul.f32 %v1583_v44, %v1480_v22  ;;  %v1591_v59 = vmul.f32 %v1583_v44, %v1483_v34  ;;  %v1589_v15 = vmul.f32 %v1583_v44, %v1481_v9 }
 0x338   : > { %v1601_v12 = vadd.f32 %v1979_v3, %v1586_v7  ;;  %v1599_v20 = vadd.f32 %v1979_v3, %v1584_v8  ;;  %v1602_v21 = vadd.f32 %v1979_v3, %v1587_v57  ;;  %v1600_v23 = vadd.f32 %v1979_v3, %v1585_v10 }
 0x339   : > { %v1605_v24 = vadd.f32 %v1979_v3, %v1590_v13  ;;  %v1603_v26 = vadd.f32 %v1979_v3, %v1588_v14  ;;  %v1606_v29 = vadd.f32 %v1979_v3, %v1591_v59  ;;  %v1604_v31 = vadd.f32 %v1979_v3, %v1589_v15 }
 0x33a   : > { %v1711_v11 = vadd.f32 %v1687_v63, %v1601_v12  ;;  %v1709_v36 = vadd.f32 %v1679_v0, %v1599_v20  ;;  %v1712_v38 = vadd.f32 %v1690_v1, %v1602_v21  ;;  %v1710_v40 = vadd.f32 %v1682_v2, %v1600_v23 }
 0x33b   : > { %v1715_v18 = vadd.f32 %v1703_v4, %v1605_v24  ;;  %v1713_v16 = vadd.f32 %v1695_v62, %v1603_v26  ;;  %v1716_v19 = vadd.f32 %v1706_v5, %v1606_v29  ;;  %v2955_v17 = vadd.f32 %v1698_v6, %v1604_v31 }
 0x33c   : > { %v1987_v22 = vmul.f32 -1.442695, %v1711_v11  ;;  %v1985_v30 = vmul.f32 -1.442695, %v1709_v36  ;;  %v1988_v9 = vmul.f32 -1.442695, %v1712_v38 }
 0x33d   : > { %v1986_v34 = vmul.f32 -1.442695, %v1710_v40  ;;  %v1991_v41 = vmul.f32 -1.442695, %v1715_v18  ;;  %v1989_v35 = vmul.f32 -1.442695, %v1713_v16 }
 0x33e   : > { %2447 = vpow2.f32 %v1987_v22  ;;  %v1992_v39 = vmul.f32 -1.442695, %v1716_v19  ;;  %v1990_v33 = vmul.f32 -1.442695, %v2955_v17 }
 0x33f   : > { %2449 = vpow2.f32 %v1985_v30 }
 0x340   : > { %2451 = vpow2.f32 %v1988_v9 }
 0x341   : > { %2453 = vpow2.f32 %v1986_v34 }
 0x342   : > { %2455 = vpow2.f32 %v1991_v41 }
 0x343   : > { %2457 = vpow2.f32 %v1989_v35 }
 0x344   : > { %2459 = vpow2.f32 %v1992_v39 }
 0x345   : > { %2461 = vpow2.f32 %v1990_v33 }
 0x348   : > { %v2448_v37 = vpop.eup %2447 }
 0x349   : > { %v2450_v43 = vpop.eup %2449  ;;  %v1743_v45 = vadd.f32 1.0, %v2448_v37 }
 0x34a   : > { %v2452_v28 = vpop.eup %2451  ;;  %v1741_v47 = vadd.f32 1.0, %v2450_v43 }
 0x34b   : > { %v2454_v48 = vpop.eup %2453  ;;  %2463 = vrcp.f32 %v1743_v45  ;;  %v1744_v49 = vadd.f32 1.0, %v2452_v28 }
 0x34c   : > { %v2456_v50 = vpop.eup %2455  ;;  %2465 = vrcp.f32 %v1741_v47  ;;  %v1742_v25 = vadd.f32 1.0, %v2454_v48 }
 0x34d   : > { %v2458_v52 = vpop.eup %2457  ;;  %2467 = vrcp.f32 %v1744_v49  ;;  %v1747_v51 = vadd.f32 1.0, %v2456_v50 }
 0x34e   : > { %v2460_v27 = vpop.eup %2459  ;;  %2469 = vrcp.f32 %v1742_v25  ;;  %v1745_v46 = vadd.f32 1.0, %v2458_v52 }
 0x34f   : > { %v2462_v53 = vpop.eup %2461  ;;  %2471 = vrcp.f32 %v1747_v51  ;;  %v1748_v54 = vadd.f32 1.0, %v2460_v27 }
 0x350   : > { %2473 = vrcp.f32 %v1745_v46  ;;  %v1746_v55 = vadd.f32 1.0, %v2462_v53 }
 0x351   : > { %2475 = vrcp.f32 %v1748_v54 }
 0x352   : > { %2477 = vrcp.f32 %v1746_v55 }
 0x355   : > { %v2464_v32 = vpop.eup %2463 }
 0x356   : > { %v2466_v56 = vpop.eup %2465  ;;  %v1767_v42 = vmul.f32 %v2464_v32, %v1711_v11 }
 0x357   : > { %v2468_v58 = vpop.eup %2467  ;;  %v1765_v60 = vmul.f32 %v2466_v56, %v1709_v36 }
 0x358   : > { %v2470_v61 = vpop.eup %2469  ;;  %1775 = vst [vmem:[%s352_s21 + $0x10] sm:$0xff] %v1767_v42  ;;  %v1768_v63 = vmul.f32 %v2468_v58, %v1712_v38 }
 0x359   : > { %v2472_v44 = vpop.eup %2471  ;;  %1773 = vst [vmem:[%s352_s21] sm:$0xff] %v1765_v60  ;;  %v1766_v0 = vmul.f32 %v2470_v61, %v1710_v40 }
 0x35a   : > { %v2474_v1 = vpop.eup %2473  ;;  %1776 = vst [vmem:[%s352_s21 + $0x18] sm:$0xff] %v1768_v63  ;;  %v1771_v2 = vmul.f32 %v2472_v44, %v1715_v18 }
 0x35b   : > { %v2476_v3 = vpop.eup %2475  ;;  %1774 = vst [vmem:[%s352_s21 + $0x8] sm:$0xff] %v1766_v0  ;;  %v1769_v4 = vmul.f32 %v2474_v1, %v1713_v16 }
 0x35c   : > { %v2478_v62 = vpop.eup %2477  ;;  %1779 = vst [vmem:[%s352_s21 + $0x30] sm:$0xff] %v1771_v2  ;;  %v1772_v5 = vmul.f32 %v2476_v3, %v1716_v19 }
 0x35d   : > { %1777 = vst [vmem:[%s352_s21 + $0x20] sm:$0xff] %v1769_v4  ;;  %v1770_v6 = vmul.f32 %v2478_v62, %v2955_v17 }
 0x35e   : > { %1780 = vst [vmem:[%s352_s21 + $0x38] sm:$0xff] %v1772_v5 }
 0x35f   : > { %1778 = vst [vmem:[%s352_s21 + $0x28] sm:$0xff] %v1770_v6 }
 0x360 PF: > { %s19_s30 = sadd.s32 1, %s2485_s30  }
 0x361   : > { %p16_p4 = scmp.ge.s32.totalorder %s19_s30, 4  }
 0x363   :  { %18 = sbr.rel (!%p16_p4) target bundleno = 1 (0x1), region = 91 }

</bundles_post_ra>
